<compile_context>
chip_gen: v7x
topology: tpu7x:2x2x1
jax: 0.10.0
libtpu: 0.0.40
codegen_flags: <defaults>
</compile_context>

<pallas_src>
import functools

import jax
import jax.numpy as jnp
from jax.experimental import pallas as pl
from jax.experimental.pallas import tpu as pltpu

HIDDEN = 128


def sdfnet_kernel(x_ref, w1_ref, w2_ref, b2_ref, w3_ref, b3_ref, o_ref):
    # ---- fc1 (+ bias folded into the contraction): MXU ----
    # w1_ref: [128, K1], x_ref: [K1, tile_n]  (K1 = C + 1 ones-row, padded to 8)
    h = jnp.dot(w1_ref[...], x_ref[...], preferred_element_type=jnp.float32)
    h = jnp.maximum(h, 0.0)
    # TODO(synk): training-mode dropout (random mask + 1/(1-p) scale) omitted;
    # eval-mode (identity) semantics used.

    # ---- fc2: MXU, f32 operands + f32 accumulation ----
    h = jnp.dot(w2_ref[...], h, preferred_element_type=jnp.float32)
    h = jnp.maximum(h + b2_ref[...], 0.0)

    # ---- fc3: MXU with sublane-padded [8, 128] weight (row 0 is the real one) ----
    out = jnp.dot(w3_ref[...], h, preferred_element_type=jnp.float32)  # [8, tile_n]
    # Only row 0 is valid; add bias and tanh on the lane-dense [1, tile_n] slice.
    o_ref[...] = jnp.tanh(out[0:1, :] + b3_ref[...]).astype(o_ref.dtype)


@functools.partial(jax.jit, static_argnames=("tile_n",))
def sdfnet_forward(x, params, *, tile_n=2048):
    """x: [N, C] float32.  params: PyTorch-convention weights/biases."""
    assert tile_n % 128 == 0, "tile_n must be a multiple of the 128-wide lane axis"
    N, C = x.shape
    w1, b1 = params["w1"], params["b1"]           # [128, C], [128]
    w2, b2 = params["w2"], params["b2"]           # [128, 128], [128]
    w3, b3 = params["w3"], params["b3"]           # [1, 128], [1]

    # fc1 bias fold: append a bias column to w1 and a ones row to x; pad the
    # contraction dim up to a sublane multiple of 8 with zeros (contributes 0).
    k1 = max(8, pl.cdiv(C + 1, 8) * 8)
    w1_aug = jnp.zeros((HIDDEN, k1), jnp.float32)
    w1_aug = w1_aug.at[:, :C].set(w1).at[:, C].set(b1)

    # Feature-major transpose + pad N to a multiple of tile_n (layout plumbing).
    # TODO(synk): if the upstream producer can emit feature-major [C, N] data,
    # this relayout pass can be dropped entirely.
    n_pad = pl.cdiv(N, tile_n) * tile_n
    x_aug = jnp.zeros((k1, n_pad), x.dtype)
    x_aug = x_aug.at[:C, :N].set(x.T)
    x_aug = x_aug.at[C, :N].set(1.0)              # ones row -> fc1 bias

    b2_col = b2.reshape(HIDDEN, 1)
    w3_pad = jnp.zeros((8, HIDDEN), jnp.float32).at[0:1, :].set(w3)  # sublane pad
    b3_2d = b3.reshape(1, 1)

    grid = (n_pad // tile_n,)
    out = pl.pallas_call(
        sdfnet_kernel,
        out_shape=jax.ShapeDtypeStruct((1, n_pad), x.dtype),
        grid_spec=pltpu.PrefetchScalarGridSpec(
            num_scalar_prefetch=0,
            grid=grid,
            in_specs=[
                pl.BlockSpec((k1, tile_n), lambda i: (0, i)),       # x tile
                pl.BlockSpec((HIDDEN, k1), lambda i: (0, 0)),       # w1 (+bias col)
                pl.BlockSpec((HIDDEN, HIDDEN), lambda i: (0, 0)),   # w2
                pl.BlockSpec((HIDDEN, 1), lambda i: (0, 0)),        # b2
                pl.BlockSpec((8, HIDDEN), lambda i: (0, 0)),        # w3 (padded row)
                pl.BlockSpec((1, 1), lambda i: (0, 0)),             # b3
            ],
            out_specs=pl.BlockSpec((1, tile_n), lambda i: (0, i)),   # lane-dense
        ),
        compiler_params=pltpu.CompilerParams(
            # Per-tile live VMEM is only a few [128, tile_n] f32 tensors
            # (~1 MiB each at tile_n=2048); raise vmem_limit_bytes here only if
            # sweeping tile_n >= 8192 (v5e's default scoped limit is 16 MiB).
            dimension_semantics=("parallel",)),
    )(x_aug, w1_aug, w2, b2_col, w3_pad, b3_2d)

    return out[0, :N].reshape(N, 1)


def init_params(key, ninputchannels):
    """Xavier-normal weights (PyTorch [out, in] convention), zero biases
    (matches SDFNet.init_weights)."""
    k1, k2, k3 = jax.random.split(key, 3)

    def xavier_normal(k, shape):
        fan_out, fan_in = shape
        std = (2.0 / (fan_in + fan_out)) ** 0.5
        return std * jax.random.normal(k, shape, dtype=jnp.float32)

    return {
        "w1": xavier_normal(k1, (HIDDEN, ninputchannels)),
        "b1": jnp.zeros((HIDDEN,), jnp.float32),
        "w2": xavier_normal(k2, (HIDDEN, HIDDEN)),
        "b2": jnp.zeros((HIDDEN,), jnp.float32),
        "w3": xavier_normal(k3, (1, HIDDEN)),
        "b3": jnp.zeros((1,), jnp.float32),
    }


def sdfnet_ref(x, p):
    """Pure-JAX reference (batch-major), f32 throughout."""
    h = jnp.maximum(x @ p["w1"].T + p["b1"], 0.0)
    h = jnp.maximum(h @ p["w2"].T + p["b2"], 0.0)
    return jnp.tanh(h @ p["w3"].T + p["b3"])


if __name__ == "__main__":
    key = jax.random.PRNGKey(0)
    kx, kp = jax.random.split(key)

    ninputchannels = 4
    N = 300                      # deliberately NOT a multiple of tile_n
    x = jax.random.normal(kx, (N, ninputchannels), dtype=jnp.float32)
    params = init_params(kp, ninputchannels)
    ref = sdfnet_ref(x, params)

    # Production default: large tiles (tile_n=2048 here -> single grid step for
    # this small demo batch; padding tail is sliced off in the wrapper).
    out = jax.block_until_ready(sdfnet_forward(x, params))
    assert out.shape == (N, 1)
    err = float(jnp.max(jnp.abs(out - ref)))
    assert err < 2e-2, f"mismatch vs reference: max abs err {err}"

    # Also exercise the multi-step grid + padding path for correctness.
    out_multi = jax.block_until_ready(sdfnet_forward(x, params, tile_n=128))
    err_multi = float(jnp.max(jnp.abs(out_multi - ref)))
    assert err_multi < 2e-2, f"multi-tile mismatch: max abs err {err_multi}"

    print("KERNEL_OK")
</pallas_src>

<mosaic_0001>
module attributes {stable_mosaic.version = 11 : i64} {
  func.func @sdfnet_kernel(%arg0: i32, %arg1: memref<8x2048xf32, #tpu.memory_space<vmem>>, %arg2: memref<128x8xf32, #tpu.memory_space<vmem>>, %arg3: memref<128x128xf32, #tpu.memory_space<vmem>>, %arg4: memref<128x1xf32, #tpu.memory_space<vmem>>, %arg5: memref<8x128xf32, #tpu.memory_space<vmem>>, %arg6: memref<1x1xf32, #tpu.memory_space<vmem>>, %arg7: memref<1x2048xf32, #tpu.memory_space<vmem>>) attributes {dimension_semantics = [#tpu.dimension_semantics<parallel>], iteration_bounds = array<i64: 1>, scalar_prefetch = 0 : i64, scratch_operands = 0 : i64, tpu.core_type = #tpu.core_type<tc>, window_params = [{transform_indices = @transform_0, window_bounds = array<i64: 8, 2048>}, {pipeline_mode = #tpu.pipeline_mode<synchronous>, transform_indices = @transform_1, window_bounds = array<i64: 128, 8>}, {pipeline_mode = #tpu.pipeline_mode<synchronous>, transform_indices = @transform_2, window_bounds = array<i64: 128, 128>}, {pipeline_mode = #tpu.pipeline_mode<synchronous>, transform_indices = @transform_3, window_bounds = array<i64: 128, 1>}, {pipeline_mode = #tpu.pipeline_mode<synchronous>, transform_indices = @transform_4, window_bounds = array<i64: 8, 128>}, {pipeline_mode = #tpu.pipeline_mode<synchronous>, transform_indices = @transform_5, window_bounds = array<i64: 1, 1>}, {transform_indices = @transform_6, window_bounds = array<i64: 1, 2048>}]} {
    %c0 = arith.constant 0 : index
    %c0_0 = arith.constant 0 : index
    %0 = vector.load %arg2[%c0, %c0_0] : memref<128x8xf32, #tpu.memory_space<vmem>>, vector<128x8xf32>
    %c0_1 = arith.constant 0 : index
    %c0_2 = arith.constant 0 : index
    %1 = vector.load %arg1[%c0_1, %c0_2] : memref<8x2048xf32, #tpu.memory_space<vmem>>, vector<8x2048xf32>
    %cst = arith.constant dense<0.000000e+00> : vector<128x2048xf32>
    %2 = tpu.matmul %0, %1, %cst {dimension_numbers = #tpu.dot_dimension_numbers<[1], [0], [0], [1], [0, 0, 1, 1], [], []>} : vector<128x8xf32>, vector<8x2048xf32>, vector<128x2048xf32> -> vector<128x2048xf32>
    %cst_3 = arith.constant 0.000000e+00 : f32
    %3 = vector.broadcast %cst_3 : f32 to vector<128x2048xf32>
    %4 = arith.maximumf %2, %3 : vector<128x2048xf32>
    %c0_4 = arith.constant 0 : index
    %c0_5 = arith.constant 0 : index
    %5 = vector.load %arg3[%c0_4, %c0_5] : memref<128x128xf32, #tpu.memory_space<vmem>>, vector<128x128xf32>
    %cst_6 = arith.constant dense<0.000000e+00> : vector<128x2048xf32>
    %6 = tpu.matmul %5, %4, %cst_6 {dimension_numbers = #tpu.dot_dimension_numbers<[1], [0], [0], [1], [0, 0, 1, 1], [], []>} : vector<128x128xf32>, vector<128x2048xf32>, vector<128x2048xf32> -> vector<128x2048xf32>
    %c0_7 = arith.constant 0 : index
    %c0_8 = arith.constant 0 : index
    %7 = vector.load %arg4[%c0_7, %c0_8] : memref<128x1xf32, #tpu.memory_space<vmem>>, vector<128x1xf32>
    %8 = vector.broadcast %7 : vector<128x1xf32> to vector<128x2048xf32>
    %9 = arith.addf %6, %8 : vector<128x2048xf32>
    %cst_9 = arith.constant 0.000000e+00 : f32
    %10 = vector.broadcast %cst_9 : f32 to vector<128x2048xf32>
    %11 = arith.maximumf %9, %10 : vector<128x2048xf32>
    %c0_10 = arith.constant 0 : index
    %c0_11 = arith.constant 0 : index
    %12 = vector.load %arg5[%c0_10, %c0_11] : memref<8x128xf32, #tpu.memory_space<vmem>>, vector<8x128xf32>
    %cst_12 = arith.constant dense<0.000000e+00> : vector<8x2048xf32>
    %13 = tpu.matmul %12, %11, %cst_12 {dimension_numbers = #tpu.dot_dimension_numbers<[1], [0], [0], [1], [0, 0, 1, 1], [], []>} : vector<8x128xf32>, vector<128x2048xf32>, vector<8x2048xf32> -> vector<8x2048xf32>
    %14 = vector.extract_strided_slice %13 {offsets = [0, 0], sizes = [1, 2048], strides = [1, 1]} : vector<8x2048xf32> to vector<1x2048xf32>
    %c0_13 = arith.constant 0 : index
    %c0_14 = arith.constant 0 : index
    %15 = vector.load %arg6[%c0_13, %c0_14] : memref<1x1xf32, #tpu.memory_space<vmem>>, vector<1x1xf32>
    %16 = vector.broadcast %15 : vector<1x1xf32> to vector<1x2048xf32>
    %17 = arith.addf %14, %16 : vector<1x2048xf32>
    %18 = math.tanh %17 : vector<1x2048xf32>
    %c0_15 = arith.constant 0 : index
    %c0_16 = arith.constant 0 : index
    %19 = vector.load %arg7[%c0_15, %c0_16] : memref<1x2048xf32, #tpu.memory_space<vmem>>, vector<1x2048xf32>
    tpu.vector_store %arg7[%c0_15, %c0_16], %18 {strides = array<i32>} : memref<1x2048xf32, #tpu.memory_space<vmem>>, vector<1x2048xf32>,
    return
  }
  func.func @transform_0(%arg0: i32) -> (i32, i32) {
    %c0_i32 = arith.constant 0 : i32
    %c0_i32_0 = arith.constant 0 : i32
    return %c0_i32, %arg0 : i32, i32
  }
  func.func @transform_1(%arg0: i32) -> (i32, i32) {
    %c0_i32 = arith.constant 0 : i32
    %c0_i32_0 = arith.constant 0 : i32
    %c0_i32_1 = arith.constant 0 : i32
    return %c0_i32, %c0_i32_0 : i32, i32
  }
  func.func @transform_2(%arg0: i32) -> (i32, i32) {
    %c0_i32 = arith.constant 0 : i32
    %c0_i32_0 = arith.constant 0 : i32
    %c0_i32_1 = arith.constant 0 : i32
    return %c0_i32, %c0_i32_0 : i32, i32
  }
  func.func @transform_3(%arg0: i32) -> (i32, i32) {
    %c0_i32 = arith.constant 0 : i32
    %c0_i32_0 = arith.constant 0 : i32
    %c0_i32_1 = arith.constant 0 : i32
    return %c0_i32, %c0_i32_0 : i32, i32
  }
  func.func @transform_4(%arg0: i32) -> (i32, i32) {
    %c0_i32 = arith.constant 0 : i32
    %c0_i32_0 = arith.constant 0 : i32
    %c0_i32_1 = arith.constant 0 : i32
    return %c0_i32, %c0_i32_0 : i32, i32
  }
  func.func @transform_5(%arg0: i32) -> (i32, i32) {
    %c0_i32 = arith.constant 0 : i32
    %c0_i32_0 = arith.constant 0 : i32
    %c0_i32_1 = arith.constant 0 : i32
    return %c0_i32, %c0_i32_0 : i32, i32
  }
  func.func @transform_6(%arg0: i32) -> (i32, i32) {
    %c0_i32 = arith.constant 0 : i32
    %c0_i32_0 = arith.constant 0 : i32
    return %c0_i32, %arg0 : i32, i32
  }
}

</mosaic_0001>

<bundles_post_ra>
// kernel: sdfnet_forward.1
= control target key start
LH: loop header
LB: loop body
LE: loop exit
PB: predicated region body
PF: predicated region fallthrough
CT: control target
= control target key end

     0   :  { %v4733_v3 = vmov 0.0   ;;  %vm57_vm0 = vcmask 64512   ;;  %s6102_s0 = inlined_call_operand.vmem [shape: f32[8,2048], index: 0, kind: input, shape index: {}]   ;;  %s6103_s1 = inlined_call_operand.vmem [shape: f32[128,8], index: 1, kind: input, shape index: {}]   ;;  %s6104_s3 = inlined_call_operand.vmem [shape: f32[128,1], index: 3, kind: input, shape index: {}]   ;;  %s6105_s2 = inlined_call_operand.vmem [shape: f32[128,128], index: 2, kind: input, shape index: {}]   ;;  %s6106_s5 = inlined_call_operand.<no memory space> [shape: f32[1,1], index: 5, kind: input, shape index: {}]   ;;  %s6107_s4 = inlined_call_operand.vmem [shape: f32[8,128], index: 4, kind: input, shape index: {}]   ;;  %s6108_s6 = inlined_call_operand.vmem [shape: f32[1,2048], index: 6, kind: output, shape index: {}]  }
   0x1   :  { %v42_v0 = vld [vmem:[%s6102_s0 + $0x8] sm:$0xff]  ;;  %v44_v1 = vld [vmem:[%s6102_s0 + $0x18] sm:$0xff]  ;;  %v41_v2 = vld [vmem:[%s6102_s0] sm:$0xff]  ;;  %170 = vmatprep.mubr.f32.mxu0 %v4733_v3  ;;  %331 = vmatprep.mubr.f32.mxu1 %v4733_v3 }
   0x2   :  { %106 = vmatprep.subr.mxu0 %v42_v0  ;;  %267 = vmatprep.subr.mxu1 %v44_v1  ;;  %v43_v4 = vld [vmem:[%s6102_s0 + $0x10] sm:$0xff]  ;;  %v4788_v5 = vld [vmem:[%s6103_s1] sm:$0xff]  ;;  %v46_v6 = vld [vmem:[%s6102_s0 + $0x28] sm:$0xff] }
   0x3   :  { %107 = vmatpush1.msra.mxu0 %v41_v2  ;;  %268 = vmatpush1.msra.mxu1 %v43_v4  ;;  %v48_v7 = vld [vmem:[%s6102_s0 + $0x38] sm:$0xff]  ;;  %v45_v8 = vld [vmem:[%s6102_s0 + $0x20] sm:$0xff]  ;;  %v47_v9 = vld [vmem:[%s6102_s0 + $0x30] sm:$0xff] }
   0x4   :  { %4039 = vmatmul.mubr.msk.f32.vlgmr.msra.gmra.mrb[0].mxu0 %vm57_vm0, %v4788_v5  ;;  %4055 = vmatmul.mubr.msk.f32.vlgmr.msra.gmra.mrb[0].mxu1 %vm57_vm0, %v4788_v5  ;;  %v4811_v10 = vld [vmem:[%s6103_s1 + $0x8] sm:$0xff]  ;;  %v4822_v11 = vld [vmem:[%s6103_s1 + $0x10] sm:$0xff]  ;;  %v52_v13 = vld [vmem:[%s6102_s0 + $0x58] sm:$0xff] }
   0x5   :  { %176 = vmatprep.mubr.f32.mxu0 %v4733_v3  ;;  %337 = vmatprep.mubr.f32.mxu1 %v4733_v3  ;;  %v50_v12 = vld [vmem:[%s6102_s0 + $0x48] sm:$0xff]  ;;  %v4839_v14 = vld [vmem:[%s6103_s1 + $0x18] sm:$0xff]  ;;  %v4850_v15 = vld [vmem:[%s6103_s1 + $0x20] sm:$0xff] }
   0x6   :  { %428 = vmatprep.subr.mxu0 %v46_v6  ;;  %589 = vmatprep.subr.mxu1 %v48_v7  ;;  %v4861_v16 = vld [vmem:[%s6103_s1 + $0x28] sm:$0xff]  ;;  %v4872_v17 = vld [vmem:[%s6103_s1 + $0x30] sm:$0xff]  ;;  %v4883_v18 = vld [vmem:[%s6103_s1 + $0x38] sm:$0xff] }
   0x7   :  { %429 = vmatpush1.msra.mxu0 %v45_v8  ;;  %590 = vmatpush1.msra.mxu1 %v47_v9  ;;  %v4894_v19 = vld [vmem:[%s6103_s1 + $0x40] sm:$0xff]  ;;  %v4905_v20 = vld [vmem:[%s6103_s1 + $0x48] sm:$0xff]  ;;  %v4916_v21 = vld [vmem:[%s6103_s1 + $0x50] sm:$0xff] }
   0x8   :  { %4040 = vmatmul.mubr.msk.f32.gmra.mrb[2].mxu0 %vm57_vm0, %v4811_v10  ;;  %4056 = vmatmul.mubr.msk.f32.gmra.mrb[2].mxu1 %vm57_vm0, %v4811_v10  ;;  %v4927_v22 = vld [vmem:[%s6103_s1 + $0x58] sm:$0xff]  ;;  %v4938_v23 = vld [vmem:[%s6103_s1 + $0x60] sm:$0xff]  ;;  %v4949_v24 = vld [vmem:[%s6103_s1 + $0x68] sm:$0xff] }
   0x9   :  { %182 = vmatprep.mubr.f32.mxu0 %v4733_v3  ;;  %343 = vmatprep.mubr.f32.mxu1 %v4733_v3  ;;  %v4960_v25 = vld [vmem:[%s6103_s1 + $0x70] sm:$0xff]  ;;  %v4971_v26 = vld [vmem:[%s6103_s1 + $0x78] sm:$0xff]  ;;  %v49_v27 = vld [vmem:[%s6102_s0 + $0x40] sm:$0xff] }
   0xa   :  { %750 = vmatprep.subr.mxu0 %v50_v12  ;;  %911 = vmatprep.subr.mxu1 %v52_v13  ;;  %v51_v28 = vld [vmem:[%s6102_s0 + $0x50] sm:$0xff]  ;;  %v54_v29 = vld [vmem:[%s6102_s0 + $0x68] sm:$0xff]  ;;  %v56_v30 = vld [vmem:[%s6102_s0 + $0x78] sm:$0xff] }
   0xb   :  { %v53_v31 = vld [vmem:[%s6102_s0 + $0x60] sm:$0xff]  ;;  %v55_v32 = vld [vmem:[%s6102_s0 + $0x70] sm:$0xff] }
   0xc   :  { %4041 = vmatmul.mubr.msk.f32.gmra.mrb[4].mxu0 %vm57_vm0, %v4822_v11  ;;  %4057 = vmatmul.mubr.msk.f32.gmra.mrb[4].mxu1 %vm57_vm0, %v4822_v11 }
   0xd   :  { %188 = vmatprep.mubr.f32.mxu0 %v4733_v3  ;;  %349 = vmatprep.mubr.f32.mxu1 %v4733_v3 }
  0x10   :  { %4042 = vmatmul.mubr.msk.f32.gmra.mrb[6].mxu0 %vm57_vm0, %v4839_v14  ;;  %4058 = vmatmul.mubr.msk.f32.gmra.mrb[6].mxu1 %vm57_vm0, %v4839_v14 }
  0x11   :  { %194 = vmatprep.mubr.f32.mxu0 %v4733_v3  ;;  %355 = vmatprep.mubr.f32.mxu1 %v4733_v3 }
  0x14   :  { %4043 = vmatmul.mubr.msk.f32.gmra.mrb[8].mxu0 %vm57_vm0, %v4850_v15  ;;  %4059 = vmatmul.mubr.msk.f32.gmra.mrb[8].mxu1 %vm57_vm0, %v4850_v15 }
  0x15   :  { %200 = vmatprep.mubr.f32.mxu0 %v4733_v3  ;;  %361 = vmatprep.mubr.f32.mxu1 %v4733_v3 }
  0x18   :  { %4044 = vmatmul.mubr.msk.f32.gmra.mrb[10].mxu0 %vm57_vm0, %v4861_v16  ;;  %4060 = vmatmul.mubr.msk.f32.gmra.mrb[10].mxu1 %vm57_vm0, %v4861_v16 }
  0x19   :  { %206 = vmatprep.mubr.f32.mxu0 %v4733_v3  ;;  %367 = vmatprep.mubr.f32.mxu1 %v4733_v3 }
  0x1c   :  { %4045 = vmatmul.mubr.msk.f32.gmra.mrb[12].mxu0 %vm57_vm0, %v4872_v17  ;;  %4061 = vmatmul.mubr.msk.f32.gmra.mrb[12].mxu1 %vm57_vm0, %v4872_v17 }
  0x1d   :  { %212 = vmatprep.mubr.f32.mxu0 %v4733_v3  ;;  %373 = vmatprep.mubr.f32.mxu1 %v4733_v3 }
  0x20   :  { %4046 = vmatmul.mubr.msk.f32.gmra.mrb[14].mxu0 %vm57_vm0, %v4883_v18  ;;  %4062 = vmatmul.mubr.msk.f32.gmra.mrb[14].mxu1 %vm57_vm0, %v4883_v18 }
  0x21   :  { %218 = vmatprep.mubr.f32.mxu0 %v4733_v3  ;;  %379 = vmatprep.mubr.f32.mxu1 %v4733_v3 }
  0x24   :  { %4047 = vmatmul.mubr.msk.f32.gmra.mrb[16].mxu0 %vm57_vm0, %v4894_v19  ;;  %4063 = vmatmul.mubr.msk.f32.gmra.mrb[16].mxu1 %vm57_vm0, %v4894_v19 }
  0x25   :  { %224 = vmatprep.mubr.f32.mxu0 %v4733_v3  ;;  %385 = vmatprep.mubr.f32.mxu1 %v4733_v3 }
  0x28   :  { %4048 = vmatmul.mubr.msk.f32.gmra.mrb[18].mxu0 %vm57_vm0, %v4905_v20  ;;  %4064 = vmatmul.mubr.msk.f32.gmra.mrb[18].mxu1 %vm57_vm0, %v4905_v20 }
  0x29   :  { %230 = vmatprep.mubr.f32.mxu0 %v4733_v3  ;;  %391 = vmatprep.mubr.f32.mxu1 %v4733_v3 }
  0x2c   :  { %4049 = vmatmul.mubr.msk.f32.gmra.mrb[20].mxu0 %vm57_vm0, %v4916_v21  ;;  %4065 = vmatmul.mubr.msk.f32.gmra.mrb[20].mxu1 %vm57_vm0, %v4916_v21 }
  0x2d   :  { %236 = vmatprep.mubr.f32.mxu0 %v4733_v3  ;;  %397 = vmatprep.mubr.f32.mxu1 %v4733_v3 }
  0x30   :  { %4050 = vmatmul.mubr.msk.f32.gmra.mrb[22].mxu0 %vm57_vm0, %v4927_v22  ;;  %4066 = vmatmul.mubr.msk.f32.gmra.mrb[22].mxu1 %vm57_vm0, %v4927_v22 }
  0x31   :  { %242 = vmatprep.mubr.f32.mxu0 %v4733_v3  ;;  %403 = vmatprep.mubr.f32.mxu1 %v4733_v3 }
  0x34   :  { %4051 = vmatmul.mubr.msk.f32.gmra.mrb[24].mxu0 %vm57_vm0, %v4938_v23  ;;  %4067 = vmatmul.mubr.msk.f32.gmra.mrb[24].mxu1 %vm57_vm0, %v4938_v23 }
  0x35   :  { %248 = vmatprep.mubr.f32.mxu0 %v4733_v3  ;;  %409 = vmatprep.mubr.f32.mxu1 %v4733_v3 }
  0x38   :  { %4052 = vmatmul.mubr.msk.f32.gmra.mrb[26].mxu0 %vm57_vm0, %v4949_v24  ;;  %4068 = vmatmul.mubr.msk.f32.gmra.mrb[26].mxu1 %vm57_vm0, %v4949_v24 }
  0x39   :  { %254 = vmatprep.mubr.f32.mxu0 %v4733_v3  ;;  %415 = vmatprep.mubr.f32.mxu1 %v4733_v3 }
  0x3c   :  { %4053 = vmatmul.mubr.msk.f32.gmra.mrb[28].mxu0 %vm57_vm0, %v4960_v25  ;;  %4069 = vmatmul.mubr.msk.f32.gmra.mrb[28].mxu1 %vm57_vm0, %v4960_v25 }
  0x3d   :  { %260 = vmatprep.mubr.f32.mxu0 %v4733_v3  ;;  %421 = vmatprep.mubr.f32.mxu1 %v4733_v3 }
  0x40   :  { %4054 = vmatmul.mubr.msk.f32.gmra.mrb[30].mxu0 %vm57_vm0, %v4971_v26  ;;  %4070 = vmatmul.mubr.msk.f32.gmra.mrb[30].mxu1 %vm57_vm0, %v4971_v26 }
  0x41   :  { %492 = vmatprep.mubr.f32.mxu0 %v4733_v3  ;;  %653 = vmatprep.mubr.f32.mxu1 %v4733_v3 }
  0x44   :  { %4071 = vmatmul.mubr.msk.f32.vlgmr.msra.gmra.mrb[32].mxu0 %vm57_vm0, %v4788_v5  ;;  %4087 = vmatmul.mubr.msk.f32.vlgmr.msra.gmra.mrb[32].mxu1 %vm57_vm0, %v4788_v5 }
  0x45   :  { %498 = vmatprep.mubr.f32.mxu0 %v4733_v3  ;;  %659 = vmatprep.mubr.f32.mxu1 %v4733_v3 }
  0x46   :  { %751 = vmatpush1.msra.mxu0 %v49_v27  ;;  %912 = vmatpush1.msra.mxu1 %v51_v28 }
  0x47   :  { %1072 = vmatprep.subr.mxu0 %v54_v29  ;;  %1233 = vmatprep.subr.mxu1 %v56_v30 }
  0x48   :  { %4072 = vmatmul.mubr.msk.f32.gmra.mrb[34].mxu0 %vm57_vm0, %v4811_v10  ;;  %4088 = vmatmul.mubr.msk.f32.gmra.mrb[34].mxu1 %vm57_vm0, %v4811_v10 }
  0x49   :  { %504 = vmatprep.mubr.f32.mxu0 %v4733_v3  ;;  %665 = vmatprep.mubr.f32.mxu1 %v4733_v3 }
  0x4c   :  { %4073 = vmatmul.mubr.msk.f32.gmra.mrb[36].mxu0 %vm57_vm0, %v4822_v11  ;;  %4089 = vmatmul.mubr.msk.f32.gmra.mrb[36].mxu1 %vm57_vm0, %v4822_v11 }
  0x4d   :  { %510 = vmatprep.mubr.f32.mxu0 %v4733_v3  ;;  %671 = vmatprep.mubr.f32.mxu1 %v4733_v3 }
  0x50   :  { %4074 = vmatmul.mubr.msk.f32.gmra.mrb[38].mxu0 %vm57_vm0, %v4839_v14  ;;  %4090 = vmatmul.mubr.msk.f32.gmra.mrb[38].mxu1 %vm57_vm0, %v4839_v14 }
  0x51   :  { %516 = vmatprep.mubr.f32.mxu0 %v4733_v3  ;;  %677 = vmatprep.mubr.f32.mxu1 %v4733_v3 }
  0x54   :  { %4075 = vmatmul.mubr.msk.f32.gmra.mrb[40].mxu0 %vm57_vm0, %v4850_v15  ;;  %4091 = vmatmul.mubr.msk.f32.gmra.mrb[40].mxu1 %vm57_vm0, %v4850_v15 }
  0x55   :  { %522 = vmatprep.mubr.f32.mxu0 %v4733_v3  ;;  %683 = vmatprep.mubr.f32.mxu1 %v4733_v3 }
  0x58   :  { %4076 = vmatmul.mubr.msk.f32.gmra.mrb[42].mxu0 %vm57_vm0, %v4861_v16  ;;  %4092 = vmatmul.mubr.msk.f32.gmra.mrb[42].mxu1 %vm57_vm0, %v4861_v16 }
  0x59   :  { %528 = vmatprep.mubr.f32.mxu0 %v4733_v3  ;;  %689 = vmatprep.mubr.f32.mxu1 %v4733_v3 }
  0x5c   :  { %4077 = vmatmul.mubr.msk.f32.gmra.mrb[44].mxu0 %vm57_vm0, %v4872_v17  ;;  %4093 = vmatmul.mubr.msk.f32.gmra.mrb[44].mxu1 %vm57_vm0, %v4872_v17 }
  0x5d   :  { %534 = vmatprep.mubr.f32.mxu0 %v4733_v3  ;;  %695 = vmatprep.mubr.f32.mxu1 %v4733_v3 }
  0x60   :  { %4078 = vmatmul.mubr.msk.f32.gmra.mrb[46].mxu0 %vm57_vm0, %v4883_v18  ;;  %4094 = vmatmul.mubr.msk.f32.gmra.mrb[46].mxu1 %vm57_vm0, %v4883_v18 }
  0x61   :  { %540 = vmatprep.mubr.f32.mxu0 %v4733_v3  ;;  %701 = vmatprep.mubr.f32.mxu1 %v4733_v3 }
  0x64   :  { %4079 = vmatmul.mubr.msk.f32.gmra.mrb[48].mxu0 %vm57_vm0, %v4894_v19  ;;  %4095 = vmatmul.mubr.msk.f32.gmra.mrb[48].mxu1 %vm57_vm0, %v4894_v19 }
  0x65   :  { %546 = vmatprep.mubr.f32.mxu0 %v4733_v3  ;;  %707 = vmatprep.mubr.f32.mxu1 %v4733_v3 }
  0x68   :  { %4080 = vmatmul.mubr.msk.f32.gmra.mrb[50].mxu0 %vm57_vm0, %v4905_v20  ;;  %4096 = vmatmul.mubr.msk.f32.gmra.mrb[50].mxu1 %vm57_vm0, %v4905_v20 }
  0x69   :  { %552 = vmatprep.mubr.f32.mxu0 %v4733_v3  ;;  %713 = vmatprep.mubr.f32.mxu1 %v4733_v3 }
  0x6c   :  { %4081 = vmatmul.mubr.msk.f32.gmra.mrb[52].mxu0 %vm57_vm0, %v4916_v21  ;;  %4097 = vmatmul.mubr.msk.f32.gmra.mrb[52].mxu1 %vm57_vm0, %v4916_v21 }
  0x6d   :  { %558 = vmatprep.mubr.f32.mxu0 %v4733_v3  ;;  %719 = vmatprep.mubr.f32.mxu1 %v4733_v3 }
  0x70   :  { %4082 = vmatmul.mubr.msk.f32.gmra.mrb[54].mxu0 %vm57_vm0, %v4927_v22  ;;  %4098 = vmatmul.mubr.msk.f32.gmra.mrb[54].mxu1 %vm57_vm0, %v4927_v22 }
  0x71   :  { %564 = vmatprep.mubr.f32.mxu0 %v4733_v3  ;;  %725 = vmatprep.mubr.f32.mxu1 %v4733_v3 }
  0x74   :  { %4083 = vmatmul.mubr.msk.f32.gmra.mrb[56].mxu0 %vm57_vm0, %v4938_v23  ;;  %4099 = vmatmul.mubr.msk.f32.gmra.mrb[56].mxu1 %vm57_vm0, %v4938_v23 }
  0x75   :  { %570 = vmatprep.mubr.f32.mxu0 %v4733_v3  ;;  %731 = vmatprep.mubr.f32.mxu1 %v4733_v3 }
  0x78   :  { %4084 = vmatmul.mubr.msk.f32.gmra.mrb[58].mxu0 %vm57_vm0, %v4949_v24  ;;  %4100 = vmatmul.mubr.msk.f32.gmra.mrb[58].mxu1 %vm57_vm0, %v4949_v24 }
  0x79   :  { %576 = vmatprep.mubr.f32.mxu0 %v4733_v3  ;;  %737 = vmatprep.mubr.f32.mxu1 %v4733_v3 }
  0x7c   :  { %4085 = vmatmul.mubr.msk.f32.gmra.mrb[60].mxu0 %vm57_vm0, %v4960_v25  ;;  %4101 = vmatmul.mubr.msk.f32.gmra.mrb[60].mxu1 %vm57_vm0, %v4960_v25 }
  0x7d   :  { %582 = vmatprep.mubr.f32.mxu0 %v4733_v3  ;;  %743 = vmatprep.mubr.f32.mxu1 %v4733_v3 }
  0x80   :  { %4086 = vmatmul.mubr.msk.f32.gmra.mrb[62].mxu0 %vm57_vm0, %v4971_v26  ;;  %4102 = vmatmul.mubr.msk.f32.gmra.mrb[62].mxu1 %vm57_vm0, %v4971_v26 }
  0x81   :  { %814 = vmatprep.mubr.f32.mxu0 %v4733_v3  ;;  %975 = vmatprep.mubr.f32.mxu1 %v4733_v3 }
  0x84   :  { %4103 = vmatmul.mubr.msk.f32.vlgmr.msra.gmra.mrb[64].mxu0 %vm57_vm0, %v4788_v5  ;;  %4119 = vmatmul.mubr.msk.f32.vlgmr.msra.gmra.mrb[64].mxu1 %vm57_vm0, %v4788_v5 }
  0x85   :  { %820 = vmatprep.mubr.f32.mxu0 %v4733_v3  ;;  %981 = vmatprep.mubr.f32.mxu1 %v4733_v3 }
  0x86   :  { %1073 = vmatpush1.msra.mxu0 %v53_v31  ;;  %1234 = vmatpush1.msra.mxu1 %v55_v32 }
  0x88   :  { %4104 = vmatmul.mubr.msk.f32.gmra.mrb[66].mxu0 %vm57_vm0, %v4811_v10  ;;  %4120 = vmatmul.mubr.msk.f32.gmra.mrb[66].mxu1 %vm57_vm0, %v4811_v10 }
  0x89   :  { %826 = vmatprep.mubr.f32.mxu0 %v4733_v3  ;;  %987 = vmatprep.mubr.f32.mxu1 %v4733_v3 }
  0x8c   :  { %4105 = vmatmul.mubr.msk.f32.gmra.mrb[68].mxu0 %vm57_vm0, %v4822_v11  ;;  %4121 = vmatmul.mubr.msk.f32.gmra.mrb[68].mxu1 %vm57_vm0, %v4822_v11 }
  0x8d   :  { %832 = vmatprep.mubr.f32.mxu0 %v4733_v3  ;;  %993 = vmatprep.mubr.f32.mxu1 %v4733_v3 }
  0x90   :  { %4106 = vmatmul.mubr.msk.f32.gmra.mrb[70].mxu0 %vm57_vm0, %v4839_v14  ;;  %4122 = vmatmul.mubr.msk.f32.gmra.mrb[70].mxu1 %vm57_vm0, %v4839_v14 }
  0x91   :  { %838 = vmatprep.mubr.f32.mxu0 %v4733_v3  ;;  %999 = vmatprep.mubr.f32.mxu1 %v4733_v3 }
  0x94   :  { %4107 = vmatmul.mubr.msk.f32.gmra.mrb[72].mxu0 %vm57_vm0, %v4850_v15  ;;  %4123 = vmatmul.mubr.msk.f32.gmra.mrb[72].mxu1 %vm57_vm0, %v4850_v15 }
  0x95   :  { %844 = vmatprep.mubr.f32.mxu0 %v4733_v3  ;;  %1005 = vmatprep.mubr.f32.mxu1 %v4733_v3 }
  0x98   :  { %4108 = vmatmul.mubr.msk.f32.gmra.mrb[74].mxu0 %vm57_vm0, %v4861_v16  ;;  %4124 = vmatmul.mubr.msk.f32.gmra.mrb[74].mxu1 %vm57_vm0, %v4861_v16 }
  0x99   :  { %850 = vmatprep.mubr.f32.mxu0 %v4733_v3  ;;  %1011 = vmatprep.mubr.f32.mxu1 %v4733_v3 }
  0x9c   :  { %4109 = vmatmul.mubr.msk.f32.gmra.mrb[76].mxu0 %vm57_vm0, %v4872_v17  ;;  %4125 = vmatmul.mubr.msk.f32.gmra.mrb[76].mxu1 %vm57_vm0, %v4872_v17 }
  0x9d   :  { %856 = vmatprep.mubr.f32.mxu0 %v4733_v3  ;;  %1017 = vmatprep.mubr.f32.mxu1 %v4733_v3 }
  0xa0   :  { %4110 = vmatmul.mubr.msk.f32.gmra.mrb[78].mxu0 %vm57_vm0, %v4883_v18  ;;  %4126 = vmatmul.mubr.msk.f32.gmra.mrb[78].mxu1 %vm57_vm0, %v4883_v18 }
  0xa1   :  { %862 = vmatprep.mubr.f32.mxu0 %v4733_v3  ;;  %1023 = vmatprep.mubr.f32.mxu1 %v4733_v3 }
  0xa4   :  { %4111 = vmatmul.mubr.msk.f32.gmra.mrb[80].mxu0 %vm57_vm0, %v4894_v19  ;;  %4127 = vmatmul.mubr.msk.f32.gmra.mrb[80].mxu1 %vm57_vm0, %v4894_v19 }
  0xa5   :  { %868 = vmatprep.mubr.f32.mxu0 %v4733_v3  ;;  %1029 = vmatprep.mubr.f32.mxu1 %v4733_v3 }
  0xa8   :  { %4112 = vmatmul.mubr.msk.f32.gmra.mrb[82].mxu0 %vm57_vm0, %v4905_v20  ;;  %4128 = vmatmul.mubr.msk.f32.gmra.mrb[82].mxu1 %vm57_vm0, %v4905_v20 }
  0xa9   :  { %874 = vmatprep.mubr.f32.mxu0 %v4733_v3  ;;  %1035 = vmatprep.mubr.f32.mxu1 %v4733_v3 }
  0xac   :  { %4113 = vmatmul.mubr.msk.f32.gmra.mrb[84].mxu0 %vm57_vm0, %v4916_v21  ;;  %4129 = vmatmul.mubr.msk.f32.gmra.mrb[84].mxu1 %vm57_vm0, %v4916_v21 }
  0xad   :  { %880 = vmatprep.mubr.f32.mxu0 %v4733_v3  ;;  %1041 = vmatprep.mubr.f32.mxu1 %v4733_v3 }
  0xb0   :  { %4114 = vmatmul.mubr.msk.f32.gmra.mrb[86].mxu0 %vm57_vm0, %v4927_v22  ;;  %4130 = vmatmul.mubr.msk.f32.gmra.mrb[86].mxu1 %vm57_vm0, %v4927_v22 }
  0xb1   :  { %886 = vmatprep.mubr.f32.mxu0 %v4733_v3  ;;  %1047 = vmatprep.mubr.f32.mxu1 %v4733_v3 }
  0xb4   :  { %4115 = vmatmul.mubr.msk.f32.gmra.mrb[88].mxu0 %vm57_vm0, %v4938_v23  ;;  %4131 = vmatmul.mubr.msk.f32.gmra.mrb[88].mxu1 %vm57_vm0, %v4938_v23 }
  0xb5   :  { %892 = vmatprep.mubr.f32.mxu0 %v4733_v3  ;;  %1053 = vmatprep.mubr.f32.mxu1 %v4733_v3 }
  0xb8   :  { %4116 = vmatmul.mubr.msk.f32.gmra.mrb[90].mxu0 %vm57_vm0, %v4949_v24  ;;  %4132 = vmatmul.mubr.msk.f32.gmra.mrb[90].mxu1 %vm57_vm0, %v4949_v24 }
  0xb9   :  { %898 = vmatprep.mubr.f32.mxu0 %v4733_v3  ;;  %1059 = vmatprep.mubr.f32.mxu1 %v4733_v3 }
  0xbc   :  { %4117 = vmatmul.mubr.msk.f32.gmra.mrb[92].mxu0 %vm57_vm0, %v4960_v25  ;;  %4133 = vmatmul.mubr.msk.f32.gmra.mrb[92].mxu1 %vm57_vm0, %v4960_v25 }
  0xbd   :  { %904 = vmatprep.mubr.f32.mxu0 %v4733_v3  ;;  %1065 = vmatprep.mubr.f32.mxu1 %v4733_v3 }
  0xc0   :  { %4118 = vmatmul.mubr.msk.f32.gmra.mrb[94].mxu0 %vm57_vm0, %v4971_v26  ;;  %4134 = vmatmul.mubr.msk.f32.gmra.mrb[94].mxu1 %vm57_vm0, %v4971_v26 }
  0xc1   :  { %1136 = vmatprep.mubr.f32.mxu0 %v4733_v3  ;;  %1297 = vmatprep.mubr.f32.mxu1 %v4733_v3 }
  0xc4   :  { %4135 = vmatmul.mubr.msk.f32.vlgmr.msra.gmra.mrb[96].mxu0 %vm57_vm0, %v4788_v5  ;;  %4151 = vmatmul.mubr.msk.f32.vlgmr.msra.gmra.mrb[96].mxu1 %vm57_vm0, %v4788_v5 }
  0xc5   :  { %1142 = vmatprep.mubr.f32.mxu0 %v4733_v3  ;;  %1303 = vmatprep.mubr.f32.mxu1 %v4733_v3 }
  0xc8   :  { %4136 = vmatmul.mubr.msk.f32.gmra.mrb[98].mxu0 %vm57_vm0, %v4811_v10  ;;  %4152 = vmatmul.mubr.msk.f32.gmra.mrb[98].mxu1 %vm57_vm0, %v4811_v10 }
  0xc9   :  { %1148 = vmatprep.mubr.f32.mxu0 %v4733_v3  ;;  %1309 = vmatprep.mubr.f32.mxu1 %v4733_v3 }
  0xcc   :  { %4137 = vmatmul.mubr.msk.f32.gmra.mrb[100].mxu0 %vm57_vm0, %v4822_v11  ;;  %4153 = vmatmul.mubr.msk.f32.gmra.mrb[100].mxu1 %vm57_vm0, %v4822_v11 }
  0xcd   :  { %1154 = vmatprep.mubr.f32.mxu0 %v4733_v3  ;;  %1315 = vmatprep.mubr.f32.mxu1 %v4733_v3 }
  0xd0   :  { %4138 = vmatmul.mubr.msk.f32.gmra.mrb[102].mxu0 %vm57_vm0, %v4839_v14  ;;  %4154 = vmatmul.mubr.msk.f32.gmra.mrb[102].mxu1 %vm57_vm0, %v4839_v14 }
  0xd1   :  { %1160 = vmatprep.mubr.f32.mxu0 %v4733_v3  ;;  %1321 = vmatprep.mubr.f32.mxu1 %v4733_v3 }
  0xd4   :  { %4139 = vmatmul.mubr.msk.f32.gmra.mrb[104].mxu0 %vm57_vm0, %v4850_v15  ;;  %4155 = vmatmul.mubr.msk.f32.gmra.mrb[104].mxu1 %vm57_vm0, %v4850_v15 }
  0xd5   :  { %1166 = vmatprep.mubr.f32.mxu0 %v4733_v3  ;;  %1327 = vmatprep.mubr.f32.mxu1 %v4733_v3 }
  0xd7   :  { %v172_v33 = vpop.f32.mrb[0].mxu0  ;;  %v333_v34 = vpop.f32.mrb[0].mxu1 }
  0xd8   :  { %v174_v35 = vpop.f32.mrb[1].mxu0  ;;  %v335_v36 = vpop.f32.mrb[1].mxu1  ;;  %4140 = vmatmul.mubr.msk.f32.gmra.mrb[106].mxu0 %vm57_vm0, %v4861_v16  ;;  %4156 = vmatmul.mubr.msk.f32.gmra.mrb[106].mxu1 %vm57_vm0, %v4861_v16  ;;  %v1394_v39 = vmax.f32 %v172_v33, 0.0  ;;  %v1396_v40 = vmax.f32 %v333_v34, 0.0 }
  0xd9   :  { %1172 = vmatprep.mubr.f32.mxu0 %v4733_v3  ;;  %1333 = vmatprep.mubr.f32.mxu1 %v4733_v3  ;;  %v1395_v45 = vmax.f32 %v174_v35, 0.0  ;;  %v1397_v46 = vmax.f32 %v335_v36, 0.0 }
  0xdb   :  { %v178_v37 = vpop.f32.mrb[2].mxu0  ;;  %v339_v38 = vpop.f32.mrb[2].mxu1 }
  0xdc   :  { %v1410_v41 = vmax.f32 %v178_v37, 0.0  ;;  %v1412_v42 = vmax.f32 %v339_v38, 0.0  ;;  %v180_v43 = vpop.f32.mrb[3].mxu0  ;;  %v341_v44 = vpop.f32.mrb[3].mxu1  ;;  %4141 = vmatmul.mubr.msk.f32.gmra.mrb[108].mxu0 %vm57_vm0, %v4872_v17  ;;  %4157 = vmatmul.mubr.msk.f32.gmra.mrb[108].mxu1 %vm57_vm0, %v4872_v17 }
  0xdd   :  { %v1411_v47 = vmax.f32 %v180_v43, 0.0  ;;  %v1413_v48 = vmax.f32 %v341_v44, 0.0  ;;  %1178 = vmatprep.mubr.f32.mxu0 %v4733_v3  ;;  %1339 = vmatprep.mubr.f32.mxu1 %v4733_v3 }
  0xde   :  { %v4169_v49 = vpack.c.bf16 %v1410_v41, %v1394_v39  ;;  %v4201_v50 = vpack.c.bf16 %v1412_v42, %v1396_v40 }
  0xdf   :  { %v184_v51 = vpop.f32.mrb[4].mxu0  ;;  %v345_v52 = vpop.f32.mrb[4].mxu1  ;;  %v4167_v53 = vpack.c.bf16 %v1411_v47, %v1395_v45  ;;  %v4199_v54 = vpack.c.bf16 %v1413_v48, %v1397_v46 }
  0xe0   :  { %v186_v55 = vpop.f32.mrb[5].mxu0  ;;  %v347_v56 = vpop.f32.mrb[5].mxu1  ;;  %4142 = vmatmul.mubr.msk.f32.gmra.mrb[110].mxu0 %vm57_vm0, %v4883_v18  ;;  %4158 = vmatmul.mubr.msk.f32.gmra.mrb[110].mxu1 %vm57_vm0, %v4883_v18  ;;  %v1426_v59 = vmax.f32 %v184_v51, 0.0  ;;  %v1428_v60 = vmax.f32 %v345_v52, 0.0 }
  0xe1   :  { %4168 = vmatprep.subr.bf16.mxu0 %v4167_v53  ;;  %4200 = vmatprep.subr.bf16.mxu1 %v4199_v54  ;;  %v1427_v1 = vmax.f32 %v186_v55, 0.0  ;;  %v1429_v2 = vmax.f32 %v347_v56, 0.0  ;;  %v4734_v53 = vmov 0  }
  0xe2   :  { %4170 = vmatpush1.bf16.msra.mxu0 %v4169_v49  ;;  %4202 = vmatpush1.bf16.msra.mxu1 %v4201_v50 }
  0xe3   :  { %v190_v57 = vpop.f32.mrb[6].mxu0  ;;  %v351_v58 = vpop.f32.mrb[6].mxu1  ;;  %1184 = vmatprep.mubr.f32.mxu0 %v4733_v3  ;;  %1345 = vmatprep.mubr.f32.mxu1 %v4733_v3 }
  0xe4   :  { %v1442_v61 = vmax.f32 %v190_v57, 0.0  ;;  %v1444_v62 = vmax.f32 %v351_v58, 0.0  ;;  %v192_v63 = vpop.f32.mrb[7].mxu0  ;;  %v353_v0 = vpop.f32.mrb[7].mxu1  ;;  %4143 = vmatmul.mubr.msk.f32.gmra.mrb[112].mxu0 %vm57_vm0, %v4894_v19  ;;  %4159 = vmatmul.mubr.msk.f32.gmra.mrb[112].mxu1 %vm57_vm0, %v4894_v19 }
  0xe5   :  { %v1443_v4 = vmax.f32 %v192_v63, 0.0  ;;  %v1445_v5 = vmax.f32 %v353_v0, 0.0  ;;  %1190 = vmatprep.mubr.f32.mxu0 %v4733_v3  ;;  %1351 = vmatprep.mubr.f32.mxu1 %v4733_v3 }
  0xe6   :  { %v4173_v6 = vpack.c.bf16 %v1442_v61, %v1426_v59  ;;  %v4205_v7 = vpack.c.bf16 %v1444_v62, %v1428_v60  ;;  %4682 = vset.pattern.permute.xlu0 %v4734_v53  ;;  %4683 = vset.pattern.permute.xlu1 %v4734_v53  ;;  %v1667_v61 = vld [vmem:[%s6104_s3 + $0x8] sm:$0xff]  ;;  %v1668_v62 = vld [vmem:[%s6104_s3 + $0x10] sm:$0xff] }
  0xe7   :  { %v196_v8 = vpop.f32.mrb[8].mxu0  ;;  %v357_v9 = vpop.f32.mrb[8].mxu1  ;;  %v4171_v10 = vpack.c.bf16 %v1443_v4, %v1427_v1  ;;  %v4203_v11 = vpack.c.bf16 %v1445_v5, %v1429_v2  ;;  %1694 = vperm.xlu1 %4683, %v1668_v62  }
  0xe8   :  { %v198_v12 = vpop.f32.mrb[9].mxu0  ;;  %v359_v13 = vpop.f32.mrb[9].mxu1  ;;  %4144 = vmatmul.mubr.msk.f32.gmra.mrb[114].mxu0 %vm57_vm0, %v4905_v20  ;;  %4160 = vmatmul.mubr.msk.f32.gmra.mrb[114].mxu1 %vm57_vm0, %v4905_v20  ;;  %v1458_v16 = vmax.f32 %v196_v8, 0.0  ;;  %v1460_v17 = vmax.f32 %v357_v9, 0.0 }
  0xe9   :  { %4172 = vmatprep.subr.bf16.mxu0 %v4171_v10  ;;  %4204 = vmatprep.subr.bf16.mxu1 %v4203_v11  ;;  %v1459_v20 = vmax.f32 %v198_v12, 0.0  ;;  %v1461_v29 = vmax.f32 %v359_v13, 0.0 }
  0xea   :  { %4174 = vmatpush1.bf16.msra.mxu0 %v4173_v6  ;;  %4206 = vmatpush1.bf16.msra.mxu1 %v4205_v7 }
  0xeb   :  { %v202_v14 = vpop.f32.mrb[10].mxu0  ;;  %v363_v15 = vpop.f32.mrb[10].mxu1  ;;  %1196 = vmatprep.mubr.f32.mxu0 %v4733_v3  ;;  %1357 = vmatprep.mubr.f32.mxu1 %v4733_v3 }
  0xec   :  { %v1474_v18 = vmax.f32 %v202_v14, 0.0  ;;  %v1476_v19 = vmax.f32 %v363_v15, 0.0  ;;  %v204_v27 = vpop.f32.mrb[11].mxu0  ;;  %v365_v28 = vpop.f32.mrb[11].mxu1  ;;  %4145 = vmatmul.mubr.msk.f32.gmra.mrb[116].mxu0 %vm57_vm0, %v4916_v21  ;;  %4161 = vmatmul.mubr.msk.f32.gmra.mrb[116].mxu1 %vm57_vm0, %v4916_v21 }
  0xed   :  { %v1475_v30 = vmax.f32 %v204_v27, 0.0  ;;  %v1477_v31 = vmax.f32 %v365_v28, 0.0  ;;  %1202 = vmatprep.mubr.f32.mxu0 %v4733_v3  ;;  %1363 = vmatprep.mubr.f32.mxu1 %v4733_v3 }
  0xee   :  { %v4177_v32 = vpack.c.bf16 %v1474_v18, %v1458_v16  ;;  %v4209_v33 = vpack.c.bf16 %v1476_v19, %v1460_v17  ;;  %v1670_v17 = vld [vmem:[%s6104_s3 + $0x20] sm:$0xff] }
  0xef   :  { %v4175_v34 = vpack.c.bf16 %v1475_v30, %v1459_v20  ;;  %v4207_v35 = vpack.c.bf16 %v1477_v31, %v1461_v29  ;;  %v208_v36 = vpop.f32.mrb[12].mxu0  ;;  %v369_v37 = vpop.f32.mrb[12].mxu1 }
  0xf0   :  { %v210_v38 = vpop.f32.mrb[13].mxu0  ;;  %v371_v39 = vpop.f32.mrb[13].mxu1  ;;  %4146 = vmatmul.mubr.msk.f32.gmra.mrb[118].mxu0 %vm57_vm0, %v4927_v22  ;;  %4162 = vmatmul.mubr.msk.f32.gmra.mrb[118].mxu1 %vm57_vm0, %v4927_v22  ;;  %v1490_v21 = vmax.f32 %v208_v36, 0.0  ;;  %v1492_v42 = vmax.f32 %v369_v37, 0.0  ;;  %v1666_v22 = vld [vmem:[%s6104_s3] sm:$0xff] }
  0xf1   :  { %4176 = vmatprep.subr.bf16.mxu0 %v4175_v34  ;;  %4208 = vmatprep.subr.bf16.mxu1 %v4207_v35  ;;  %v1491_v47 = vmax.f32 %v210_v38, 0.0  ;;  %v1493_v48 = vmax.f32 %v371_v39, 0.0  ;;  %v1671_v35 = vld [vmem:[%s6104_s3 + $0x28] sm:$0xff] }
  0xf2   :  { %4178 = vmatpush1.bf16.msra.mxu0 %v4177_v32  ;;  %4210 = vmatpush1.bf16.msra.mxu1 %v4209_v33 }
  0xf3   :  { %v214_v40 = vpop.f32.mrb[14].mxu0  ;;  %v375_v41 = vpop.f32.mrb[14].mxu1  ;;  %1208 = vmatprep.mubr.f32.mxu0 %v4733_v3  ;;  %1369 = vmatprep.mubr.f32.mxu1 %v4733_v3 }
  0xf4   :  { %v1506_v43 = vmax.f32 %v214_v40, 0.0  ;;  %v1508_v44 = vmax.f32 %v375_v41, 0.0  ;;  %v216_v45 = vpop.f32.mrb[15].mxu0  ;;  %v377_v46 = vpop.f32.mrb[15].mxu1  ;;  %4147 = vmatmul.mubr.msk.f32.gmra.mrb[120].mxu0 %vm57_vm0, %v4938_v23  ;;  %4163 = vmatmul.mubr.msk.f32.gmra.mrb[120].mxu1 %vm57_vm0, %v4938_v23 }
  0xf5   :  { %v1507_v49 = vmax.f32 %v216_v45, 0.0  ;;  %v1509_v50 = vmax.f32 %v377_v46, 0.0  ;;  %1214 = vmatprep.mubr.f32.mxu0 %v4733_v3  ;;  %1375 = vmatprep.mubr.f32.mxu1 %v4733_v3 }
  0xf6   :  { %v4181_v51 = vpack.c.bf16 %v1506_v43, %v1490_v21  ;;  %v4213_v52 = vpack.c.bf16 %v1508_v44, %v1492_v42  ;;  %1684 = vperm.xlu0 %4682, %v1666_v22   ;;  %v1672_v43 = vld [vmem:[%s6104_s3 + $0x30] sm:$0xff] }
  0xf7   :  { %v4179_v54 = vpack.c.bf16 %v1507_v49, %v1491_v47  ;;  %v4211_v55 = vpack.c.bf16 %v1509_v50, %v1493_v48  ;;  %v220_v23 = vpop.f32.mrb[16].mxu0  ;;  %v381_v56 = vpop.f32.mrb[16].mxu1 }
  0xf8   :  { %v222_v57 = vpop.f32.mrb[17].mxu0  ;;  %v383_v58 = vpop.f32.mrb[17].mxu1  ;;  %4148 = vmatmul.mubr.msk.f32.gmra.mrb[122].mxu0 %vm57_vm0, %v4949_v24  ;;  %4164 = vmatmul.mubr.msk.f32.gmra.mrb[122].mxu1 %vm57_vm0, %v4949_v24  ;;  %v1522_v63 = vmax.f32 %v220_v23, 0.0  ;;  %v1524_v24 = vmax.f32 %v381_v56, 0.0 }
  0xf9   :  { %4180 = vmatprep.subr.bf16.mxu0 %v4179_v54  ;;  %4212 = vmatprep.subr.bf16.mxu1 %v4211_v55  ;;  %v1523_v5 = vmax.f32 %v222_v57, 0.0  ;;  %v1525_v6 = vmax.f32 %v383_v58, 0.0  ;;  %v1673_v55 = vld [vmem:[%s6104_s3 + $0x38] sm:$0xff] }
  0xfa   :  { %4182 = vmatpush1.bf16.msra.mxu0 %v4181_v51  ;;  %4214 = vmatpush1.bf16.msra.mxu1 %v4213_v52 }
  0xfb   :  { %v226_v59 = vpop.f32.mrb[18].mxu0  ;;  %v387_v60 = vpop.f32.mrb[18].mxu1  ;;  %1220 = vmatprep.mubr.f32.mxu0 %v4733_v3  ;;  %1381 = vmatprep.mubr.f32.mxu1 %v4733_v3 }
  0xfc   :  { %v1538_v0 = vmax.f32 %v226_v59, 0.0  ;;  %v1540_v1 = vmax.f32 %v387_v60, 0.0  ;;  %v228_v2 = vpop.f32.mrb[19].mxu0  ;;  %v389_v4 = vpop.f32.mrb[19].mxu1  ;;  %4149 = vmatmul.mubr.msk.f32.gmra.mrb[124].mxu0 %vm57_vm0, %v4960_v25  ;;  %4165 = vmatmul.mubr.msk.f32.gmra.mrb[124].mxu1 %vm57_vm0, %v4960_v25  ;;  %v1669_v25 = vld [vmem:[%s6104_s3 + $0x18] sm:$0xff] }
  0xfd   :  { %v1539_v7 = vmax.f32 %v228_v2, 0.0  ;;  %v1541_v8 = vmax.f32 %v389_v4, 0.0  ;;  %1226 = vmatprep.mubr.f32.mxu0 %v4733_v3  ;;  %1387 = vmatprep.mubr.f32.mxu1 %v4733_v3 }
  0xfe   :  { %v4185_v9 = vpack.c.bf16 %v1538_v0, %v1522_v63  ;;  %v4217_v10 = vpack.c.bf16 %v1540_v1, %v1524_v24  ;;  %1689 = vperm.xlu0 %4682, %v1667_v61   ;;  %1699 = vperm.xlu1 %4683, %v1669_v25   ;;  %v1674_v63 = vld [vmem:[%s6104_s3 + $0x40] sm:$0xff] }
  0xff   :  { %v4183_v11 = vpack.c.bf16 %v1539_v7, %v1523_v5  ;;  %v4215_v12 = vpack.c.bf16 %v1541_v8, %v1525_v6  ;;  %v232_v13 = vpop.f32.mrb[20].mxu0  ;;  %v393_v14 = vpop.f32.mrb[20].mxu1 }
 0x100   :  { %v234_v15 = vpop.f32.mrb[21].mxu0  ;;  %v395_v16 = vpop.f32.mrb[21].mxu1  ;;  %4150 = vmatmul.mubr.msk.f32.gmra.mrb[126].mxu0 %vm57_vm0, %v4971_v26  ;;  %4166 = vmatmul.mubr.msk.f32.gmra.mrb[126].mxu1 %vm57_vm0, %v4971_v26  ;;  %v1554_v27 = vmax.f32 %v232_v13, 0.0  ;;  %v1556_v26 = vmax.f32 %v393_v14, 0.0 }
 0x101   :  { %4184 = vmatprep.subr.bf16.mxu0 %v4183_v11  ;;  %4216 = vmatprep.subr.bf16.mxu1 %v4215_v12  ;;  %v1555_v31 = vmax.f32 %v234_v15, 0.0  ;;  %v1557_v32 = vmax.f32 %v395_v16, 0.0  ;;  %v1675_v12 = vld [vmem:[%s6104_s3 + $0x48] sm:$0xff] }
 0x102   :  { %4186 = vmatpush1.bf16.msra.mxu0 %v4185_v9  ;;  %4218 = vmatpush1.bf16.msra.mxu1 %v4217_v10 }
 0x103   :  { %v238_v18 = vpop.f32.mrb[22].mxu0  ;;  %v399_v19 = vpop.f32.mrb[22].mxu1  ;;  %1826 = vmatprep.mubr.f32.mxu0 %v4733_v3  ;;  %1987 = vmatprep.mubr.f32.mxu1 %v4733_v3 }
 0x104   :  { %v1570_v28 = vmax.f32 %v238_v18, 0.0  ;;  %v1572_v20 = vmax.f32 %v399_v19, 0.0  ;;  %v240_v29 = vpop.f32.mrb[23].mxu0  ;;  %v401_v30 = vpop.f32.mrb[23].mxu1  ;;  %1704 = vperm.xlu0 %4682, %v1670_v17   ;;  %1709 = vperm.xlu1 %4683, %v1671_v35  }
 0x105   :  { %v1571_v33 = vmax.f32 %v240_v29, 0.0  ;;  %v1573_v34 = vmax.f32 %v401_v30, 0.0 }
 0x106   :  { %v4189_v36 = vpack.c.bf16 %v1570_v28, %v1554_v27  ;;  %v4221_v37 = vpack.c.bf16 %v1572_v20, %v1556_v26  ;;  %v1676_v27 = vld [vmem:[%s6104_s3 + $0x50] sm:$0xff]  ;;  %v5321_v26 = vld [vmem:[%s6105_s2] sm:$0xff] }
 0x107   :  { %v4187_v38 = vpack.c.bf16 %v1571_v33, %v1555_v31  ;;  %v4219_v39 = vpack.c.bf16 %v1573_v34, %v1557_v32  ;;  %v244_v21 = vpop.f32.mrb[24].mxu0  ;;  %v405_v40 = vpop.f32.mrb[24].mxu1 }
 0x108   :  { %v246_v41 = vpop.f32.mrb[25].mxu0  ;;  %v407_v42 = vpop.f32.mrb[25].mxu1  ;;  %1714 = vperm.xlu0 %4682, %v1672_v43   ;;  %v1586_v46 = vmax.f32 %v244_v21, 0.0  ;;  %v1588_v22 = vmax.f32 %v405_v40, 0.0  ;;  %1719 = vperm.xlu1 %4683, %v1673_v55  }
 0x109   :  { %4188 = vmatprep.subr.bf16.mxu0 %v4187_v38  ;;  %4220 = vmatprep.subr.bf16.mxu1 %v4219_v39  ;;  %v1587_v51 = vmax.f32 %v246_v41, 0.0  ;;  %v1589_v52 = vmax.f32 %v407_v42, 0.0  ;;  %v1677_v39 = vld [vmem:[%s6104_s3 + $0x58] sm:$0xff]  ;;  %v5333_v41 = vld [vmem:[%s6105_s2 + $0x8] sm:$0xff] }
 0x10a   :  { %4190 = vmatpush1.bf16.msra.mxu0 %v4189_v36  ;;  %4222 = vmatpush1.bf16.msra.mxu1 %v4221_v37 }
 0x10b   :  { %v250_v44 = vpop.f32.mrb[26].mxu0  ;;  %v411_v45 = vpop.f32.mrb[26].mxu1 }
 0x10c   :  { %v1602_v47 = vmax.f32 %v250_v44, 0.0  ;;  %v1604_v48 = vmax.f32 %v411_v45, 0.0  ;;  %v252_v49 = vpop.f32.mrb[27].mxu0  ;;  %v413_v50 = vpop.f32.mrb[27].mxu1  ;;  %1724 = vperm.xlu0 %4682, %v1674_v63   ;;  %1729 = vperm.xlu1 %4683, %v1675_v12   ;;  %v5357_v63 = vld [vmem:[%s6105_s2 + $0x18] sm:$0xff] }
 0x10d   :  { %v1603_v53 = vmax.f32 %v252_v49, 0.0  ;;  %v1605_v54 = vmax.f32 %v413_v50, 0.0 }
 0x10e   :  { %v4193_v23 = vpack.c.bf16 %v1602_v47, %v1586_v46  ;;  %v4225_v56 = vpack.c.bf16 %v1604_v48, %v1588_v22  ;;  %v5340_v47 = vld [vmem:[%s6105_s2 + $0x10] sm:$0xff] }
 0x10f   :  { %v4191_v57 = vpack.c.bf16 %v1603_v53, %v1587_v51  ;;  %v4223_v58 = vpack.c.bf16 %v1605_v54, %v1589_v52  ;;  %v256_v59 = vpop.f32.mrb[28].mxu0  ;;  %v417_v60 = vpop.f32.mrb[28].mxu1 }
 0x110   :  { %v258_v61 = vpop.f32.mrb[29].mxu0  ;;  %v419_v62 = vpop.f32.mrb[29].mxu1  ;;  %v1618_v1 = vmax.f32 %v256_v59, 0.0  ;;  %v1620_v2 = vmax.f32 %v417_v60, 0.0  ;;  %1734 = vperm.xlu0 %4682, %v1676_v27   ;;  %1739 = vperm.xlu1 %4683, %v1677_v39   ;;  %v1679_v60 = vld [vmem:[%s6104_s3 + $0x68] sm:$0xff] }
 0x111   :  { %4192 = vmatprep.subr.bf16.mxu0 %v4191_v57  ;;  %4224 = vmatprep.subr.bf16.mxu1 %v4223_v58  ;;  %v1619_v8 = vmax.f32 %v258_v61, 0.0  ;;  %v1621_v9 = vmax.f32 %v419_v62, 0.0 }
 0x112   :  { %4194 = vmatpush1.bf16.msra.mxu0 %v4193_v23  ;;  %4226 = vmatpush1.bf16.msra.mxu1 %v4225_v56  ;;  %v1678_v23 = vld [vmem:[%s6104_s3 + $0x60] sm:$0xff] }
 0x113   :  { %v262_v24 = vpop.f32.mrb[30].mxu0  ;;  %v423_v0 = vpop.f32.mrb[30].mxu1 }
 0x114   :  { %v1634_v4 = vmax.f32 %v262_v24, 0.0  ;;  %v1636_v5 = vmax.f32 %v423_v0, 0.0  ;;  %v264_v6 = vpop.f32.mrb[31].mxu0  ;;  %v425_v7 = vpop.f32.mrb[31].mxu1  ;;  %1749 = vperm.xlu1 %4683, %v1679_v60   ;;  %1744 = vperm.xlu0 %4682, %v1678_v23  }
 0x115   :  { %v1635_v10 = vmax.f32 %v264_v6, 0.0  ;;  %v1637_v11 = vmax.f32 %v425_v7, 0.0  ;;  %v5364_v6 = vld [vmem:[%s6105_s2 + $0x20] sm:$0xff] }
 0x116   :  { %v4197_v13 = vpack.c.bf16 %v1634_v4, %v1618_v1  ;;  %v4229_v14 = vpack.c.bf16 %v1636_v5, %v1620_v2 }
 0x117   :  { %v4195_v15 = vpack.c.bf16 %v1635_v10, %v1619_v8  ;;  %v4227_v16 = vpack.c.bf16 %v1637_v11, %v1621_v9  ;;  %v494_v25 = vpop.f32.mrb[32].mxu0  ;;  %v655_v17 = vpop.f32.mrb[32].mxu1 }
 0x118   :  { %v496_v18 = vpop.f32.mrb[33].mxu0  ;;  %v657_v19 = vpop.f32.mrb[33].mxu1  ;;  %v1398_v29 = vmax.f32 %v494_v25, 0.0  ;;  %v1400_v30 = vmax.f32 %v655_v17, 0.0 }
 0x119   :  { %4196 = vmatprep.subr.bf16.mxu0 %v4195_v15  ;;  %4228 = vmatprep.subr.bf16.mxu1 %v4227_v16  ;;  %v1399_v35 = vmax.f32 %v496_v18, 0.0  ;;  %v1401_v36 = vmax.f32 %v657_v19, 0.0  ;;  %v1680_v15 = vld [vmem:[%s6104_s3 + $0x70] sm:$0xff]  ;;  %v1681_v19 = vld [vmem:[%s6104_s3 + $0x78] sm:$0xff] }
 0x11a   :  { %4198 = vmatpush1.bf16.msra.mxu0 %v4197_v13  ;;  %4230 = vmatpush1.bf16.msra.mxu1 %v4229_v14 }
 0x11b   :  { %v500_v28 = vpop.f32.mrb[34].mxu0  ;;  %v661_v20 = vpop.f32.mrb[34].mxu1  ;;  %1759 = vperm.xlu1 %4683, %v1681_v19   ;;  %1754 = vperm.xlu0 %4682, %v1680_v15  }
 0x11c   :  { %v1414_v31 = vmax.f32 %v500_v28, 0.0  ;;  %v1416_v32 = vmax.f32 %v661_v20, 0.0  ;;  %v502_v33 = vpop.f32.mrb[35].mxu0  ;;  %v663_v34 = vpop.f32.mrb[35].mxu1  ;;  %v5381_v20 = vld [vmem:[%s6105_s2 + $0x28] sm:$0xff] }
 0x11d   :  { %v1415_v37 = vmax.f32 %v502_v33, 0.0  ;;  %v1417_v38 = vmax.f32 %v663_v34, 0.0  ;;  %1827 = vmatmul.mubr.f32.vlgmr.msra.gmra.mrb[128].mxu0 %v5321_v26  ;;  %1988 = vmatmul.mubr.f32.vlgmr.msra.gmra.mrb[128].mxu1 %v5321_v26 }
 0x11e   :  { %v4233_v21 = vpack.c.bf16 %v1414_v31, %v1398_v29  ;;  %v4265_v40 = vpack.c.bf16 %v1416_v32, %v1400_v30  ;;  %1832 = vmatprep.mubr.f32.mxu0 %v4733_v3  ;;  %1993 = vmatprep.mubr.f32.mxu1 %v4733_v3 }
 0x11f   :  { %v4231_v42 = vpack.c.bf16 %v1415_v37, %v1399_v35  ;;  %v4263_v43 = vpack.c.bf16 %v1417_v38, %v1401_v36  ;;  %v506_v44 = vpop.f32.mrb[36].mxu0  ;;  %v667_v45 = vpop.f32.mrb[36].mxu1  ;;  %v5388_v35 = vld [vmem:[%s6105_s2 + $0x30] sm:$0xff] }
 0x120   :  { %v508_v46 = vpop.f32.mrb[37].mxu0  ;;  %v669_v22 = vpop.f32.mrb[37].mxu1  ;;  %v1430_v48 = vmax.f32 %v506_v44, 0.0  ;;  %v1432_v51 = vmax.f32 %v667_v45, 0.0 }
 0x121   :  { %1833 = vmatmul.mubr.f32.gmra.mrb[130].mxu0 %v5333_v41  ;;  %1994 = vmatmul.mubr.f32.gmra.mrb[130].mxu1 %v5333_v41  ;;  %v1431_v56 = vmax.f32 %v508_v46, 0.0  ;;  %v1433_v57 = vmax.f32 %v669_v22, 0.0 }
 0x122   :  { %4232 = vmatprep.subr.bf16.mxu0 %v4231_v42  ;;  %4264 = vmatprep.subr.bf16.mxu1 %v4263_v43 }
 0x123   :  { %4234 = vmatpush1.bf16.msra.mxu0 %v4233_v21  ;;  %4266 = vmatpush1.bf16.msra.mxu1 %v4265_v40  ;;  %v512_v49 = vpop.f32.mrb[38].mxu0  ;;  %v673_v50 = vpop.f32.mrb[38].mxu1 }
 0x124   :  { %v1446_v52 = vmax.f32 %v512_v49, 0.0  ;;  %v1448_v53 = vmax.f32 %v673_v50, 0.0  ;;  %v514_v54 = vpop.f32.mrb[39].mxu0  ;;  %v675_v55 = vpop.f32.mrb[39].mxu1  ;;  %1838 = vmatprep.mubr.f32.mxu0 %v4733_v3  ;;  %1999 = vmatprep.mubr.f32.mxu1 %v4733_v3  ;;  %v5399_v50 = vld [vmem:[%s6105_s2 + $0x38] sm:$0xff] }
 0x125   :  { %v1447_v58 = vmax.f32 %v514_v54, 0.0  ;;  %v1449_v59 = vmax.f32 %v675_v55, 0.0  ;;  %1839 = vmatmul.mubr.f32.gmra.mrb[132].mxu0 %v5340_v47  ;;  %2000 = vmatmul.mubr.f32.gmra.mrb[132].mxu1 %v5340_v47 }
 0x126   :  { %v4237_v61 = vpack.c.bf16 %v1446_v52, %v1430_v48  ;;  %v4269_v62 = vpack.c.bf16 %v1448_v53, %v1432_v51  ;;  %1844 = vmatprep.mubr.f32.mxu0 %v4733_v3  ;;  %2005 = vmatprep.mubr.f32.mxu1 %v4733_v3 }
 0x127   :  { %v4235_v24 = vpack.c.bf16 %v1447_v58, %v1431_v56  ;;  %v4267_v0 = vpack.c.bf16 %v1449_v59, %v1433_v57  ;;  %v518_v1 = vpop.f32.mrb[40].mxu0  ;;  %v679_v2 = vpop.f32.mrb[40].mxu1  ;;  %v5406_v56 = vld [vmem:[%s6105_s2 + $0x40] sm:$0xff] }
 0x128   :  { %v520_v4 = vpop.f32.mrb[41].mxu0  ;;  %v681_v5 = vpop.f32.mrb[41].mxu1  ;;  %v1462_v7 = vmax.f32 %v518_v1, 0.0  ;;  %v1464_v10 = vmax.f32 %v679_v2, 0.0 }
 0x129   :  { %1845 = vmatmul.mubr.f32.gmra.mrb[134].mxu0 %v5357_v63  ;;  %2006 = vmatmul.mubr.f32.gmra.mrb[134].mxu1 %v5357_v63  ;;  %v1463_v16 = vmax.f32 %v520_v4, 0.0  ;;  %v1465_v25 = vmax.f32 %v681_v5, 0.0 }
 0x12a   :  { %4236 = vmatprep.subr.bf16.mxu0 %v4235_v24  ;;  %4268 = vmatprep.subr.bf16.mxu1 %v4267_v0 }
 0x12b   :  { %4238 = vmatpush1.bf16.msra.mxu0 %v4237_v61  ;;  %4270 = vmatpush1.bf16.msra.mxu1 %v4269_v62  ;;  %v524_v8 = vpop.f32.mrb[42].mxu0  ;;  %v685_v9 = vpop.f32.mrb[42].mxu1 }
 0x12c   :  { %v1478_v11 = vmax.f32 %v524_v8, 0.0  ;;  %v1480_v12 = vmax.f32 %v685_v9, 0.0  ;;  %v526_v13 = vpop.f32.mrb[43].mxu0  ;;  %v687_v14 = vpop.f32.mrb[43].mxu1  ;;  %1850 = vmatprep.mubr.f32.mxu0 %v4733_v3  ;;  %2011 = vmatprep.mubr.f32.mxu1 %v4733_v3  ;;  %v5417_v9 = vld [vmem:[%s6105_s2 + $0x48] sm:$0xff] }
 0x12d   :  { %v1479_v17 = vmax.f32 %v526_v13, 0.0  ;;  %v1481_v18 = vmax.f32 %v687_v14, 0.0  ;;  %1851 = vmatmul.mubr.f32.gmra.mrb[136].mxu0 %v5364_v6  ;;  %2012 = vmatmul.mubr.f32.gmra.mrb[136].mxu1 %v5364_v6 }
 0x12e   :  { %v4241_v27 = vpack.c.bf16 %v1478_v11, %v1462_v7  ;;  %v4273_v28 = vpack.c.bf16 %v1480_v12, %v1464_v10  ;;  %1856 = vmatprep.mubr.f32.mxu0 %v4733_v3  ;;  %2017 = vmatprep.mubr.f32.mxu1 %v4733_v3 }
 0x12f   :  { %v4239_v29 = vpack.c.bf16 %v1479_v17, %v1463_v16  ;;  %v4271_v30 = vpack.c.bf16 %v1481_v18, %v1465_v25  ;;  %v530_v31 = vpop.f32.mrb[44].mxu0  ;;  %v691_v32 = vpop.f32.mrb[44].mxu1  ;;  %v5424_v16 = vld [vmem:[%s6105_s2 + $0x50] sm:$0xff] }
 0x130   :  { %v532_v33 = vpop.f32.mrb[45].mxu0  ;;  %v693_v34 = vpop.f32.mrb[45].mxu1  ;;  %v1494_v38 = vmax.f32 %v530_v31, 0.0  ;;  %v1496_v39 = vmax.f32 %v691_v32, 0.0 }
 0x131   :  { %1857 = vmatmul.mubr.f32.gmra.mrb[138].mxu0 %v5381_v20  ;;  %2018 = vmatmul.mubr.f32.gmra.mrb[138].mxu1 %v5381_v20  ;;  %v1495_v44 = vmax.f32 %v532_v33, 0.0  ;;  %v1497_v45 = vmax.f32 %v693_v34, 0.0 }
 0x132   :  { %4240 = vmatprep.subr.bf16.mxu0 %v4239_v29  ;;  %4272 = vmatprep.subr.bf16.mxu1 %v4271_v30 }
 0x133   :  { %4242 = vmatpush1.bf16.msra.mxu0 %v4241_v27  ;;  %4274 = vmatpush1.bf16.msra.mxu1 %v4273_v28  ;;  %v536_v36 = vpop.f32.mrb[46].mxu0  ;;  %v697_v37 = vpop.f32.mrb[46].mxu1 }
 0x134   :  { %v1510_v21 = vmax.f32 %v536_v36, 0.0  ;;  %v1512_v40 = vmax.f32 %v697_v37, 0.0  ;;  %v538_v42 = vpop.f32.mrb[47].mxu0  ;;  %v699_v43 = vpop.f32.mrb[47].mxu1  ;;  %1862 = vmatprep.mubr.f32.mxu0 %v4733_v3  ;;  %2023 = vmatprep.mubr.f32.mxu1 %v4733_v3 }
 0x135   :  { %v1511_v46 = vmax.f32 %v538_v42, 0.0  ;;  %v1513_v22 = vmax.f32 %v699_v43, 0.0  ;;  %1863 = vmatmul.mubr.f32.gmra.mrb[140].mxu0 %v5388_v35  ;;  %2024 = vmatmul.mubr.f32.gmra.mrb[140].mxu1 %v5388_v35 }
 0x136   :  { %v4245_v48 = vpack.c.bf16 %v1510_v21, %v1494_v38  ;;  %v4277_v49 = vpack.c.bf16 %v1512_v40, %v1496_v39  ;;  %1868 = vmatprep.mubr.f32.mxu0 %v4733_v3  ;;  %2029 = vmatprep.mubr.f32.mxu1 %v4733_v3  ;;  %v5435_v38 = vld [vmem:[%s6105_s2 + $0x58] sm:$0xff] }
 0x137   :  { %v4243_v51 = vpack.c.bf16 %v1511_v46, %v1495_v44  ;;  %v4275_v52 = vpack.c.bf16 %v1513_v22, %v1497_v45  ;;  %v542_v53 = vpop.f32.mrb[48].mxu0  ;;  %v703_v54 = vpop.f32.mrb[48].mxu1  ;;  %v5442_v45 = vld [vmem:[%s6105_s2 + $0x60] sm:$0xff] }
 0x138   :  { %v544_v55 = vpop.f32.mrb[49].mxu0  ;;  %v705_v23 = vpop.f32.mrb[49].mxu1  ;;  %v1526_v59 = vmax.f32 %v542_v53, 0.0  ;;  %v1528_v60 = vmax.f32 %v703_v54, 0.0 }
 0x139   :  { %1869 = vmatmul.mubr.f32.gmra.mrb[142].mxu0 %v5399_v50  ;;  %2030 = vmatmul.mubr.f32.gmra.mrb[142].mxu1 %v5399_v50  ;;  %v1527_v1 = vmax.f32 %v544_v55, 0.0  ;;  %v1529_v2 = vmax.f32 %v705_v23, 0.0 }
 0x13a   :  { %4244 = vmatprep.subr.bf16.mxu0 %v4243_v51  ;;  %4276 = vmatprep.subr.bf16.mxu1 %v4275_v52 }
 0x13b   :  { %4246 = vmatpush1.bf16.msra.mxu0 %v4245_v48  ;;  %4278 = vmatpush1.bf16.msra.mxu1 %v4277_v49  ;;  %v548_v57 = vpop.f32.mrb[50].mxu0  ;;  %v709_v58 = vpop.f32.mrb[50].mxu1 }
 0x13c   :  { %v1542_v61 = vmax.f32 %v548_v57, 0.0  ;;  %v1544_v62 = vmax.f32 %v709_v58, 0.0  ;;  %v550_v24 = vpop.f32.mrb[51].mxu0  ;;  %v711_v0 = vpop.f32.mrb[51].mxu1  ;;  %1874 = vmatprep.mubr.f32.mxu0 %v4733_v3  ;;  %2035 = vmatprep.mubr.f32.mxu1 %v4733_v3 }
 0x13d   :  { %v1543_v4 = vmax.f32 %v550_v24, 0.0  ;;  %v1545_v5 = vmax.f32 %v711_v0, 0.0  ;;  %1875 = vmatmul.mubr.f32.gmra.mrb[144].mxu0 %v5406_v56  ;;  %2036 = vmatmul.mubr.f32.gmra.mrb[144].mxu1 %v5406_v56 }
 0x13e   :  { %v4249_v7 = vpack.c.bf16 %v1542_v61, %v1526_v59  ;;  %v4281_v8 = vpack.c.bf16 %v1544_v62, %v1528_v60  ;;  %1880 = vmatprep.mubr.f32.mxu0 %v4733_v3  ;;  %2041 = vmatprep.mubr.f32.mxu1 %v4733_v3  ;;  %v5453_v61 = vld [vmem:[%s6105_s2 + $0x68] sm:$0xff] }
 0x13f   :  { %v4247_v10 = vpack.c.bf16 %v1543_v4, %v1527_v1  ;;  %v4279_v11 = vpack.c.bf16 %v1545_v5, %v1529_v2  ;;  %v554_v12 = vpop.f32.mrb[52].mxu0  ;;  %v715_v13 = vpop.f32.mrb[52].mxu1  ;;  %v5460_v5 = vld [vmem:[%s6105_s2 + $0x70] sm:$0xff] }
 0x140   :  { %v556_v14 = vpop.f32.mrb[53].mxu0  ;;  %v717_v15 = vpop.f32.mrb[53].mxu1  ;;  %v1558_v18 = vmax.f32 %v554_v12, 0.0  ;;  %v1560_v19 = vmax.f32 %v715_v13, 0.0 }
 0x141   :  { %1881 = vmatmul.mubr.f32.gmra.mrb[146].mxu0 %v5417_v9  ;;  %2042 = vmatmul.mubr.f32.gmra.mrb[146].mxu1 %v5417_v9  ;;  %v1559_v31 = vmax.f32 %v556_v14, 0.0  ;;  %v1561_v32 = vmax.f32 %v717_v15, 0.0 }
 0x142   :  { %4248 = vmatprep.subr.bf16.mxu0 %v4247_v10  ;;  %4280 = vmatprep.subr.bf16.mxu1 %v4279_v11 }
 0x143   :  { %4250 = vmatpush1.bf16.msra.mxu0 %v4249_v7  ;;  %4282 = vmatpush1.bf16.msra.mxu1 %v4281_v8  ;;  %v560_v25 = vpop.f32.mrb[54].mxu0  ;;  %v721_v17 = vpop.f32.mrb[54].mxu1 }
 0x144   :  { %v1574_v27 = vmax.f32 %v560_v25, 0.0  ;;  %v1576_v28 = vmax.f32 %v721_v17, 0.0  ;;  %v562_v29 = vpop.f32.mrb[55].mxu0  ;;  %v723_v30 = vpop.f32.mrb[55].mxu1  ;;  %1886 = vmatprep.mubr.f32.mxu0 %v4733_v3  ;;  %2047 = vmatprep.mubr.f32.mxu1 %v4733_v3  ;;  %v11_v25 = vstv %s6106_s5 }
 0x145   :  { %v1575_v33 = vmax.f32 %v562_v29, 0.0  ;;  %v1577_v34 = vmax.f32 %v723_v30, 0.0  ;;  %1887 = vmatmul.mubr.f32.gmra.mrb[148].mxu0 %v5424_v16  ;;  %2048 = vmatmul.mubr.f32.gmra.mrb[148].mxu1 %v5424_v16  ;;  %12 = vst [vmem:[#allocation2] sm:$0x1] %v11_v25  ;;  %v5474_v30 = vld [vmem:[%s6105_s2 + $0x78] sm:$0xff] }
 0x146   :  { %v4253_v36 = vpack.c.bf16 %v1574_v27, %v1558_v18  ;;  %v4285_v37 = vpack.c.bf16 %v1576_v28, %v1560_v19  ;;  %1892 = vmatprep.mubr.f32.mxu0 %v4733_v3  ;;  %2053 = vmatprep.mubr.f32.mxu1 %v4733_v3 }
 0x147   :  { %v4251_v39 = vpack.c.bf16 %v1575_v33, %v1559_v31  ;;  %v4283_v21 = vpack.c.bf16 %v1577_v34, %v1561_v32  ;;  %v566_v40 = vpop.f32.mrb[56].mxu0  ;;  %v727_v42 = vpop.f32.mrb[56].mxu1 }
 0x148   :  { %v568_v43 = vpop.f32.mrb[57].mxu0  ;;  %v729_v44 = vpop.f32.mrb[57].mxu1  ;;  %v1590_v48 = vmax.f32 %v566_v40, 0.0  ;;  %v1592_v49 = vmax.f32 %v727_v42, 0.0 }
 0x149   :  { %1893 = vmatmul.mubr.f32.gmra.mrb[150].mxu0 %v5435_v38  ;;  %2054 = vmatmul.mubr.f32.gmra.mrb[150].mxu1 %v5435_v38  ;;  %v1591_v55 = vmax.f32 %v568_v43, 0.0  ;;  %v1593_v23 = vmax.f32 %v729_v44, 0.0 }
 0x14a   :  { %4252 = vmatprep.subr.bf16.mxu0 %v4251_v39  ;;  %4284 = vmatprep.subr.bf16.mxu1 %v4283_v21 }
 0x14b   :  { %4254 = vmatpush1.bf16.msra.mxu0 %v4253_v36  ;;  %4286 = vmatpush1.bf16.msra.mxu1 %v4285_v37  ;;  %v572_v46 = vpop.f32.mrb[58].mxu0  ;;  %v733_v22 = vpop.f32.mrb[58].mxu1 }
 0x14c   :  { %v1606_v51 = vmax.f32 %v572_v46, 0.0  ;;  %v1608_v52 = vmax.f32 %v733_v22, 0.0  ;;  %v574_v53 = vpop.f32.mrb[59].mxu0  ;;  %v735_v54 = vpop.f32.mrb[59].mxu1  ;;  %1898 = vmatprep.mubr.f32.mxu0 %v4733_v3  ;;  %2059 = vmatprep.mubr.f32.mxu1 %v4733_v3 }
 0x14d   :  { %v1607_v57 = vmax.f32 %v574_v53, 0.0  ;;  %v1609_v58 = vmax.f32 %v735_v54, 0.0  ;;  %1899 = vmatmul.mubr.f32.gmra.mrb[152].mxu0 %v5442_v45  ;;  %2060 = vmatmul.mubr.f32.gmra.mrb[152].mxu1 %v5442_v45 }
 0x14e   :  { %v4257_v59 = vpack.c.bf16 %v1606_v51, %v1590_v48  ;;  %v4289_v60 = vpack.c.bf16 %v1608_v52, %v1592_v49  ;;  %1904 = vmatprep.mubr.f32.mxu0 %v4733_v3  ;;  %2065 = vmatprep.mubr.f32.mxu1 %v4733_v3  ;;  %v3875_v48 = vld [vmem:[#allocation2] sm:$0x1] }
 0x14f   :  { %v4255_v62 = vpack.c.bf16 %v1607_v57, %v1591_v55  ;;  %v4287_v24 = vpack.c.bf16 %v1609_v58, %v1593_v23  ;;  %v578_v0 = vpop.f32.mrb[60].mxu0  ;;  %v739_v1 = vpop.f32.mrb[60].mxu1  ;;  %3878 = vperm.xlu0 %4682, %v3875_v48  }
 0x150   :  { %v580_v2 = vpop.f32.mrb[61].mxu0  ;;  %v741_v4 = vpop.f32.mrb[61].mxu1  ;;  %v1622_v7 = vmax.f32 %v578_v0, 0.0  ;;  %v1624_v11 = vmax.f32 %v739_v1, 0.0 }
 0x151   :  { %1905 = vmatmul.mubr.f32.gmra.mrb[154].mxu0 %v5453_v61  ;;  %2066 = vmatmul.mubr.f32.gmra.mrb[154].mxu1 %v5453_v61  ;;  %v1623_v17 = vmax.f32 %v580_v2, 0.0  ;;  %v1625_v18 = vmax.f32 %v741_v4, 0.0 }
 0x152   :  { %4256 = vmatprep.subr.bf16.mxu0 %v4255_v62  ;;  %4288 = vmatprep.subr.bf16.mxu1 %v4287_v24 }
 0x153   :  { %4258 = vmatpush1.bf16.msra.mxu0 %v4257_v59  ;;  %4290 = vmatpush1.bf16.msra.mxu1 %v4289_v60  ;;  %v584_v8 = vpop.f32.mrb[62].mxu0  ;;  %v745_v10 = vpop.f32.mrb[62].mxu1 }
 0x154   :  { %v1638_v12 = vmax.f32 %v584_v8, 0.0  ;;  %v1640_v13 = vmax.f32 %v745_v10, 0.0  ;;  %v586_v14 = vpop.f32.mrb[63].mxu0  ;;  %v747_v15 = vpop.f32.mrb[63].mxu1  ;;  %1910 = vmatprep.mubr.f32.mxu0 %v4733_v3  ;;  %2071 = vmatprep.mubr.f32.mxu1 %v4733_v3 }
 0x155   :  { %v1639_v19 = vmax.f32 %v586_v14, 0.0  ;;  %v1641_v27 = vmax.f32 %v747_v15, 0.0  ;;  %1911 = vmatmul.mubr.f32.gmra.mrb[156].mxu0 %v5460_v5  ;;  %2072 = vmatmul.mubr.f32.gmra.mrb[156].mxu1 %v5460_v5 }
 0x156   :  { %v4261_v28 = vpack.c.bf16 %v1638_v12, %v1622_v7  ;;  %v4293_v29 = vpack.c.bf16 %v1640_v13, %v1624_v11  ;;  %1916 = vmatprep.mubr.f32.mxu0 %v4733_v3  ;;  %2077 = vmatprep.mubr.f32.mxu1 %v4733_v3 }
 0x157   :  { %v4259_v31 = vpack.c.bf16 %v1639_v19, %v1623_v17  ;;  %v4291_v32 = vpack.c.bf16 %v1641_v27, %v1625_v18  ;;  %v816_v33 = vpop.f32.mrb[64].mxu0  ;;  %v977_v34 = vpop.f32.mrb[64].mxu1 }
 0x158   :  { %v818_v36 = vpop.f32.mrb[65].mxu0  ;;  %v979_v37 = vpop.f32.mrb[65].mxu1  ;;  %v1402_v39 = vmax.f32 %v816_v33, 0.0  ;;  %v1404_v21 = vmax.f32 %v977_v34, 0.0 }
 0x159   :  { %1917 = vmatmul.mubr.f32.gmra.mrb[158].mxu0 %v5474_v30  ;;  %2078 = vmatmul.mubr.f32.gmra.mrb[158].mxu1 %v5474_v30  ;;  %v1403_v49 = vmax.f32 %v818_v36, 0.0  ;;  %v1405_v51 = vmax.f32 %v979_v37, 0.0 }
 0x15a   :  { %4260 = vmatprep.subr.bf16.mxu0 %v4259_v31  ;;  %4292 = vmatprep.subr.bf16.mxu1 %v4291_v32 }
 0x15b   :  { %4262 = vmatpush1.bf16.msra.mxu0 %v4261_v28  ;;  %4294 = vmatpush1.bf16.msra.mxu1 %v4293_v29  ;;  %v822_v40 = vpop.f32.mrb[66].mxu0  ;;  %v983_v42 = vpop.f32.mrb[66].mxu1 }
 0x15c   :  { %v1418_v43 = vmax.f32 %v822_v40, 0.0  ;;  %v1420_v44 = vmax.f32 %v983_v42, 0.0  ;;  %v824_v46 = vpop.f32.mrb[67].mxu0  ;;  %v985_v22 = vpop.f32.mrb[67].mxu1  ;;  %2148 = vmatprep.mubr.f32.mxu0 %v4733_v3  ;;  %2309 = vmatprep.mubr.f32.mxu1 %v4733_v3 }
 0x15d   :  { %v1419_v52 = vmax.f32 %v824_v46, 0.0  ;;  %v1421_v53 = vmax.f32 %v985_v22, 0.0 }
 0x15e   :  { %v4297_v54 = vpack.c.bf16 %v1418_v43, %v1402_v39  ;;  %v4329_v55 = vpack.c.bf16 %v1420_v44, %v1404_v21  ;;  %2149 = vmatmul.mubr.f32.vlgmr.msra.gmra.mrb[160].mxu0 %v5321_v26  ;;  %2310 = vmatmul.mubr.f32.vlgmr.msra.gmra.mrb[160].mxu1 %v5321_v26 }
 0x15f   :  { %v4295_v23 = vpack.c.bf16 %v1419_v52, %v1403_v49  ;;  %v4327_v57 = vpack.c.bf16 %v1421_v53, %v1405_v51  ;;  %v828_v58 = vpop.f32.mrb[68].mxu0  ;;  %v989_v59 = vpop.f32.mrb[68].mxu1  ;;  %2154 = vmatprep.mubr.f32.mxu0 %v4733_v3  ;;  %2315 = vmatprep.mubr.f32.mxu1 %v4733_v3 }
 0x160   :  { %v830_v60 = vpop.f32.mrb[69].mxu0  ;;  %v991_v62 = vpop.f32.mrb[69].mxu1  ;;  %v1434_v0 = vmax.f32 %v828_v58, 0.0  ;;  %v1436_v1 = vmax.f32 %v989_v59, 0.0 }
 0x161   :  { %4296 = vmatprep.subr.bf16.mxu0 %v4295_v23  ;;  %4328 = vmatprep.subr.bf16.mxu1 %v4327_v57  ;;  %v1435_v10 = vmax.f32 %v830_v60, 0.0  ;;  %v1437_v11 = vmax.f32 %v991_v62, 0.0 }
 0x162   :  { %2155 = vmatmul.mubr.f32.gmra.mrb[162].mxu0 %v5333_v41  ;;  %2316 = vmatmul.mubr.f32.gmra.mrb[162].mxu1 %v5333_v41 }
 0x163   :  { %4298 = vmatpush1.bf16.msra.mxu0 %v4297_v54  ;;  %4330 = vmatpush1.bf16.msra.mxu1 %v4329_v55  ;;  %v834_v24 = vpop.f32.mrb[70].mxu0  ;;  %v995_v26 = vpop.f32.mrb[70].mxu1 }
 0x164   :  { %v1450_v2 = vmax.f32 %v834_v24, 0.0  ;;  %v1452_v4 = vmax.f32 %v995_v26, 0.0  ;;  %v836_v7 = vpop.f32.mrb[71].mxu0  ;;  %v997_v8 = vpop.f32.mrb[71].mxu1  ;;  %2160 = vmatprep.mubr.f32.mxu0 %v4733_v3  ;;  %2321 = vmatprep.mubr.f32.mxu1 %v4733_v3 }
 0x165   :  { %v1451_v12 = vmax.f32 %v836_v7, 0.0  ;;  %v1453_v13 = vmax.f32 %v997_v8, 0.0 }
 0x166   :  { %v4301_v14 = vpack.c.bf16 %v1450_v2, %v1434_v0  ;;  %v4333_v41 = vpack.c.bf16 %v1452_v4, %v1436_v1  ;;  %2161 = vmatmul.mubr.f32.gmra.mrb[164].mxu0 %v5340_v47  ;;  %2322 = vmatmul.mubr.f32.gmra.mrb[164].mxu1 %v5340_v47 }
 0x167   :  { %v4299_v15 = vpack.c.bf16 %v1451_v12, %v1435_v10  ;;  %v4331_v25 = vpack.c.bf16 %v1453_v13, %v1437_v11  ;;  %v840_v17 = vpop.f32.mrb[72].mxu0  ;;  %v1001_v18 = vpop.f32.mrb[72].mxu1  ;;  %2166 = vmatprep.mubr.f32.mxu0 %v4733_v3  ;;  %2327 = vmatprep.mubr.f32.mxu1 %v4733_v3 }
 0x168   :  { %v842_v19 = vpop.f32.mrb[73].mxu0  ;;  %v1003_v27 = vpop.f32.mrb[73].mxu1  ;;  %v1466_v29 = vmax.f32 %v840_v17, 0.0  ;;  %v1468_v31 = vmax.f32 %v1001_v18, 0.0 }
 0x169   :  { %4300 = vmatprep.subr.bf16.mxu0 %v4299_v15  ;;  %4332 = vmatprep.subr.bf16.mxu1 %v4331_v25  ;;  %v1467_v37 = vmax.f32 %v842_v19, 0.0  ;;  %v1469_v39 = vmax.f32 %v1003_v27, 0.0 }
 0x16a   :  { %2167 = vmatmul.mubr.f32.gmra.mrb[166].mxu0 %v5357_v63  ;;  %2328 = vmatmul.mubr.f32.gmra.mrb[166].mxu1 %v5357_v63 }
 0x16b   :  { %4302 = vmatpush1.bf16.msra.mxu0 %v4301_v14  ;;  %4334 = vmatpush1.bf16.msra.mxu1 %v4333_v41  ;;  %v846_v28 = vpop.f32.mrb[74].mxu0  ;;  %v1007_v47 = vpop.f32.mrb[74].mxu1 }
 0x16c   :  { %v1482_v32 = vmax.f32 %v846_v28, 0.0  ;;  %v1484_v33 = vmax.f32 %v1007_v47, 0.0  ;;  %v848_v34 = vpop.f32.mrb[75].mxu0  ;;  %v1009_v36 = vpop.f32.mrb[75].mxu1  ;;  %2172 = vmatprep.mubr.f32.mxu0 %v4733_v3  ;;  %2333 = vmatprep.mubr.f32.mxu1 %v4733_v3 }
 0x16d   :  { %v1483_v21 = vmax.f32 %v848_v34, 0.0  ;;  %v1485_v40 = vmax.f32 %v1009_v36, 0.0 }
 0x16e   :  { %v4305_v42 = vpack.c.bf16 %v1482_v32, %v1466_v29  ;;  %v4337_v63 = vpack.c.bf16 %v1484_v33, %v1468_v31  ;;  %2173 = vmatmul.mubr.f32.gmra.mrb[168].mxu0 %v5364_v6  ;;  %2334 = vmatmul.mubr.f32.gmra.mrb[168].mxu1 %v5364_v6 }
 0x16f   :  { %v4303_v43 = vpack.c.bf16 %v1483_v21, %v1467_v37  ;;  %v4335_v44 = vpack.c.bf16 %v1485_v40, %v1469_v39  ;;  %v852_v46 = vpop.f32.mrb[76].mxu0  ;;  %v1013_v22 = vpop.f32.mrb[76].mxu1  ;;  %2178 = vmatprep.mubr.f32.mxu0 %v4733_v3  ;;  %2339 = vmatprep.mubr.f32.mxu1 %v4733_v3 }
 0x170   :  { %v854_v48 = vpop.f32.mrb[77].mxu0  ;;  %v1015_v49 = vpop.f32.mrb[77].mxu1  ;;  %v1498_v52 = vmax.f32 %v852_v46, 0.0  ;;  %v1500_v53 = vmax.f32 %v1013_v22, 0.0 }
 0x171   :  { %4304 = vmatprep.subr.bf16.mxu0 %v4303_v43  ;;  %4336 = vmatprep.subr.bf16.mxu1 %v4335_v44  ;;  %v1499_v58 = vmax.f32 %v854_v48, 0.0  ;;  %v1501_v59 = vmax.f32 %v1015_v49, 0.0 }
 0x172   :  { %2179 = vmatmul.mubr.f32.gmra.mrb[170].mxu0 %v5381_v20  ;;  %2340 = vmatmul.mubr.f32.gmra.mrb[170].mxu1 %v5381_v20 }
 0x173   :  { %4306 = vmatpush1.bf16.msra.mxu0 %v4305_v42  ;;  %4338 = vmatpush1.bf16.msra.mxu1 %v4337_v63  ;;  %v858_v51 = vpop.f32.mrb[78].mxu0  ;;  %v1019_v6 = vpop.f32.mrb[78].mxu1 }
 0x174   :  { %v1514_v54 = vmax.f32 %v858_v51, 0.0  ;;  %v1516_v55 = vmax.f32 %v1019_v6, 0.0  ;;  %v860_v23 = vpop.f32.mrb[79].mxu0  ;;  %v1021_v57 = vpop.f32.mrb[79].mxu1  ;;  %2184 = vmatprep.mubr.f32.mxu0 %v4733_v3  ;;  %2345 = vmatprep.mubr.f32.mxu1 %v4733_v3 }
 0x175   :  { %v1515_v60 = vmax.f32 %v860_v23, 0.0  ;;  %v1517_v62 = vmax.f32 %v1021_v57, 0.0 }
 0x176   :  { %v4309_v24 = vpack.c.bf16 %v1514_v54, %v1498_v52  ;;  %v4341_v20 = vpack.c.bf16 %v1516_v55, %v1500_v53  ;;  %2185 = vmatmul.mubr.f32.gmra.mrb[172].mxu0 %v5388_v35  ;;  %2346 = vmatmul.mubr.f32.gmra.mrb[172].mxu1 %v5388_v35 }
 0x177   :  { %v4307_v26 = vpack.c.bf16 %v1515_v60, %v1499_v58  ;;  %v4339_v0 = vpack.c.bf16 %v1517_v62, %v1501_v59  ;;  %v864_v1 = vpop.f32.mrb[80].mxu0  ;;  %v1025_v2 = vpop.f32.mrb[80].mxu1  ;;  %2190 = vmatprep.mubr.f32.mxu0 %v4733_v3  ;;  %2351 = vmatprep.mubr.f32.mxu1 %v4733_v3 }
 0x178   :  { %v866_v4 = vpop.f32.mrb[81].mxu0  ;;  %v1027_v7 = vpop.f32.mrb[81].mxu1  ;;  %v1530_v10 = vmax.f32 %v864_v1, 0.0  ;;  %v1532_v11 = vmax.f32 %v1025_v2, 0.0 }
 0x179   :  { %4308 = vmatprep.subr.bf16.mxu0 %v4307_v26  ;;  %4340 = vmatprep.subr.bf16.mxu1 %v4339_v0  ;;  %v1531_v15 = vmax.f32 %v866_v4, 0.0  ;;  %v1533_v25 = vmax.f32 %v1027_v7, 0.0 }
 0x17a   :  { %2191 = vmatmul.mubr.f32.gmra.mrb[174].mxu0 %v5399_v50  ;;  %2352 = vmatmul.mubr.f32.gmra.mrb[174].mxu1 %v5399_v50 }
 0x17b   :  { %4310 = vmatpush1.bf16.msra.mxu0 %v4309_v24  ;;  %4342 = vmatpush1.bf16.msra.mxu1 %v4341_v20  ;;  %v870_v8 = vpop.f32.mrb[82].mxu0  ;;  %v1031_v35 = vpop.f32.mrb[82].mxu1 }
 0x17c   :  { %v1546_v12 = vmax.f32 %v870_v8, 0.0  ;;  %v1548_v13 = vmax.f32 %v1031_v35, 0.0  ;;  %v872_v14 = vpop.f32.mrb[83].mxu0  ;;  %v1033_v41 = vpop.f32.mrb[83].mxu1  ;;  %2196 = vmatprep.mubr.f32.mxu0 %v4733_v3  ;;  %2357 = vmatprep.mubr.f32.mxu1 %v4733_v3 }
 0x17d   :  { %v1547_v17 = vmax.f32 %v872_v14, 0.0  ;;  %v1549_v18 = vmax.f32 %v1033_v41, 0.0 }
 0x17e   :  { %v4313_v19 = vpack.c.bf16 %v1546_v12, %v1530_v10  ;;  %v4345_v50 = vpack.c.bf16 %v1548_v13, %v1532_v11  ;;  %2197 = vmatmul.mubr.f32.gmra.mrb[176].mxu0 %v5406_v56  ;;  %2358 = vmatmul.mubr.f32.gmra.mrb[176].mxu1 %v5406_v56 }
 0x17f   :  { %v4311_v27 = vpack.c.bf16 %v1547_v17, %v1531_v15  ;;  %v4343_v28 = vpack.c.bf16 %v1549_v18, %v1533_v25  ;;  %v876_v47 = vpop.f32.mrb[84].mxu0  ;;  %v1037_v29 = vpop.f32.mrb[84].mxu1  ;;  %2202 = vmatprep.mubr.f32.mxu0 %v4733_v3  ;;  %2363 = vmatprep.mubr.f32.mxu1 %v4733_v3 }
 0x180   :  { %v878_v31 = vpop.f32.mrb[85].mxu0  ;;  %v1039_v32 = vpop.f32.mrb[85].mxu1  ;;  %v1562_v34 = vmax.f32 %v876_v47, 0.0  ;;  %v1564_v36 = vmax.f32 %v1037_v29, 0.0 }
 0x181   :  { %4312 = vmatprep.subr.bf16.mxu0 %v4311_v27  ;;  %4344 = vmatprep.subr.bf16.mxu1 %v4343_v28  ;;  %v1563_v42 = vmax.f32 %v878_v31, 0.0  ;;  %v1565_v63 = vmax.f32 %v1039_v32, 0.0 }
 0x182   :  { %2203 = vmatmul.mubr.f32.gmra.mrb[178].mxu0 %v5417_v9  ;;  %2364 = vmatmul.mubr.f32.gmra.mrb[178].mxu1 %v5417_v9 }
 0x183   :  { %4314 = vmatpush1.bf16.msra.mxu0 %v4313_v19  ;;  %4346 = vmatpush1.bf16.msra.mxu1 %v4345_v50  ;;  %v882_v33 = vpop.f32.mrb[86].mxu0  ;;  %v1043_v56 = vpop.f32.mrb[86].mxu1 }
 0x184   :  { %v1578_v37 = vmax.f32 %v882_v33, 0.0  ;;  %v1580_v39 = vmax.f32 %v1043_v56, 0.0  ;;  %v884_v21 = vpop.f32.mrb[87].mxu0  ;;  %v1045_v40 = vpop.f32.mrb[87].mxu1  ;;  %2208 = vmatprep.mubr.f32.mxu0 %v4733_v3  ;;  %2369 = vmatprep.mubr.f32.mxu1 %v4733_v3 }
 0x185   :  { %v1579_v43 = vmax.f32 %v884_v21, 0.0  ;;  %v1581_v44 = vmax.f32 %v1045_v40, 0.0 }
 0x186   :  { %v4317_v46 = vpack.c.bf16 %v1578_v37, %v1562_v34  ;;  %v4349_v9 = vpack.c.bf16 %v1580_v39, %v1564_v36  ;;  %2209 = vmatmul.mubr.f32.gmra.mrb[180].mxu0 %v5424_v16  ;;  %2370 = vmatmul.mubr.f32.gmra.mrb[180].mxu1 %v5424_v16 }
 0x187   :  { %v4315_v22 = vpack.c.bf16 %v1579_v43, %v1563_v42  ;;  %v4347_v48 = vpack.c.bf16 %v1581_v44, %v1565_v63  ;;  %v888_v49 = vpop.f32.mrb[88].mxu0  ;;  %v1049_v51 = vpop.f32.mrb[88].mxu1  ;;  %2214 = vmatprep.mubr.f32.mxu0 %v4733_v3  ;;  %2375 = vmatprep.mubr.f32.mxu1 %v4733_v3  ;;  %v5547_v44 = vld [vmem:[%s6105_s2] sm:$0xff] }
 0x188   :  { %v890_v6 = vpop.f32.mrb[89].mxu0  ;;  %v1051_v52 = vpop.f32.mrb[89].mxu1  ;;  %v1594_v54 = vmax.f32 %v888_v49, 0.0  ;;  %v1596_v55 = vmax.f32 %v1049_v51, 0.0 }
 0x189   :  { %4316 = vmatprep.subr.bf16.mxu0 %v4315_v22  ;;  %4348 = vmatprep.subr.bf16.mxu1 %v4347_v48  ;;  %v1595_v60 = vmax.f32 %v890_v6, 0.0  ;;  %v1597_v62 = vmax.f32 %v1051_v52, 0.0  ;;  %v5556_v6 = vld [vmem:[%s6105_s2 + $0x8] sm:$0xff] }
 0x18a   :  { %2215 = vmatmul.mubr.f32.gmra.mrb[182].mxu0 %v5435_v38  ;;  %2376 = vmatmul.mubr.f32.gmra.mrb[182].mxu1 %v5435_v38 }
 0x18b   :  { %4318 = vmatpush1.bf16.msra.mxu0 %v4317_v46  ;;  %4350 = vmatpush1.bf16.msra.mxu1 %v4349_v9  ;;  %v894_v53 = vpop.f32.mrb[90].mxu0  ;;  %v1055_v16 = vpop.f32.mrb[90].mxu1 }
 0x18c   :  { %v1610_v23 = vmax.f32 %v894_v53, 0.0  ;;  %v1612_v57 = vmax.f32 %v1055_v16, 0.0  ;;  %v896_v58 = vpop.f32.mrb[91].mxu0  ;;  %v1057_v59 = vpop.f32.mrb[91].mxu1  ;;  %2220 = vmatprep.mubr.f32.mxu0 %v4733_v3  ;;  %2381 = vmatprep.mubr.f32.mxu1 %v4733_v3 }
 0x18d   :  { %v1611_v24 = vmax.f32 %v896_v58, 0.0  ;;  %v1613_v20 = vmax.f32 %v1057_v59, 0.0 }
 0x18e   :  { %v4321_v26 = vpack.c.bf16 %v1610_v23, %v1594_v54  ;;  %v4353_v38 = vpack.c.bf16 %v1612_v57, %v1596_v55  ;;  %2221 = vmatmul.mubr.f32.gmra.mrb[184].mxu0 %v5442_v45  ;;  %2382 = vmatmul.mubr.f32.gmra.mrb[184].mxu1 %v5442_v45 }
 0x18f   :  { %v4319_v0 = vpack.c.bf16 %v1611_v24, %v1595_v60  ;;  %v4351_v1 = vpack.c.bf16 %v1613_v20, %v1597_v62  ;;  %v900_v2 = vpop.f32.mrb[92].mxu0  ;;  %v1061_v4 = vpop.f32.mrb[92].mxu1  ;;  %2226 = vmatprep.mubr.f32.mxu0 %v4733_v3  ;;  %2387 = vmatprep.mubr.f32.mxu1 %v4733_v3 }
 0x190   :  { %v902_v7 = vpop.f32.mrb[93].mxu0  ;;  %v1063_v8 = vpop.f32.mrb[93].mxu1  ;;  %v1626_v10 = vmax.f32 %v900_v2, 0.0  ;;  %v1628_v11 = vmax.f32 %v1061_v4, 0.0 }
 0x191   :  { %4320 = vmatprep.subr.bf16.mxu0 %v4319_v0  ;;  %4352 = vmatprep.subr.bf16.mxu1 %v4351_v1  ;;  %v1627_v15 = vmax.f32 %v902_v7, 0.0  ;;  %v1629_v25 = vmax.f32 %v1063_v8, 0.0 }
 0x192   :  { %2227 = vmatmul.mubr.f32.gmra.mrb[186].mxu0 %v5453_v61  ;;  %2388 = vmatmul.mubr.f32.gmra.mrb[186].mxu1 %v5453_v61 }
 0x193   :  { %4322 = vmatpush1.bf16.msra.mxu0 %v4321_v26  ;;  %4354 = vmatpush1.bf16.msra.mxu1 %v4353_v38  ;;  %v906_v35 = vpop.f32.mrb[94].mxu0  ;;  %v1067_v45 = vpop.f32.mrb[94].mxu1  ;;  %v5565_v38 = vld [vmem:[%s6105_s2 + $0x10] sm:$0xff] }
 0x194   :  { %v1642_v12 = vmax.f32 %v906_v35, 0.0  ;;  %v1644_v13 = vmax.f32 %v1067_v45, 0.0  ;;  %v908_v14 = vpop.f32.mrb[95].mxu0  ;;  %v1069_v41 = vpop.f32.mrb[95].mxu1  ;;  %2232 = vmatprep.mubr.f32.mxu0 %v4733_v3  ;;  %2393 = vmatprep.mubr.f32.mxu1 %v4733_v3  ;;  %v5574_v35 = vld [vmem:[%s6105_s2 + $0x18] sm:$0xff] }
 0x195   :  { %v1643_v17 = vmax.f32 %v908_v14, 0.0  ;;  %v1645_v18 = vmax.f32 %v1069_v41, 0.0 }
 0x196   :  { %v4325_v19 = vpack.c.bf16 %v1642_v12, %v1626_v10  ;;  %v4357_v61 = vpack.c.bf16 %v1644_v13, %v1628_v11  ;;  %2233 = vmatmul.mubr.f32.gmra.mrb[188].mxu0 %v5460_v5  ;;  %2394 = vmatmul.mubr.f32.gmra.mrb[188].mxu1 %v5460_v5 }
 0x197   :  { %v4323_v50 = vpack.c.bf16 %v1643_v17, %v1627_v15  ;;  %v4355_v27 = vpack.c.bf16 %v1645_v18, %v1629_v25  ;;  %v1138_v28 = vpop.f32.mrb[96].mxu0  ;;  %v1299_v47 = vpop.f32.mrb[96].mxu1  ;;  %2238 = vmatprep.mubr.f32.mxu0 %v4733_v3  ;;  %2399 = vmatprep.mubr.f32.mxu1 %v4733_v3 }
 0x198   :  { %v1140_v29 = vpop.f32.mrb[97].mxu0  ;;  %v1301_v31 = vpop.f32.mrb[97].mxu1  ;;  %v1406_v33 = vmax.f32 %v1138_v28, 0.0  ;;  %v1408_v56 = vmax.f32 %v1299_v47, 0.0 }
 0x199   :  { %4324 = vmatprep.subr.bf16.mxu0 %v4323_v50  ;;  %4356 = vmatprep.subr.bf16.mxu1 %v4355_v27  ;;  %v1407_v21 = vmax.f32 %v1140_v29, 0.0  ;;  %v1409_v40 = vmax.f32 %v1301_v31, 0.0  ;;  %v5583_v27 = vld [vmem:[%s6105_s2 + $0x20] sm:$0xff] }
 0x19a   :  { %2239 = vmatmul.mubr.f32.gmra.mrb[190].mxu0 %v5474_v30  ;;  %2400 = vmatmul.mubr.f32.gmra.mrb[190].mxu1 %v5474_v30 }
 0x19b   :  { %4326 = vmatpush1.bf16.msra.mxu0 %v4325_v19  ;;  %4358 = vmatpush1.bf16.msra.mxu1 %v4357_v61  ;;  %v1144_v32 = vpop.f32.mrb[98].mxu0  ;;  %v1305_v5 = vpop.f32.mrb[98].mxu1 }
 0x19c   :  { %v1422_v34 = vmax.f32 %v1144_v32, 0.0  ;;  %v1424_v36 = vmax.f32 %v1305_v5, 0.0  ;;  %v1146_v37 = vpop.f32.mrb[99].mxu0  ;;  %v1307_v39 = vpop.f32.mrb[99].mxu1  ;;  %2470 = vmatprep.mubr.f32.mxu0 %v4733_v3  ;;  %2631 = vmatprep.mubr.f32.mxu1 %v4733_v3 }
 0x19d   :  { %v1423_v42 = vmax.f32 %v1146_v37, 0.0  ;;  %v1425_v63 = vmax.f32 %v1307_v39, 0.0 }
 0x19e   :  { %v4361_v43 = vpack.c.bf16 %v1422_v34, %v1406_v33  ;;  %v4393_v30 = vpack.c.bf16 %v1424_v36, %v1408_v56  ;;  %2471 = vmatmul.mubr.f32.vlgmr.msra.gmra.mrb[192].mxu0 %v5547_v44  ;;  %2632 = vmatmul.mubr.f32.vlgmr.msra.gmra.mrb[192].mxu1 %v5547_v44  ;;  %v5592_v33 = vld [vmem:[%s6105_s2 + $0x28] sm:$0xff] }
 0x19f   :  { %v4359_v46 = vpack.c.bf16 %v1423_v42, %v1407_v21  ;;  %v4391_v9 = vpack.c.bf16 %v1425_v63, %v1409_v40  ;;  %v1150_v22 = vpop.f32.mrb[100].mxu0  ;;  %v1311_v48 = vpop.f32.mrb[100].mxu1  ;;  %2476 = vmatprep.mubr.f32.mxu0 %v4733_v3  ;;  %2637 = vmatprep.mubr.f32.mxu1 %v4733_v3 }
 0x1a0   :  { %v1152_v49 = vpop.f32.mrb[101].mxu0  ;;  %v1313_v51 = vpop.f32.mrb[101].mxu1  ;;  %v1438_v16 = vmax.f32 %v1150_v22, 0.0  ;;  %v1440_v54 = vmax.f32 %v1311_v48, 0.0  ;;  %v5601_v48 = vld [vmem:[%s6105_s2 + $0x30] sm:$0xff] }
 0x1a1   :  { %4360 = vmatprep.subr.bf16.mxu0 %v4359_v46  ;;  %4392 = vmatprep.subr.bf16.mxu1 %v4391_v9  ;;  %v1439_v59 = vmax.f32 %v1152_v49, 0.0  ;;  %v1441_v60 = vmax.f32 %v1313_v51, 0.0 }
 0x1a2   :  { %2477 = vmatmul.mubr.f32.gmra.mrb[194].mxu0 %v5556_v6  ;;  %2638 = vmatmul.mubr.f32.gmra.mrb[194].mxu1 %v5556_v6 }
 0x1a3   :  { %4362 = vmatpush1.bf16.msra.mxu0 %v4361_v43  ;;  %4394 = vmatpush1.bf16.msra.mxu1 %v4393_v30  ;;  %v1156_v52 = vpop.f32.mrb[102].mxu0  ;;  %v1317_v53 = vpop.f32.mrb[102].mxu1 }
 0x1a4   :  { %v1454_v55 = vmax.f32 %v1156_v52, 0.0  ;;  %v1456_v23 = vmax.f32 %v1317_v53, 0.0  ;;  %v1158_v57 = vpop.f32.mrb[103].mxu0  ;;  %v1319_v58 = vpop.f32.mrb[103].mxu1  ;;  %2482 = vmatprep.mubr.f32.mxu0 %v4733_v3  ;;  %2643 = vmatprep.mubr.f32.mxu1 %v4733_v3 }
 0x1a5   :  { %v1455_v62 = vmax.f32 %v1158_v57, 0.0  ;;  %v1457_v24 = vmax.f32 %v1319_v58, 0.0 }
 0x1a6   :  { %v4365_v20 = vpack.c.bf16 %v1454_v55, %v1438_v16  ;;  %v4397_v26 = vpack.c.bf16 %v1456_v23, %v1440_v54  ;;  %2483 = vmatmul.mubr.f32.gmra.mrb[196].mxu0 %v5565_v38  ;;  %2644 = vmatmul.mubr.f32.gmra.mrb[196].mxu1 %v5565_v38  ;;  %v5610_v55 = vld [vmem:[%s6105_s2 + $0x38] sm:$0xff] }
 0x1a7   :  { %v4363_v0 = vpack.c.bf16 %v1455_v62, %v1439_v59  ;;  %v4395_v1 = vpack.c.bf16 %v1457_v24, %v1441_v60  ;;  %v1162_v2 = vpop.f32.mrb[104].mxu0  ;;  %v1323_v4 = vpop.f32.mrb[104].mxu1  ;;  %2488 = vmatprep.mubr.f32.mxu0 %v4733_v3  ;;  %2649 = vmatprep.mubr.f32.mxu1 %v4733_v3 }
 0x1a8   :  { %v1164_v7 = vpop.f32.mrb[105].mxu0  ;;  %v1325_v8 = vpop.f32.mrb[105].mxu1  ;;  %v1470_v11 = vmax.f32 %v1162_v2, 0.0  ;;  %v1472_v12 = vmax.f32 %v1323_v4, 0.0 }
 0x1a9   :  { %4364 = vmatprep.subr.bf16.mxu0 %v4363_v0  ;;  %4396 = vmatprep.subr.bf16.mxu1 %v4395_v1  ;;  %v1471_v25 = vmax.f32 %v1164_v7, 0.0  ;;  %v1473_v17 = vmax.f32 %v1325_v8, 0.0  ;;  %v5619_v8 = vld [vmem:[%s6105_s2 + $0x40] sm:$0xff] }
 0x1aa   :  { %2489 = vmatmul.mubr.f32.gmra.mrb[198].mxu0 %v5574_v35  ;;  %2650 = vmatmul.mubr.f32.gmra.mrb[198].mxu1 %v5574_v35 }
 0x1ab   :  { %4366 = vmatpush1.bf16.msra.mxu0 %v4365_v20  ;;  %4398 = vmatpush1.bf16.msra.mxu1 %v4397_v26  ;;  %v1168_v45 = vpop.f32.mrb[106].mxu0  ;;  %v1329_v10 = vpop.f32.mrb[106].mxu1 }
 0x1ac   :  { %v1486_v13 = vmax.f32 %v1168_v45, 0.0  ;;  %v1488_v14 = vmax.f32 %v1329_v10, 0.0  ;;  %v1170_v41 = vpop.f32.mrb[107].mxu0  ;;  %v1331_v15 = vpop.f32.mrb[107].mxu1  ;;  %2494 = vmatprep.mubr.f32.mxu0 %v4733_v3  ;;  %2655 = vmatprep.mubr.f32.mxu1 %v4733_v3 }
 0x1ad   :  { %v1487_v18 = vmax.f32 %v1170_v41, 0.0  ;;  %v1489_v19 = vmax.f32 %v1331_v15, 0.0  ;;  %v5628_v41 = vld [vmem:[%s6105_s2 + $0x48] sm:$0xff] }
 0x1ae   :  { %v4369_v61 = vpack.c.bf16 %v1486_v13, %v1470_v11  ;;  %v4401_v50 = vpack.c.bf16 %v1488_v14, %v1472_v12  ;;  %2495 = vmatmul.mubr.f32.gmra.mrb[200].mxu0 %v5583_v27  ;;  %2656 = vmatmul.mubr.f32.gmra.mrb[200].mxu1 %v5583_v27 }
 0x1af   :  { %v4367_v28 = vpack.c.bf16 %v1487_v18, %v1471_v25  ;;  %v4399_v47 = vpack.c.bf16 %v1489_v19, %v1473_v17  ;;  %v1174_v29 = vpop.f32.mrb[108].mxu0  ;;  %v1335_v31 = vpop.f32.mrb[108].mxu1  ;;  %2500 = vmatprep.mubr.f32.mxu0 %v4733_v3  ;;  %2661 = vmatprep.mubr.f32.mxu1 %v4733_v3 }
 0x1b0   :  { %v1176_v32 = vpop.f32.mrb[109].mxu0  ;;  %v1337_v5 = vpop.f32.mrb[109].mxu1  ;;  %v1502_v36 = vmax.f32 %v1174_v29, 0.0  ;;  %v1504_v37 = vmax.f32 %v1335_v31, 0.0 }
 0x1b1   :  { %4368 = vmatprep.subr.bf16.mxu0 %v4367_v28  ;;  %4400 = vmatprep.subr.bf16.mxu1 %v4399_v47  ;;  %v1503_v63 = vmax.f32 %v1176_v32, 0.0  ;;  %v1505_v43 = vmax.f32 %v1337_v5, 0.0 }
 0x1b2   :  { %2501 = vmatmul.mubr.f32.gmra.mrb[202].mxu0 %v5592_v33  ;;  %2662 = vmatmul.mubr.f32.gmra.mrb[202].mxu1 %v5592_v33 }
 0x1b3   :  { %4370 = vmatpush1.bf16.msra.mxu0 %v4369_v61  ;;  %4402 = vmatpush1.bf16.msra.mxu1 %v4401_v50  ;;  %v1180_v56 = vpop.f32.mrb[110].mxu0  ;;  %v1341_v34 = vpop.f32.mrb[110].mxu1 }
 0x1b4   :  { %v1518_v39 = vmax.f32 %v1180_v56, 0.0  ;;  %v1520_v21 = vmax.f32 %v1341_v34, 0.0  ;;  %v1182_v40 = vpop.f32.mrb[111].mxu0  ;;  %v1343_v42 = vpop.f32.mrb[111].mxu1  ;;  %2506 = vmatprep.mubr.f32.mxu0 %v4733_v3  ;;  %2667 = vmatprep.mubr.f32.mxu1 %v4733_v3  ;;  %v5637_v34 = vld [vmem:[%s6105_s2 + $0x50] sm:$0xff] }
 0x1b5   :  { %v1519_v30 = vmax.f32 %v1182_v40, 0.0  ;;  %v1521_v46 = vmax.f32 %v1343_v42, 0.0 }
 0x1b6   :  { %v4373_v9 = vpack.c.bf16 %v1518_v39, %v1502_v36  ;;  %v4405_v22 = vpack.c.bf16 %v1520_v21, %v1504_v37  ;;  %2507 = vmatmul.mubr.f32.gmra.mrb[204].mxu0 %v5601_v48  ;;  %2668 = vmatmul.mubr.f32.gmra.mrb[204].mxu1 %v5601_v48 }
 0x1b7   :  { %v4371_v49 = vpack.c.bf16 %v1519_v30, %v1503_v63  ;;  %v4403_v51 = vpack.c.bf16 %v1521_v46, %v1505_v43  ;;  %v1186_v52 = vpop.f32.mrb[112].mxu0  ;;  %v1347_v53 = vpop.f32.mrb[112].mxu1  ;;  %2512 = vmatprep.mubr.f32.mxu0 %v4733_v3  ;;  %2673 = vmatprep.mubr.f32.mxu1 %v4733_v3  ;;  %v5646_v63 = vld [vmem:[%s6105_s2 + $0x58] sm:$0xff] }
 0x1b8   :  { %v1188_v16 = vpop.f32.mrb[113].mxu0  ;;  %v1349_v54 = vpop.f32.mrb[113].mxu1  ;;  %v1534_v58 = vmax.f32 %v1186_v52, 0.0  ;;  %v1536_v59 = vmax.f32 %v1347_v53, 0.0 }
 0x1b9   :  { %4372 = vmatprep.subr.bf16.mxu0 %v4371_v49  ;;  %4404 = vmatprep.subr.bf16.mxu1 %v4403_v51  ;;  %v1535_v26 = vmax.f32 %v1188_v16, 0.0  ;;  %v1537_v0 = vmax.f32 %v1349_v54, 0.0 }
 0x1ba   :  { %2513 = vmatmul.mubr.f32.gmra.mrb[206].mxu0 %v5610_v55  ;;  %2674 = vmatmul.mubr.f32.gmra.mrb[206].mxu1 %v5610_v55 }
 0x1bb   :  { %4374 = vmatpush1.bf16.msra.mxu0 %v4373_v9  ;;  %4406 = vmatpush1.bf16.msra.mxu1 %v4405_v22  ;;  %v1192_v23 = vpop.f32.mrb[114].mxu0  ;;  %v1353_v57 = vpop.f32.mrb[114].mxu1 }
 0x1bc   :  { %v1550_v60 = vmax.f32 %v1192_v23, 0.0  ;;  %v1552_v62 = vmax.f32 %v1353_v57, 0.0  ;;  %v1194_v24 = vpop.f32.mrb[115].mxu0  ;;  %v1355_v20 = vpop.f32.mrb[115].mxu1  ;;  %2518 = vmatprep.mubr.f32.mxu0 %v4733_v3  ;;  %2679 = vmatprep.mubr.f32.mxu1 %v4733_v3 }
 0x1bd   :  { %v1551_v1 = vmax.f32 %v1194_v24, 0.0  ;;  %v1553_v2 = vmax.f32 %v1355_v20, 0.0 }
 0x1be   :  { %v4377_v4 = vpack.c.bf16 %v1550_v60, %v1534_v58  ;;  %v4409_v7 = vpack.c.bf16 %v1552_v62, %v1536_v59  ;;  %2519 = vmatmul.mubr.f32.gmra.mrb[208].mxu0 %v5619_v8  ;;  %2680 = vmatmul.mubr.f32.gmra.mrb[208].mxu1 %v5619_v8  ;;  %v5655_v59 = vld [vmem:[%s6105_s2 + $0x60] sm:$0xff] }
 0x1bf   :  { %v4375_v45 = vpack.c.bf16 %v1551_v1, %v1535_v26  ;;  %v4407_v10 = vpack.c.bf16 %v1553_v2, %v1537_v0  ;;  %v1198_v11 = vpop.f32.mrb[116].mxu0  ;;  %v1359_v12 = vpop.f32.mrb[116].mxu1  ;;  %2524 = vmatprep.mubr.f32.mxu0 %v4733_v3  ;;  %2685 = vmatprep.mubr.f32.mxu1 %v4733_v3  ;;  %v5664_v1 = vld [vmem:[%s6105_s2 + $0x68] sm:$0xff] }
 0x1c0   :  { %v1200_v13 = vpop.f32.mrb[117].mxu0  ;;  %v1361_v14 = vpop.f32.mrb[117].mxu1  ;;  %v1566_v17 = vmax.f32 %v1198_v11, 0.0  ;;  %v1568_v18 = vmax.f32 %v1359_v12, 0.0 }
 0x1c1   :  { %4376 = vmatprep.subr.bf16.mxu0 %v4375_v45  ;;  %4408 = vmatprep.subr.bf16.mxu1 %v4407_v10  ;;  %v1567_v47 = vmax.f32 %v1200_v13, 0.0  ;;  %v1569_v29 = vmax.f32 %v1361_v14, 0.0 }
 0x1c2   :  { %2525 = vmatmul.mubr.f32.gmra.mrb[210].mxu0 %v5628_v41  ;;  %2686 = vmatmul.mubr.f32.gmra.mrb[210].mxu1 %v5628_v41 }
 0x1c3   :  { %4378 = vmatpush1.bf16.msra.mxu0 %v4377_v4  ;;  %4410 = vmatpush1.bf16.msra.mxu1 %v4409_v7  ;;  %v1204_v15 = vpop.f32.mrb[118].mxu0  ;;  %v1365_v25 = vpop.f32.mrb[118].mxu1 }
 0x1c4   :  { %v1582_v19 = vmax.f32 %v1204_v15, 0.0  ;;  %v1584_v61 = vmax.f32 %v1365_v25, 0.0  ;;  %v1206_v50 = vpop.f32.mrb[119].mxu0  ;;  %v1367_v28 = vpop.f32.mrb[119].mxu1  ;;  %2530 = vmatprep.mubr.f32.mxu0 %v4733_v3  ;;  %2691 = vmatprep.mubr.f32.mxu1 %v4733_v3 }
 0x1c5   :  { %v1583_v31 = vmax.f32 %v1206_v50, 0.0  ;;  %v1585_v32 = vmax.f32 %v1367_v28, 0.0 }
 0x1c6   :  { %v4381_v5 = vpack.c.bf16 %v1582_v19, %v1566_v17  ;;  %v4413_v56 = vpack.c.bf16 %v1584_v61, %v1568_v18  ;;  %2531 = vmatmul.mubr.f32.gmra.mrb[212].mxu0 %v5637_v34  ;;  %2692 = vmatmul.mubr.f32.gmra.mrb[212].mxu1 %v5637_v34  ;;  %v5673_v61 = vld [vmem:[%s6105_s2 + $0x70] sm:$0xff] }
 0x1c7   :  { %v4379_v36 = vpack.c.bf16 %v1583_v31, %v1567_v47  ;;  %v4411_v37 = vpack.c.bf16 %v1585_v32, %v1569_v29  ;;  %v1210_v39 = vpop.f32.mrb[120].mxu0  ;;  %v1371_v21 = vpop.f32.mrb[120].mxu1  ;;  %2536 = vmatprep.mubr.f32.mxu0 %v4733_v3  ;;  %2697 = vmatprep.mubr.f32.mxu1 %v4733_v3  ;;  %v5682_v47 = vld [vmem:[%s6105_s2 + $0x78] sm:$0xff] }
 0x1c8   :  { %v1212_v40 = vpop.f32.mrb[121].mxu0  ;;  %v1373_v42 = vpop.f32.mrb[121].mxu1  ;;  %v1598_v46 = vmax.f32 %v1210_v39, 0.0  ;;  %v1600_v9 = vmax.f32 %v1371_v21, 0.0 }
 0x1c9   :  { %4380 = vmatprep.subr.bf16.mxu0 %v4379_v36  ;;  %4412 = vmatprep.subr.bf16.mxu1 %v4411_v37  ;;  %v1599_v53 = vmax.f32 %v1212_v40, 0.0  ;;  %v1601_v16 = vmax.f32 %v1373_v42, 0.0 }
 0x1ca   :  { %2537 = vmatmul.mubr.f32.gmra.mrb[214].mxu0 %v5646_v63  ;;  %2698 = vmatmul.mubr.f32.gmra.mrb[214].mxu1 %v5646_v63 }
 0x1cb   :  { %4382 = vmatpush1.bf16.msra.mxu0 %v4381_v5  ;;  %4414 = vmatpush1.bf16.msra.mxu1 %v4413_v56  ;;  %v1216_v43 = vpop.f32.mrb[122].mxu0  ;;  %v1377_v30 = vpop.f32.mrb[122].mxu1 }
 0x1cc   :  { %v1614_v22 = vmax.f32 %v1216_v43, 0.0  ;;  %v1616_v49 = vmax.f32 %v1377_v30, 0.0  ;;  %v1218_v51 = vpop.f32.mrb[123].mxu0  ;;  %v1379_v52 = vpop.f32.mrb[123].mxu1  ;;  %2542 = vmatprep.mubr.f32.mxu0 %v4733_v3  ;;  %2703 = vmatprep.mubr.f32.mxu1 %v4733_v3 }
 0x1cd   :  { %v1615_v54 = vmax.f32 %v1218_v51, 0.0  ;;  %v1617_v23 = vmax.f32 %v1379_v52, 0.0 }
 0x1ce   :  { %v4385_v57 = vpack.c.bf16 %v1614_v22, %v1598_v46  ;;  %v4417_v58 = vpack.c.bf16 %v1616_v49, %v1600_v9  ;;  %2543 = vmatmul.mubr.f32.gmra.mrb[216].mxu0 %v5655_v59  ;;  %2704 = vmatmul.mubr.f32.gmra.mrb[216].mxu1 %v5655_v59 }
 0x1cf   :  { %v4383_v60 = vpack.c.bf16 %v1615_v54, %v1599_v53  ;;  %v4415_v62 = vpack.c.bf16 %v1617_v23, %v1601_v16  ;;  %v1222_v24 = vpop.f32.mrb[124].mxu0  ;;  %v1383_v20 = vpop.f32.mrb[124].mxu1  ;;  %2548 = vmatprep.mubr.f32.mxu0 %v4733_v3  ;;  %2709 = vmatprep.mubr.f32.mxu1 %v4733_v3 }
 0x1d0   :  { %v1224_v26 = vpop.f32.mrb[125].mxu0  ;;  %v1385_v0 = vpop.f32.mrb[125].mxu1  ;;  %v1630_v7 = vmax.f32 %v1222_v24, 0.0  ;;  %v1632_v45 = vmax.f32 %v1383_v20, 0.0 }
 0x1d1   :  { %4384 = vmatprep.subr.bf16.mxu0 %v4383_v60  ;;  %4416 = vmatprep.subr.bf16.mxu1 %v4415_v62  ;;  %v1631_v14 = vmax.f32 %v1224_v26, 0.0  ;;  %v1633_v15 = vmax.f32 %v1385_v0, 0.0 }
 0x1d2   :  { %2549 = vmatmul.mubr.f32.gmra.mrb[218].mxu0 %v5664_v1  ;;  %2710 = vmatmul.mubr.f32.gmra.mrb[218].mxu1 %v5664_v1 }
 0x1d3   :  { %4386 = vmatpush1.bf16.msra.mxu0 %v4385_v57  ;;  %4418 = vmatpush1.bf16.msra.mxu1 %v4417_v58  ;;  %v1228_v2 = vpop.f32.mrb[126].mxu0  ;;  %v1389_v4 = vpop.f32.mrb[126].mxu1 }
 0x1d4   :  { %v1646_v10 = vmax.f32 %v1228_v2, 0.0  ;;  %v1648_v11 = vmax.f32 %v1389_v4, 0.0  ;;  %v1230_v12 = vpop.f32.mrb[127].mxu0  ;;  %v1391_v13 = vpop.f32.mrb[127].mxu1  ;;  %2554 = vmatprep.mubr.f32.mxu0 %v4733_v3  ;;  %2715 = vmatprep.mubr.f32.mxu1 %v4733_v3 }
 0x1d5   :  { %v1647_v25 = vmax.f32 %v1230_v12, 0.0  ;;  %v1649_v17 = vmax.f32 %v1391_v13, 0.0 }
 0x1d6   :  { %v4389_v18 = vpack.c.bf16 %v1646_v10, %v1630_v7  ;;  %v4421_v19 = vpack.c.bf16 %v1648_v11, %v1632_v45  ;;  %2555 = vmatmul.mubr.f32.gmra.mrb[220].mxu0 %v5673_v61  ;;  %2716 = vmatmul.mubr.f32.gmra.mrb[220].mxu1 %v5673_v61 }
 0x1d7   :  { %v4387_v50 = vpack.c.bf16 %v1647_v25, %v1631_v14  ;;  %v4419_v28 = vpack.c.bf16 %v1649_v17, %v1633_v15  ;;  %2560 = vmatprep.mubr.f32.mxu0 %v4733_v3  ;;  %2721 = vmatprep.mubr.f32.mxu1 %v4733_v3 }
 0x1d9   :  { %4388 = vmatprep.subr.bf16.mxu0 %v4387_v50  ;;  %4420 = vmatprep.subr.bf16.mxu1 %v4419_v28 }
 0x1da   :  { %2561 = vmatmul.mubr.f32.gmra.mrb[222].mxu0 %v5682_v47  ;;  %2722 = vmatmul.mubr.f32.gmra.mrb[222].mxu1 %v5682_v47 }
 0x1db   :  { %4390 = vmatpush1.bf16.msra.mxu0 %v4389_v18  ;;  %4422 = vmatpush1.bf16.msra.mxu1 %v4421_v19 }
 0x1dc   :  { %2792 = vmatprep.mubr.f32.mxu0 %v4733_v3  ;;  %2953 = vmatprep.mubr.f32.mxu1 %v4733_v3 }
 0x1de   :  { %2793 = vmatmul.mubr.f32.vlgmr.msra.gmra.mrb[224].mxu0 %v5547_v44  ;;  %2954 = vmatmul.mubr.f32.vlgmr.msra.gmra.mrb[224].mxu1 %v5547_v44  ;;  %v5704_v44 = vpop.permute.xlu0 %1684 }
 0x1df   :  { %2798 = vmatprep.mubr.f32.mxu0 %v4733_v3  ;;  %2959 = vmatprep.mubr.f32.mxu1 %v4733_v3 }
 0x1e2   :  { %2799 = vmatmul.mubr.f32.gmra.mrb[226].mxu0 %v5556_v6  ;;  %2960 = vmatmul.mubr.f32.gmra.mrb[226].mxu1 %v5556_v6 }
 0x1e3   :  { %2804 = vmatprep.mubr.f32.mxu0 %v4733_v3  ;;  %2965 = vmatprep.mubr.f32.mxu1 %v4733_v3 }
 0x1e6   :  { %2805 = vmatmul.mubr.f32.gmra.mrb[228].mxu0 %v5565_v38  ;;  %2966 = vmatmul.mubr.f32.gmra.mrb[228].mxu1 %v5565_v38 }
 0x1e7   :  { %2810 = vmatprep.mubr.f32.mxu0 %v4733_v3  ;;  %2971 = vmatprep.mubr.f32.mxu1 %v4733_v3 }
 0x1ea   :  { %2811 = vmatmul.mubr.f32.gmra.mrb[230].mxu0 %v5574_v35  ;;  %2972 = vmatmul.mubr.f32.gmra.mrb[230].mxu1 %v5574_v35  ;;  %v5712_v35 = vpop.permute.xlu0 %1689 }
 0x1eb   :  { %2816 = vmatprep.mubr.f32.mxu0 %v4733_v3  ;;  %2977 = vmatprep.mubr.f32.mxu1 %v4733_v3 }
 0x1ee   :  { %2817 = vmatmul.mubr.f32.gmra.mrb[232].mxu0 %v5583_v27  ;;  %2978 = vmatmul.mubr.f32.gmra.mrb[232].mxu1 %v5583_v27  ;;  %v5718_v27 = vpop.permute.xlu1 %1694  ;;  %v5748_v17 = vpop.permute.xlu0 %1704 }
 0x1ef   :  { %2822 = vmatprep.mubr.f32.mxu0 %v4733_v3  ;;  %2983 = vmatprep.mubr.f32.mxu1 %v4733_v3 }
 0x1f0   :  { %v1828_v6 = vpop.f32.mrb[128].mxu0  ;;  %v1989_v38 = vpop.f32.mrb[128].mxu1 }
 0x1f1   :  { %v1830_v29 = vpop.f32.mrb[129].mxu0  ;;  %v1991_v31 = vpop.f32.mrb[129].mxu1  ;;  %v1829_v32 = vadd.f32 %v1828_v6, %v5704_v44  ;;  %v1990_v5 = vadd.f32 %v1989_v38, %v5704_v44 }
 0x1f2   :  { %2823 = vmatmul.mubr.f32.gmra.mrb[234].mxu0 %v5592_v33  ;;  %2984 = vmatmul.mubr.f32.gmra.mrb[234].mxu1 %v5592_v33  ;;  %v1831_v56 = vadd.f32 %v1830_v29, %v5704_v44  ;;  %v1992_v36 = vadd.f32 %v1991_v31, %v5704_v44  ;;  %v5732_v20 = vpop.permute.xlu1 %1699 }
 0x1f3   :  { %2828 = vmatprep.mubr.f32.mxu0 %v4733_v3  ;;  %2989 = vmatprep.mubr.f32.mxu1 %v4733_v3  ;;  %v3050_v46 = vmax.f32 %v1829_v32, 0.0  ;;  %v3052_v9 = vmax.f32 %v1990_v5, 0.0 }
 0x1f4   :  { %v1834_v37 = vpop.f32.mrb[130].mxu0  ;;  %v1995_v39 = vpop.f32.mrb[130].mxu1  ;;  %v3051_v51 = vmax.f32 %v1831_v56, 0.0  ;;  %v3053_v52 = vmax.f32 %v1992_v36, 0.0 }
 0x1f5   :  { %v1836_v21 = vpop.f32.mrb[131].mxu0  ;;  %v1997_v33 = vpop.f32.mrb[131].mxu1  ;;  %v1835_v40 = vadd.f32 %v1834_v37, %v5712_v35  ;;  %v1996_v42 = vadd.f32 %v1995_v39, %v5712_v35 }
 0x1f6   :  { %v1837_v43 = vadd.f32 %v1836_v21, %v5712_v35  ;;  %v1998_v30 = vadd.f32 %v1997_v33, %v5712_v35  ;;  %2829 = vmatmul.mubr.f32.gmra.mrb[236].mxu0 %v5601_v48  ;;  %2990 = vmatmul.mubr.f32.gmra.mrb[236].mxu1 %v5601_v48  ;;  %v5752_v39 = vpop.permute.xlu1 %1709 }
 0x1f7   :  { %2834 = vmatprep.mubr.f32.mxu0 %v4733_v3  ;;  %2995 = vmatprep.mubr.f32.mxu1 %v4733_v3  ;;  %v3066_v22 = vmax.f32 %v1835_v40, 0.0  ;;  %v3068_v49 = vmax.f32 %v1996_v42, 0.0 }
 0x1f8   :  { %v3067_v53 = vmax.f32 %v1837_v43, 0.0  ;;  %v3069_v16 = vmax.f32 %v1998_v30, 0.0  ;;  %v1840_v54 = vpop.f32.mrb[132].mxu0  ;;  %v2001_v23 = vpop.f32.mrb[132].mxu1 }
 0x1f9   :  { %v1842_v57 = vpop.f32.mrb[133].mxu0  ;;  %v2003_v58 = vpop.f32.mrb[133].mxu1  ;;  %v4425_v60 = vpack.c.bf16 %v3066_v22, %v3050_v46  ;;  %v4457_v62 = vpack.c.bf16 %v3068_v49, %v3052_v9  ;;  %v1841_v26 = vadd.f32 %v1840_v54, %v5718_v27  ;;  %v2002_v0 = vadd.f32 %v2001_v23, %v5718_v27 }
 0x1fa   :  { %v4423_v24 = vpack.c.bf16 %v3067_v53, %v3051_v51  ;;  %v4455_v48 = vpack.c.bf16 %v3069_v16, %v3053_v52  ;;  %2835 = vmatmul.mubr.f32.gmra.mrb[238].mxu0 %v5610_v55  ;;  %2996 = vmatmul.mubr.f32.gmra.mrb[238].mxu1 %v5610_v55  ;;  %v1843_v2 = vadd.f32 %v1842_v57, %v5718_v27  ;;  %v5768_v52 = vpop.permute.xlu0 %1714 }
 0x1fb   :  { %2840 = vmatprep.mubr.f32.mxu0 %v4733_v3  ;;  %3001 = vmatprep.mubr.f32.mxu1 %v4733_v3  ;;  %v2004_v4 = vadd.f32 %v2003_v58, %v5718_v27  ;;  %v3082_v15 = vmax.f32 %v1841_v26, 0.0  ;;  %v3084_v25 = vmax.f32 %v2002_v0, 0.0 }
 0x1fc   :  { %v1846_v7 = vpop.f32.mrb[134].mxu0  ;;  %v2007_v45 = vpop.f32.mrb[134].mxu1  ;;  %4424 = vmatprep.subr.bf16.mxu0 %v4423_v24  ;;  %4456 = vmatprep.subr.bf16.mxu1 %v4455_v48  ;;  %v3083_v50 = vmax.f32 %v1843_v2, 0.0 }
 0x1fd   :  { %v1848_v10 = vpop.f32.mrb[135].mxu0  ;;  %v2009_v55 = vpop.f32.mrb[135].mxu1  ;;  %4426 = vmatpush1.bf16.msra.mxu0 %v4425_v60  ;;  %4458 = vmatpush1.bf16.msra.mxu1 %v4457_v62  ;;  %v1847_v11 = vadd.f32 %v1846_v7, %v5732_v20  ;;  %v2008_v12 = vadd.f32 %v2007_v45, %v5732_v20  ;;  %v3085_v28 = vmax.f32 %v2004_v4, 0.0 }
 0x1fe   :  { %v1849_v13 = vadd.f32 %v1848_v10, %v5732_v20  ;;  %v2010_v14 = vadd.f32 %v2009_v55, %v5732_v20  ;;  %2841 = vmatmul.mubr.f32.gmra.mrb[240].mxu0 %v5619_v8  ;;  %3002 = vmatmul.mubr.f32.gmra.mrb[240].mxu1 %v5619_v8  ;;  %v5772_v45 = vpop.permute.xlu1 %1719 }
 0x1ff   :  { %2846 = vmatprep.mubr.f32.mxu0 %v4733_v3  ;;  %3007 = vmatprep.mubr.f32.mxu1 %v4733_v3  ;;  %v3098_v18 = vmax.f32 %v1847_v11, 0.0  ;;  %v3100_v19 = vmax.f32 %v2008_v12, 0.0 }
 0x200   :  { %v3099_v6 = vmax.f32 %v1849_v13, 0.0  ;;  %v3101_v38 = vmax.f32 %v2010_v14, 0.0  ;;  %v1852_v29 = vpop.f32.mrb[136].mxu0  ;;  %v2013_v31 = vpop.f32.mrb[136].mxu1 }
 0x201   :  { %v1854_v32 = vpop.f32.mrb[137].mxu0  ;;  %v2015_v5 = vpop.f32.mrb[137].mxu1  ;;  %v4429_v56 = vpack.c.bf16 %v3098_v18, %v3082_v15  ;;  %v4461_v8 = vpack.c.bf16 %v3100_v19, %v3084_v25  ;;  %v1853_v21 = vadd.f32 %v1852_v29, %v5748_v17  ;;  %v2014_v33 = vadd.f32 %v2013_v31, %v5748_v17 }
 0x202   :  { %v4427_v36 = vpack.c.bf16 %v3099_v6, %v3083_v50  ;;  %v4459_v37 = vpack.c.bf16 %v3101_v38, %v3085_v28  ;;  %2847 = vmatmul.mubr.f32.gmra.mrb[242].mxu0 %v5628_v41  ;;  %3008 = vmatmul.mubr.f32.gmra.mrb[242].mxu1 %v5628_v41  ;;  %v1855_v43 = vadd.f32 %v1854_v32, %v5748_v17  ;;  %v5788_v28 = vpop.permute.xlu0 %1724 }
 0x203   :  { %2852 = vmatprep.mubr.f32.mxu0 %v4733_v3  ;;  %3013 = vmatprep.mubr.f32.mxu1 %v4733_v3  ;;  %v2016_v30 = vadd.f32 %v2015_v5, %v5748_v17  ;;  %v3114_v53 = vmax.f32 %v1853_v21, 0.0  ;;  %v3116_v54 = vmax.f32 %v2014_v33, 0.0 }
 0x204   :  { %v1858_v40 = vpop.f32.mrb[138].mxu0  ;;  %v2019_v42 = vpop.f32.mrb[138].mxu1  ;;  %4428 = vmatprep.subr.bf16.mxu0 %v4427_v36  ;;  %4460 = vmatprep.subr.bf16.mxu1 %v4459_v37  ;;  %v3115_v57 = vmax.f32 %v1855_v43, 0.0 }
 0x205   :  { %v1860_v46 = vpop.f32.mrb[139].mxu0  ;;  %v2021_v41 = vpop.f32.mrb[139].mxu1  ;;  %4430 = vmatpush1.bf16.msra.mxu0 %v4429_v56  ;;  %4462 = vmatpush1.bf16.msra.mxu1 %v4461_v8  ;;  %v1859_v9 = vadd.f32 %v1858_v40, %v5752_v39  ;;  %v2020_v22 = vadd.f32 %v2019_v42, %v5752_v39  ;;  %v3117_v60 = vmax.f32 %v2016_v30, 0.0 }
 0x206   :  { %v1861_v49 = vadd.f32 %v1860_v46, %v5752_v39  ;;  %v2022_v51 = vadd.f32 %v2021_v41, %v5752_v39  ;;  %2853 = vmatmul.mubr.f32.gmra.mrb[244].mxu0 %v5637_v34  ;;  %3014 = vmatmul.mubr.f32.gmra.mrb[244].mxu1 %v5637_v34  ;;  %v5792_v30 = vpop.permute.xlu1 %1729 }
 0x207   :  { %2858 = vmatprep.mubr.f32.mxu0 %v4733_v3  ;;  %3019 = vmatprep.mubr.f32.mxu1 %v4733_v3  ;;  %v3130_v16 = vmax.f32 %v1859_v9, 0.0  ;;  %v3132_v23 = vmax.f32 %v2020_v22, 0.0 }
 0x208   :  { %v3131_v58 = vmax.f32 %v1861_v49, 0.0  ;;  %v3133_v62 = vmax.f32 %v2022_v51, 0.0  ;;  %v1864_v24 = vpop.f32.mrb[140].mxu0  ;;  %v2025_v48 = vpop.f32.mrb[140].mxu1 }
 0x209   :  { %v1866_v26 = vpop.f32.mrb[141].mxu0  ;;  %v2027_v0 = vpop.f32.mrb[141].mxu1  ;;  %v4433_v2 = vpack.c.bf16 %v3130_v16, %v3114_v53  ;;  %v4465_v34 = vpack.c.bf16 %v3132_v23, %v3116_v54  ;;  %v1865_v10 = vadd.f32 %v1864_v24, %v5768_v52  ;;  %v2026_v55 = vadd.f32 %v2025_v48, %v5768_v52 }
 0x20a   :  { %v4431_v4 = vpack.c.bf16 %v3131_v58, %v3115_v57  ;;  %v4463_v7 = vpack.c.bf16 %v3133_v62, %v3117_v60  ;;  %2859 = vmatmul.mubr.f32.gmra.mrb[246].mxu0 %v5646_v63  ;;  %3020 = vmatmul.mubr.f32.gmra.mrb[246].mxu1 %v5646_v63  ;;  %v1867_v13 = vadd.f32 %v1866_v26, %v5768_v52  ;;  %v5808_v58 = vpop.permute.xlu0 %1734 }
 0x20b   :  { %2864 = vmatprep.mubr.f32.mxu0 %v4733_v3  ;;  %3025 = vmatprep.mubr.f32.mxu1 %v4733_v3  ;;  %v2028_v14 = vadd.f32 %v2027_v0, %v5768_v52  ;;  %v3146_v6 = vmax.f32 %v1865_v10, 0.0  ;;  %v3148_v29 = vmax.f32 %v2026_v55, 0.0 }
 0x20c   :  { %v1870_v11 = vpop.f32.mrb[142].mxu0  ;;  %v2031_v12 = vpop.f32.mrb[142].mxu1  ;;  %4432 = vmatprep.subr.bf16.mxu0 %v4431_v4  ;;  %4464 = vmatprep.subr.bf16.mxu1 %v4463_v7  ;;  %v3147_v32 = vmax.f32 %v1867_v13, 0.0 }
 0x20d   :  { %v1872_v15 = vpop.f32.mrb[143].mxu0  ;;  %v2033_v63 = vpop.f32.mrb[143].mxu1  ;;  %4434 = vmatpush1.bf16.msra.mxu0 %v4433_v2  ;;  %4466 = vmatpush1.bf16.msra.mxu1 %v4465_v34  ;;  %v1871_v25 = vadd.f32 %v1870_v11, %v5772_v45  ;;  %v2032_v18 = vadd.f32 %v2031_v12, %v5772_v45  ;;  %v3149_v56 = vmax.f32 %v2028_v14, 0.0 }
 0x20e   :  { %v1873_v19 = vadd.f32 %v1872_v15, %v5772_v45  ;;  %v2034_v50 = vadd.f32 %v2033_v63, %v5772_v45  ;;  %2865 = vmatmul.mubr.f32.gmra.mrb[248].mxu0 %v5655_v59  ;;  %3026 = vmatmul.mubr.f32.gmra.mrb[248].mxu1 %v5655_v59  ;;  %v5812_v14 = vpop.permute.xlu1 %1739 }
 0x20f   :  { %2870 = vmatprep.mubr.f32.mxu0 %v4733_v3  ;;  %3031 = vmatprep.mubr.f32.mxu1 %v4733_v3  ;;  %v3162_v38 = vmax.f32 %v1871_v25, 0.0  ;;  %v3164_v31 = vmax.f32 %v2032_v18, 0.0 }
 0x210   :  { %v3163_v5 = vmax.f32 %v1873_v19, 0.0  ;;  %v3165_v8 = vmax.f32 %v2034_v50, 0.0  ;;  %v1876_v36 = vpop.f32.mrb[144].mxu0  ;;  %v2037_v37 = vpop.f32.mrb[144].mxu1 }
 0x211   :  { %v1878_v21 = vpop.f32.mrb[145].mxu0  ;;  %v2039_v33 = vpop.f32.mrb[145].mxu1  ;;  %v4437_v40 = vpack.c.bf16 %v3162_v38, %v3146_v6  ;;  %v4469_v59 = vpack.c.bf16 %v3164_v31, %v3148_v29  ;;  %v1877_v46 = vadd.f32 %v1876_v36, %v5788_v28  ;;  %v2038_v41 = vadd.f32 %v2037_v37, %v5788_v28 }
 0x212   :  { %v4435_v42 = vpack.c.bf16 %v3163_v5, %v3147_v32  ;;  %v4467_v43 = vpack.c.bf16 %v3165_v8, %v3149_v56  ;;  %2871 = vmatmul.mubr.f32.gmra.mrb[250].mxu0 %v5664_v1  ;;  %3032 = vmatmul.mubr.f32.gmra.mrb[250].mxu1 %v5664_v1  ;;  %v1879_v49 = vadd.f32 %v1878_v21, %v5788_v28  ;;  %v5824_v5 = vpop.permute.xlu0 %1744 }
 0x213   :  { %2876 = vmatprep.mubr.f32.mxu0 %v4733_v3  ;;  %3037 = vmatprep.mubr.f32.mxu1 %v4733_v3  ;;  %v2040_v51 = vadd.f32 %v2039_v33, %v5788_v28  ;;  %v3178_v60 = vmax.f32 %v1877_v46, 0.0  ;;  %v3180_v24 = vmax.f32 %v2038_v41, 0.0 }
 0x214   :  { %v1882_v9 = vpop.f32.mrb[146].mxu0  ;;  %v2043_v22 = vpop.f32.mrb[146].mxu1  ;;  %4436 = vmatprep.subr.bf16.mxu0 %v4435_v42  ;;  %4468 = vmatprep.subr.bf16.mxu1 %v4467_v43  ;;  %v3179_v26 = vmax.f32 %v1879_v49, 0.0 }
 0x215   :  { %v1884_v53 = vpop.f32.mrb[147].mxu0  ;;  %v2045_v1 = vpop.f32.mrb[147].mxu1  ;;  %4438 = vmatpush1.bf16.msra.mxu0 %v4437_v40  ;;  %4470 = vmatpush1.bf16.msra.mxu1 %v4469_v59  ;;  %v1883_v16 = vadd.f32 %v1882_v9, %v5792_v30  ;;  %v2044_v54 = vadd.f32 %v2043_v22, %v5792_v30  ;;  %v3181_v2 = vmax.f32 %v2040_v51, 0.0 }
 0x216   :  { %v1885_v23 = vadd.f32 %v1884_v53, %v5792_v30  ;;  %v2046_v57 = vadd.f32 %v2045_v1, %v5792_v30  ;;  %2877 = vmatmul.mubr.f32.gmra.mrb[252].mxu0 %v5673_v61  ;;  %3038 = vmatmul.mubr.f32.gmra.mrb[252].mxu1 %v5673_v61  ;;  %v5826_v53 = vpop.permute.xlu1 %1749 }
 0x217   :  { %2882 = vmatprep.mubr.f32.mxu0 %v4733_v3  ;;  %3043 = vmatprep.mubr.f32.mxu1 %v4733_v3  ;;  %v3194_v62 = vmax.f32 %v1883_v16, 0.0  ;;  %v3196_v48 = vmax.f32 %v2044_v54, 0.0 }
 0x218   :  { %v3195_v0 = vmax.f32 %v1885_v23, 0.0  ;;  %v3197_v34 = vmax.f32 %v2046_v57, 0.0  ;;  %v1888_v4 = vpop.f32.mrb[148].mxu0  ;;  %v2049_v7 = vpop.f32.mrb[148].mxu1 }
 0x219   :  { %v1890_v10 = vpop.f32.mrb[149].mxu0  ;;  %v2051_v55 = vpop.f32.mrb[149].mxu1  ;;  %v4441_v11 = vpack.c.bf16 %v3194_v62, %v3178_v60  ;;  %v4473_v61 = vpack.c.bf16 %v3196_v48, %v3180_v24  ;;  %v1889_v15 = vadd.f32 %v1888_v4, %v5808_v58  ;;  %v2050_v63 = vadd.f32 %v2049_v7, %v5808_v58 }
 0x21a   :  { %v4439_v12 = vpack.c.bf16 %v3195_v0, %v3179_v26  ;;  %v4471_v13 = vpack.c.bf16 %v3197_v34, %v3181_v2  ;;  %2883 = vmatmul.mubr.f32.gmra.mrb[254].mxu0 %v5682_v47  ;;  %3044 = vmatmul.mubr.f32.gmra.mrb[254].mxu1 %v5682_v47  ;;  %v1891_v19 = vadd.f32 %v1890_v10, %v5808_v58  ;;  %v5836_v34 = vpop.permute.xlu0 %1754 }
 0x21b   :  { %3371 = vmatprep.mubr.f32.mxu0 %v4733_v3  ;;  %3442 = vmatprep.mubr.f32.mxu1 %v4733_v3  ;;  %v2052_v50 = vadd.f32 %v2051_v55, %v5808_v58  ;;  %v3210_v56 = vmax.f32 %v1889_v15, 0.0  ;;  %v3212_v36 = vmax.f32 %v2050_v63, 0.0 }
 0x21c   :  { %v1894_v25 = vpop.f32.mrb[150].mxu0  ;;  %v2055_v18 = vpop.f32.mrb[150].mxu1  ;;  %4440 = vmatprep.subr.bf16.mxu0 %v4439_v12  ;;  %4472 = vmatprep.subr.bf16.mxu1 %v4471_v13  ;;  %v3211_v21 = vmax.f32 %v1891_v19, 0.0 }
 0x21d   :  { %v1896_v6 = vpop.f32.mrb[151].mxu0  ;;  %v2057_v47 = vpop.f32.mrb[151].mxu1  ;;  %4442 = vmatpush1.bf16.msra.mxu0 %v4441_v11  ;;  %4474 = vmatpush1.bf16.msra.mxu1 %v4473_v61  ;;  %v1895_v38 = vadd.f32 %v1894_v25, %v5812_v14  ;;  %v2056_v29 = vadd.f32 %v2055_v18, %v5812_v14  ;;  %v3213_v40 = vmax.f32 %v2052_v50, 0.0 }
 0x21e   :  { %v1897_v31 = vadd.f32 %v1896_v6, %v5812_v14  ;;  %v2058_v32 = vadd.f32 %v2057_v47, %v5812_v14 }
 0x21f   :  { %v3226_v8 = vmax.f32 %v1895_v38, 0.0  ;;  %v3228_v37 = vmax.f32 %v2056_v29, 0.0  ;;  %v5838_v38 = vpop.permute.xlu1 %1759 }
 0x220   :  { %v3227_v33 = vmax.f32 %v1897_v31, 0.0  ;;  %v3229_v59 = vmax.f32 %v2058_v32, 0.0  ;;  %v1900_v42 = vpop.f32.mrb[152].mxu0  ;;  %v2061_v43 = vpop.f32.mrb[152].mxu1 }
 0x221   :  { %v1902_v46 = vpop.f32.mrb[153].mxu0  ;;  %v2063_v41 = vpop.f32.mrb[153].mxu1  ;;  %v4445_v9 = vpack.c.bf16 %v3226_v8, %v3210_v56  ;;  %v4477_v22 = vpack.c.bf16 %v3228_v37, %v3212_v36  ;;  %v1901_v1 = vadd.f32 %v1900_v42, %v5824_v5  ;;  %v2062_v16 = vadd.f32 %v2061_v43, %v5824_v5 }
 0x222   :  { %v4443_v49 = vpack.c.bf16 %v3227_v33, %v3211_v21  ;;  %v4475_v51 = vpack.c.bf16 %v3229_v59, %v3213_v40  ;;  %v1903_v57 = vadd.f32 %v1902_v46, %v5824_v5  ;;  %v2064_v60 = vadd.f32 %v2063_v41, %v5824_v5 }
 0x223   :  { %v3242_v4 = vmax.f32 %v1901_v1, 0.0  ;;  %v3244_v10 = vmax.f32 %v2062_v16, 0.0 }
 0x224   :  { %v1906_v54 = vpop.f32.mrb[154].mxu0  ;;  %v2067_v23 = vpop.f32.mrb[154].mxu1  ;;  %4444 = vmatprep.subr.bf16.mxu0 %v4443_v49  ;;  %4476 = vmatprep.subr.bf16.mxu1 %v4475_v51  ;;  %v3243_v11 = vmax.f32 %v1903_v57, 0.0  ;;  %v3245_v12 = vmax.f32 %v2064_v60, 0.0 }
 0x225   :  { %v1908_v62 = vpop.f32.mrb[155].mxu0  ;;  %v2069_v24 = vpop.f32.mrb[155].mxu1  ;;  %4446 = vmatpush1.bf16.msra.mxu0 %v4445_v9  ;;  %4478 = vmatpush1.bf16.msra.mxu1 %v4477_v22  ;;  %v1907_v48 = vadd.f32 %v1906_v54, %v5826_v53  ;;  %v2068_v26 = vadd.f32 %v2067_v23, %v5826_v53 }
 0x226   :  { %v1909_v0 = vadd.f32 %v1908_v62, %v5826_v53  ;;  %v2070_v2 = vadd.f32 %v2069_v24, %v5826_v53 }
 0x227   :  { %v3258_v7 = vmax.f32 %v1907_v48, 0.0  ;;  %v3260_v55 = vmax.f32 %v2068_v26, 0.0 }
 0x228   :  { %v3259_v61 = vmax.f32 %v1909_v0, 0.0  ;;  %v3261_v13 = vmax.f32 %v2070_v2, 0.0  ;;  %v1912_v15 = vpop.f32.mrb[156].mxu0  ;;  %v2073_v63 = vpop.f32.mrb[156].mxu1 }
 0x229   :  { %v1914_v25 = vpop.f32.mrb[157].mxu0  ;;  %v2075_v18 = vpop.f32.mrb[157].mxu1  ;;  %v4449_v19 = vpack.c.bf16 %v3258_v7, %v3242_v4  ;;  %v4481_v50 = vpack.c.bf16 %v3260_v55, %v3244_v10  ;;  %v1913_v29 = vadd.f32 %v1912_v15, %v5836_v34  ;;  %v2074_v31 = vadd.f32 %v2073_v63, %v5836_v34  ;;  %v5855_v55 = vld [vmem:[%s6107_s4] sm:$0xff] }
 0x22a   :  { %v4447_v6 = vpack.c.bf16 %v3259_v61, %v3243_v11  ;;  %v4479_v47 = vpack.c.bf16 %v3261_v13, %v3245_v12  ;;  %v1915_v8 = vadd.f32 %v1914_v25, %v5836_v34  ;;  %v2076_v36 = vadd.f32 %v2075_v18, %v5836_v34 }
 0x22b   :  { %v3274_v43 = vmax.f32 %v1913_v29, 0.0  ;;  %v3276_v41 = vmax.f32 %v2074_v31, 0.0 }
 0x22c   :  { %v1918_v32 = vpop.f32.mrb[158].mxu0  ;;  %v2079_v56 = vpop.f32.mrb[158].mxu1  ;;  %4448 = vmatprep.subr.bf16.mxu0 %v4447_v6  ;;  %4480 = vmatprep.subr.bf16.mxu1 %v4479_v47  ;;  %v3275_v22 = vmax.f32 %v1915_v8, 0.0  ;;  %v3277_v51 = vmax.f32 %v2076_v36, 0.0 }
 0x22d   :  { %v1920_v37 = vpop.f32.mrb[159].mxu0  ;;  %v2081_v21 = vpop.f32.mrb[159].mxu1  ;;  %4450 = vmatpush1.bf16.msra.mxu0 %v4449_v19  ;;  %4482 = vmatpush1.bf16.msra.mxu1 %v4481_v50  ;;  %v1919_v33 = vadd.f32 %v1918_v32, %v5838_v38  ;;  %v2080_v40 = vadd.f32 %v2079_v56, %v5838_v38 }
 0x22e   :  { %v1921_v59 = vadd.f32 %v1920_v37, %v5838_v38  ;;  %v2082_v42 = vadd.f32 %v2081_v21, %v5838_v38 }
 0x22f   :  { %v3290_v46 = vmax.f32 %v1919_v33, 0.0  ;;  %v3292_v9 = vmax.f32 %v2080_v40, 0.0 }
 0x230   :  { %v3291_v49 = vmax.f32 %v1921_v59, 0.0  ;;  %v3293_v1 = vmax.f32 %v2082_v42, 0.0 }
 0x231   :  { %v2150_v16 = vpop.f32.mrb[160].mxu0  ;;  %v2311_v54 = vpop.f32.mrb[160].mxu1  ;;  %v4453_v23 = vpack.c.bf16 %v3290_v46, %v3274_v43  ;;  %v4485_v57 = vpack.c.bf16 %v3292_v9, %v3276_v41 }
 0x232   :  { %v4451_v60 = vpack.c.bf16 %v3291_v49, %v3275_v22  ;;  %v4483_v62 = vpack.c.bf16 %v3293_v1, %v3277_v51  ;;  %v2152_v24 = vpop.f32.mrb[161].mxu0  ;;  %v2313_v48 = vpop.f32.mrb[161].mxu1  ;;  %v2151_v26 = vadd.f32 %v2150_v16, %v5704_v44  ;;  %v2312_v0 = vadd.f32 %v2311_v54, %v5704_v44 }
 0x233   :  { %v2153_v2 = vadd.f32 %v2152_v24, %v5704_v44  ;;  %v2314_v4 = vadd.f32 %v2313_v48, %v5704_v44 }
 0x234   :  { %4452 = vmatprep.subr.bf16.mxu0 %v4451_v60  ;;  %4484 = vmatprep.subr.bf16.mxu1 %v4483_v62  ;;  %v3054_v25 = vmax.f32 %v2151_v26, 0.0  ;;  %v3056_v18 = vmax.f32 %v2312_v0, 0.0 }
 0x235   :  { %v2156_v7 = vpop.f32.mrb[162].mxu0  ;;  %v2317_v10 = vpop.f32.mrb[162].mxu1  ;;  %4454 = vmatpush1.bf16.msra.mxu0 %v4453_v23  ;;  %4486 = vmatpush1.bf16.msra.mxu1 %v4485_v57  ;;  %v3055_v6 = vmax.f32 %v2153_v2, 0.0  ;;  %v3057_v47 = vmax.f32 %v2314_v4, 0.0 }
 0x236   :  { %v2157_v11 = vadd.f32 %v2156_v7, %v5712_v35  ;;  %v2318_v61 = vadd.f32 %v2317_v10, %v5712_v35  ;;  %v2158_v12 = vpop.f32.mrb[163].mxu0  ;;  %v2319_v13 = vpop.f32.mrb[163].mxu1 }
 0x237   :  { %v2159_v15 = vadd.f32 %v2158_v12, %v5712_v35  ;;  %v2320_v63 = vadd.f32 %v2319_v13, %v5712_v35 }
 0x238   :  { %v3070_v19 = vmax.f32 %v2157_v11, 0.0  ;;  %v3072_v50 = vmax.f32 %v2318_v61, 0.0  ;;  %3372 = vmatmul.mubr.f32.vlgmr.msra.gmra.mrb[0].mxu0 %v5855_v55  ;;  %3443 = vmatmul.mubr.f32.vlgmr.msra.gmra.mrb[0].mxu1 %v5855_v55 }
 0x239   :  { %v3071_v29 = vmax.f32 %v2159_v15, 0.0  ;;  %v3073_v31 = vmax.f32 %v2320_v63, 0.0  ;;  %v2162_v32 = vpop.f32.mrb[164].mxu0  ;;  %v2323_v56 = vpop.f32.mrb[164].mxu1  ;;  %3513 = vmatprep.mubr.f32.mxu0 %v4733_v3  ;;  %3584 = vmatprep.mubr.f32.mxu1 %v4733_v3 }
 0x23a   :  { %v4489_v8 = vpack.c.bf16 %v3070_v19, %v3054_v25  ;;  %v4521_v36 = vpack.c.bf16 %v3072_v50, %v3056_v18  ;;  %v2164_v37 = vpop.f32.mrb[165].mxu0  ;;  %v2325_v21 = vpop.f32.mrb[165].mxu1  ;;  %v2163_v59 = vadd.f32 %v2162_v32, %v5718_v27  ;;  %v2324_v42 = vadd.f32 %v2323_v56, %v5718_v27 }
 0x23b   :  { %v4487_v33 = vpack.c.bf16 %v3071_v29, %v3055_v6  ;;  %v4519_v40 = vpack.c.bf16 %v3073_v31, %v3057_v47  ;;  %v2165_v43 = vadd.f32 %v2164_v37, %v5718_v27  ;;  %v2326_v46 = vadd.f32 %v2325_v21, %v5718_v27 }
 0x23c   :  { %v3086_v23 = vmax.f32 %v2163_v59, 0.0  ;;  %v3088_v57 = vmax.f32 %v2324_v42, 0.0 }
 0x23d   :  { %v2168_v41 = vpop.f32.mrb[166].mxu0  ;;  %v2329_v9 = vpop.f32.mrb[166].mxu1  ;;  %4488 = vmatprep.subr.bf16.mxu0 %v4487_v33  ;;  %4520 = vmatprep.subr.bf16.mxu1 %v4519_v40  ;;  %v3087_v24 = vmax.f32 %v2165_v43, 0.0  ;;  %v3089_v48 = vmax.f32 %v2326_v46, 0.0 }
 0x23e   :  { %v2169_v22 = vadd.f32 %v2168_v41, %v5732_v20  ;;  %v2330_v49 = vadd.f32 %v2329_v9, %v5732_v20  ;;  %v2170_v51 = vpop.f32.mrb[167].mxu0  ;;  %v2331_v1 = vpop.f32.mrb[167].mxu1  ;;  %4490 = vmatpush1.bf16.msra.mxu0 %v4489_v8  ;;  %4522 = vmatpush1.bf16.msra.mxu1 %v4521_v36 }
 0x23f   :  { %v2171_v16 = vadd.f32 %v2170_v51, %v5732_v20  ;;  %v2332_v54 = vadd.f32 %v2331_v1, %v5732_v20 }
 0x240   :  { %v3102_v60 = vmax.f32 %v2169_v22, 0.0  ;;  %v3104_v62 = vmax.f32 %v2330_v49, 0.0 }
 0x241   :  { %v3103_v26 = vmax.f32 %v2171_v16, 0.0  ;;  %v3105_v0 = vmax.f32 %v2332_v54, 0.0  ;;  %v2174_v2 = vpop.f32.mrb[168].mxu0  ;;  %v2335_v4 = vpop.f32.mrb[168].mxu1 }
 0x242   :  { %v4493_v7 = vpack.c.bf16 %v3102_v60, %v3086_v23  ;;  %v4525_v10 = vpack.c.bf16 %v3104_v62, %v3088_v57  ;;  %v2176_v11 = vpop.f32.mrb[169].mxu0  ;;  %v2337_v61 = vpop.f32.mrb[169].mxu1  ;;  %v2175_v15 = vadd.f32 %v2174_v2, %v5748_v17  ;;  %v2336_v63 = vadd.f32 %v2335_v4, %v5748_v17 }
 0x243   :  { %v4491_v12 = vpack.c.bf16 %v3103_v26, %v3087_v24  ;;  %v4523_v13 = vpack.c.bf16 %v3105_v0, %v3089_v48  ;;  %v2177_v25 = vadd.f32 %v2176_v11, %v5748_v17  ;;  %v2338_v18 = vadd.f32 %v2337_v61, %v5748_v17 }
 0x244   :  { %v3118_v8 = vmax.f32 %v2175_v15, 0.0  ;;  %v3120_v36 = vmax.f32 %v2336_v63, 0.0 }
 0x245   :  { %v2180_v19 = vpop.f32.mrb[170].mxu0  ;;  %v2341_v50 = vpop.f32.mrb[170].mxu1  ;;  %4492 = vmatprep.subr.bf16.mxu0 %v4491_v12  ;;  %4524 = vmatprep.subr.bf16.mxu1 %v4523_v13  ;;  %v3119_v33 = vmax.f32 %v2177_v25, 0.0  ;;  %v3121_v40 = vmax.f32 %v2338_v18, 0.0 }
 0x246   :  { %v2181_v6 = vadd.f32 %v2180_v19, %v5752_v39  ;;  %v2342_v47 = vadd.f32 %v2341_v50, %v5752_v39  ;;  %v2182_v29 = vpop.f32.mrb[171].mxu0  ;;  %v2343_v31 = vpop.f32.mrb[171].mxu1  ;;  %4494 = vmatpush1.bf16.msra.mxu0 %v4493_v7  ;;  %4526 = vmatpush1.bf16.msra.mxu1 %v4525_v10 }
 0x247   :  { %v2183_v32 = vadd.f32 %v2182_v29, %v5752_v39  ;;  %v2344_v56 = vadd.f32 %v2343_v31, %v5752_v39 }
 0x248   :  { %v3134_v37 = vmax.f32 %v2181_v6, 0.0  ;;  %v3136_v21 = vmax.f32 %v2342_v47, 0.0 }
 0x249   :  { %v3135_v59 = vmax.f32 %v2183_v32, 0.0  ;;  %v3137_v42 = vmax.f32 %v2344_v56, 0.0  ;;  %v2186_v43 = vpop.f32.mrb[172].mxu0  ;;  %v2347_v46 = vpop.f32.mrb[172].mxu1 }
 0x24a   :  { %v4497_v41 = vpack.c.bf16 %v3134_v37, %v3118_v8  ;;  %v4529_v9 = vpack.c.bf16 %v3136_v21, %v3120_v36  ;;  %v2188_v22 = vpop.f32.mrb[173].mxu0  ;;  %v2349_v49 = vpop.f32.mrb[173].mxu1  ;;  %v2187_v16 = vadd.f32 %v2186_v43, %v5768_v52  ;;  %v2348_v54 = vadd.f32 %v2347_v46, %v5768_v52 }
 0x24b   :  { %v4495_v51 = vpack.c.bf16 %v3135_v59, %v3119_v33  ;;  %v4527_v1 = vpack.c.bf16 %v3137_v42, %v3121_v40  ;;  %v2189_v23 = vadd.f32 %v2188_v22, %v5768_v52  ;;  %v2350_v57 = vadd.f32 %v2349_v49, %v5768_v52 }
 0x24c   :  { %v3150_v7 = vmax.f32 %v2187_v16, 0.0  ;;  %v3152_v10 = vmax.f32 %v2348_v54, 0.0 }
 0x24d   :  { %v2192_v60 = vpop.f32.mrb[174].mxu0  ;;  %v2353_v62 = vpop.f32.mrb[174].mxu1  ;;  %4496 = vmatprep.subr.bf16.mxu0 %v4495_v51  ;;  %4528 = vmatprep.subr.bf16.mxu1 %v4527_v1  ;;  %v3151_v12 = vmax.f32 %v2189_v23, 0.0  ;;  %v3153_v13 = vmax.f32 %v2350_v57, 0.0 }
 0x24e   :  { %v2193_v24 = vadd.f32 %v2192_v60, %v5772_v45  ;;  %v2354_v48 = vadd.f32 %v2353_v62, %v5772_v45  ;;  %v2194_v26 = vpop.f32.mrb[175].mxu0  ;;  %v2355_v0 = vpop.f32.mrb[175].mxu1  ;;  %4498 = vmatpush1.bf16.msra.mxu0 %v4497_v41  ;;  %4530 = vmatpush1.bf16.msra.mxu1 %v4529_v9 }
 0x24f   :  { %v2195_v2 = vadd.f32 %v2194_v26, %v5772_v45  ;;  %v2356_v4 = vadd.f32 %v2355_v0, %v5772_v45 }
 0x250   :  { %v3166_v11 = vmax.f32 %v2193_v24, 0.0  ;;  %v3168_v61 = vmax.f32 %v2354_v48, 0.0 }
 0x251   :  { %v3167_v15 = vmax.f32 %v2195_v2, 0.0  ;;  %v3169_v63 = vmax.f32 %v2356_v4, 0.0  ;;  %v2198_v25 = vpop.f32.mrb[176].mxu0  ;;  %v2359_v18 = vpop.f32.mrb[176].mxu1 }
 0x252   :  { %v4501_v19 = vpack.c.bf16 %v3166_v11, %v3150_v7  ;;  %v4533_v50 = vpack.c.bf16 %v3168_v61, %v3152_v10  ;;  %v2200_v6 = vpop.f32.mrb[177].mxu0  ;;  %v2361_v47 = vpop.f32.mrb[177].mxu1  ;;  %v2199_v32 = vadd.f32 %v2198_v25, %v5788_v28  ;;  %v2360_v56 = vadd.f32 %v2359_v18, %v5788_v28 }
 0x253   :  { %v4499_v29 = vpack.c.bf16 %v3167_v15, %v3151_v12  ;;  %v4531_v31 = vpack.c.bf16 %v3169_v63, %v3153_v13  ;;  %v2201_v8 = vadd.f32 %v2200_v6, %v5788_v28  ;;  %v2362_v36 = vadd.f32 %v2361_v47, %v5788_v28 }
 0x254   :  { %v3182_v41 = vmax.f32 %v2199_v32, 0.0  ;;  %v3184_v9 = vmax.f32 %v2360_v56, 0.0 }
 0x255   :  { %v2204_v37 = vpop.f32.mrb[178].mxu0  ;;  %v2365_v21 = vpop.f32.mrb[178].mxu1  ;;  %4500 = vmatprep.subr.bf16.mxu0 %v4499_v29  ;;  %4532 = vmatprep.subr.bf16.mxu1 %v4531_v31  ;;  %v3183_v51 = vmax.f32 %v2201_v8, 0.0  ;;  %v3185_v1 = vmax.f32 %v2362_v36, 0.0 }
 0x256   :  { %v2205_v33 = vadd.f32 %v2204_v37, %v5792_v30  ;;  %v2366_v40 = vadd.f32 %v2365_v21, %v5792_v30  ;;  %v2206_v59 = vpop.f32.mrb[179].mxu0  ;;  %v2367_v42 = vpop.f32.mrb[179].mxu1  ;;  %4502 = vmatpush1.bf16.msra.mxu0 %v4501_v19  ;;  %4534 = vmatpush1.bf16.msra.mxu1 %v4533_v50 }
 0x257   :  { %v2207_v43 = vadd.f32 %v2206_v59, %v5792_v30  ;;  %v2368_v46 = vadd.f32 %v2367_v42, %v5792_v30 }
 0x258   :  { %v3198_v22 = vmax.f32 %v2205_v33, 0.0  ;;  %v3200_v49 = vmax.f32 %v2366_v40, 0.0 }
 0x259   :  { %v3199_v16 = vmax.f32 %v2207_v43, 0.0  ;;  %v3201_v54 = vmax.f32 %v2368_v46, 0.0  ;;  %v2210_v23 = vpop.f32.mrb[180].mxu0  ;;  %v2371_v57 = vpop.f32.mrb[180].mxu1 }
 0x25a   :  { %v4505_v60 = vpack.c.bf16 %v3198_v22, %v3182_v41  ;;  %v4537_v62 = vpack.c.bf16 %v3200_v49, %v3184_v9  ;;  %v2212_v24 = vpop.f32.mrb[181].mxu0  ;;  %v2373_v48 = vpop.f32.mrb[181].mxu1  ;;  %v2211_v2 = vadd.f32 %v2210_v23, %v5808_v58  ;;  %v2372_v4 = vadd.f32 %v2371_v57, %v5808_v58 }
 0x25b   :  { %v4503_v26 = vpack.c.bf16 %v3199_v16, %v3183_v51  ;;  %v4535_v0 = vpack.c.bf16 %v3201_v54, %v3185_v1  ;;  %v2213_v7 = vadd.f32 %v2212_v24, %v5808_v58  ;;  %v2374_v10 = vadd.f32 %v2373_v48, %v5808_v58 }
 0x25c   :  { %v3214_v19 = vmax.f32 %v2211_v2, 0.0  ;;  %v3216_v50 = vmax.f32 %v2372_v4, 0.0 }
 0x25d   :  { %v2216_v11 = vpop.f32.mrb[182].mxu0  ;;  %v2377_v61 = vpop.f32.mrb[182].mxu1  ;;  %4504 = vmatprep.subr.bf16.mxu0 %v4503_v26  ;;  %4536 = vmatprep.subr.bf16.mxu1 %v4535_v0  ;;  %v3215_v29 = vmax.f32 %v2213_v7, 0.0  ;;  %v3217_v31 = vmax.f32 %v2374_v10, 0.0 }
 0x25e   :  { %v2217_v12 = vadd.f32 %v2216_v11, %v5812_v14  ;;  %v2378_v13 = vadd.f32 %v2377_v61, %v5812_v14  ;;  %v2218_v15 = vpop.f32.mrb[183].mxu0  ;;  %v2379_v63 = vpop.f32.mrb[183].mxu1  ;;  %4506 = vmatpush1.bf16.msra.mxu0 %v4505_v60  ;;  %4538 = vmatpush1.bf16.msra.mxu1 %v4537_v62 }
 0x25f   :  { %v2219_v25 = vadd.f32 %v2218_v15, %v5812_v14  ;;  %v2380_v18 = vadd.f32 %v2379_v63, %v5812_v14 }
 0x260   :  { %v3230_v6 = vmax.f32 %v2217_v12, 0.0  ;;  %v3232_v47 = vmax.f32 %v2378_v13, 0.0 }
 0x261   :  { %v3231_v32 = vmax.f32 %v2219_v25, 0.0  ;;  %v3233_v56 = vmax.f32 %v2380_v18, 0.0  ;;  %v2222_v8 = vpop.f32.mrb[184].mxu0  ;;  %v2383_v36 = vpop.f32.mrb[184].mxu1 }
 0x262   :  { %v4509_v37 = vpack.c.bf16 %v3230_v6, %v3214_v19  ;;  %v4541_v21 = vpack.c.bf16 %v3232_v47, %v3216_v50  ;;  %v2224_v33 = vpop.f32.mrb[185].mxu0  ;;  %v2385_v40 = vpop.f32.mrb[185].mxu1  ;;  %v2223_v43 = vadd.f32 %v2222_v8, %v5824_v5  ;;  %v2384_v46 = vadd.f32 %v2383_v36, %v5824_v5 }
 0x263   :  { %v4507_v59 = vpack.c.bf16 %v3231_v32, %v3215_v29  ;;  %v4539_v42 = vpack.c.bf16 %v3233_v56, %v3217_v31  ;;  %v2225_v41 = vadd.f32 %v2224_v33, %v5824_v5  ;;  %v2386_v9 = vadd.f32 %v2385_v40, %v5824_v5 }
 0x264   :  { %v3246_v60 = vmax.f32 %v2223_v43, 0.0  ;;  %v3248_v62 = vmax.f32 %v2384_v46, 0.0 }
 0x265   :  { %v2228_v22 = vpop.f32.mrb[186].mxu0  ;;  %v2389_v49 = vpop.f32.mrb[186].mxu1  ;;  %4508 = vmatprep.subr.bf16.mxu0 %v4507_v59  ;;  %4540 = vmatprep.subr.bf16.mxu1 %v4539_v42  ;;  %v3247_v26 = vmax.f32 %v2225_v41, 0.0  ;;  %v3249_v0 = vmax.f32 %v2386_v9, 0.0 }
 0x266   :  { %v2229_v51 = vadd.f32 %v2228_v22, %v5826_v53  ;;  %v2390_v1 = vadd.f32 %v2389_v49, %v5826_v53  ;;  %v2230_v16 = vpop.f32.mrb[187].mxu0  ;;  %v2391_v54 = vpop.f32.mrb[187].mxu1  ;;  %4510 = vmatpush1.bf16.msra.mxu0 %v4509_v37  ;;  %4542 = vmatpush1.bf16.msra.mxu1 %v4541_v21 }
 0x267   :  { %v2231_v23 = vadd.f32 %v2230_v16, %v5826_v53  ;;  %v2392_v57 = vadd.f32 %v2391_v54, %v5826_v53 }
 0x268   :  { %v3262_v24 = vmax.f32 %v2229_v51, 0.0  ;;  %v3264_v48 = vmax.f32 %v2390_v1, 0.0 }
 0x269   :  { %v3263_v2 = vmax.f32 %v2231_v23, 0.0  ;;  %v3265_v4 = vmax.f32 %v2392_v57, 0.0  ;;  %v2234_v7 = vpop.f32.mrb[188].mxu0  ;;  %v2395_v10 = vpop.f32.mrb[188].mxu1 }
 0x26a   :  { %v4513_v11 = vpack.c.bf16 %v3262_v24, %v3246_v60  ;;  %v4545_v61 = vpack.c.bf16 %v3264_v48, %v3248_v62  ;;  %v2236_v12 = vpop.f32.mrb[189].mxu0  ;;  %v2397_v13 = vpop.f32.mrb[189].mxu1  ;;  %v2235_v25 = vadd.f32 %v2234_v7, %v5836_v34  ;;  %v2396_v18 = vadd.f32 %v2395_v10, %v5836_v34 }
 0x26b   :  { %v4511_v15 = vpack.c.bf16 %v3263_v2, %v3247_v26  ;;  %v4543_v63 = vpack.c.bf16 %v3265_v4, %v3249_v0  ;;  %v2237_v19 = vadd.f32 %v2236_v12, %v5836_v34  ;;  %v2398_v50 = vadd.f32 %v2397_v13, %v5836_v34 }
 0x26c   :  { %v3278_v37 = vmax.f32 %v2235_v25, 0.0  ;;  %v3280_v21 = vmax.f32 %v2396_v18, 0.0 }
 0x26d   :  { %v2240_v6 = vpop.f32.mrb[190].mxu0  ;;  %v2401_v47 = vpop.f32.mrb[190].mxu1  ;;  %4512 = vmatprep.subr.bf16.mxu0 %v4511_v15  ;;  %4544 = vmatprep.subr.bf16.mxu1 %v4543_v63  ;;  %v3279_v59 = vmax.f32 %v2237_v19, 0.0  ;;  %v3281_v42 = vmax.f32 %v2398_v50, 0.0 }
 0x26e   :  { %v2241_v29 = vadd.f32 %v2240_v6, %v5838_v38  ;;  %v2402_v31 = vadd.f32 %v2401_v47, %v5838_v38  ;;  %v2242_v32 = vpop.f32.mrb[191].mxu0  ;;  %v2403_v56 = vpop.f32.mrb[191].mxu1  ;;  %4514 = vmatpush1.bf16.msra.mxu0 %v4513_v11  ;;  %4546 = vmatpush1.bf16.msra.mxu1 %v4545_v61 }
 0x26f   :  { %v2243_v8 = vadd.f32 %v2242_v32, %v5838_v38  ;;  %v2404_v36 = vadd.f32 %v2403_v56, %v5838_v38 }
 0x270   :  { %v3294_v33 = vmax.f32 %v2241_v29, 0.0  ;;  %v3296_v40 = vmax.f32 %v2402_v31, 0.0 }
 0x271   :  { %v3295_v43 = vmax.f32 %v2243_v8, 0.0  ;;  %v3297_v46 = vmax.f32 %v2404_v36, 0.0  ;;  %v2472_v41 = vpop.f32.mrb[192].mxu0  ;;  %v2633_v9 = vpop.f32.mrb[192].mxu1 }
 0x272   :  { %v4517_v22 = vpack.c.bf16 %v3294_v33, %v3278_v37  ;;  %v4549_v49 = vpack.c.bf16 %v3296_v40, %v3280_v21  ;;  %v2474_v51 = vpop.f32.mrb[193].mxu0  ;;  %v2635_v1 = vpop.f32.mrb[193].mxu1  ;;  %v2473_v23 = vadd.f32 %v2472_v41, %v5704_v44  ;;  %v2634_v57 = vadd.f32 %v2633_v9, %v5704_v44 }
 0x273   :  { %v4515_v16 = vpack.c.bf16 %v3295_v43, %v3279_v59  ;;  %v4547_v54 = vpack.c.bf16 %v3297_v46, %v3281_v42  ;;  %v2475_v60 = vadd.f32 %v2474_v51, %v5704_v44  ;;  %v2636_v62 = vadd.f32 %v2635_v1, %v5704_v44 }
 0x274   :  { %v3058_v11 = vmax.f32 %v2473_v23, 0.0  ;;  %v3060_v61 = vmax.f32 %v2634_v57, 0.0 }
 0x275   :  { %v2478_v24 = vpop.f32.mrb[194].mxu0  ;;  %v2639_v48 = vpop.f32.mrb[194].mxu1  ;;  %4516 = vmatprep.subr.bf16.mxu0 %v4515_v16  ;;  %4548 = vmatprep.subr.bf16.mxu1 %v4547_v54  ;;  %v3059_v15 = vmax.f32 %v2475_v60, 0.0  ;;  %v3061_v63 = vmax.f32 %v2636_v62, 0.0 }
 0x276   :  { %v2479_v26 = vadd.f32 %v2478_v24, %v5712_v35  ;;  %v2640_v0 = vadd.f32 %v2639_v48, %v5712_v35  ;;  %v2480_v2 = vpop.f32.mrb[195].mxu0  ;;  %v2641_v4 = vpop.f32.mrb[195].mxu1  ;;  %4518 = vmatpush1.bf16.msra.mxu0 %v4517_v22  ;;  %4550 = vmatpush1.bf16.msra.mxu1 %v4549_v49 }
 0x277   :  { %v2481_v7 = vadd.f32 %v2480_v2, %v5712_v35  ;;  %v2642_v10 = vadd.f32 %v2641_v4, %v5712_v35 }
 0x278   :  { %v3074_v12 = vmax.f32 %v2479_v26, 0.0  ;;  %v3076_v13 = vmax.f32 %v2640_v0, 0.0 }
 0x279   :  { %v3075_v25 = vmax.f32 %v2481_v7, 0.0  ;;  %v3077_v18 = vmax.f32 %v2642_v10, 0.0  ;;  %v2484_v19 = vpop.f32.mrb[196].mxu0  ;;  %v2645_v50 = vpop.f32.mrb[196].mxu1  ;;  %3514 = vmatmul.mubr.f32.vlgmr.msra.gmra.mrb[2].mxu0 %v5855_v55  ;;  %3585 = vmatmul.mubr.f32.vlgmr.msra.gmra.mrb[2].mxu1 %v5855_v55 }
 0x27a   :  { %v4553_v6 = vpack.c.bf16 %v3074_v12, %v3058_v11  ;;  %v4585_v47 = vpack.c.bf16 %v3076_v13, %v3060_v61  ;;  %v2486_v29 = vpop.f32.mrb[197].mxu0  ;;  %v2647_v31 = vpop.f32.mrb[197].mxu1  ;;  %3655 = vmatprep.mubr.f32.mxu0 %v4733_v3  ;;  %3726 = vmatprep.mubr.f32.mxu1 %v4733_v3  ;;  %v2485_v8 = vadd.f32 %v2484_v19, %v5718_v27 }
 0x27b   :  { %v4551_v32 = vpack.c.bf16 %v3075_v25, %v3059_v15  ;;  %v4583_v56 = vpack.c.bf16 %v3077_v18, %v3061_v63  ;;  %v2646_v36 = vadd.f32 %v2645_v50, %v5718_v27  ;;  %v2487_v37 = vadd.f32 %v2486_v29, %v5718_v27 }
 0x27c   :  { %v2648_v21 = vadd.f32 %v2647_v31, %v5718_v27  ;;  %v3090_v9 = vmax.f32 %v2485_v8, 0.0 }
 0x27d   :  { %v2490_v33 = vpop.f32.mrb[198].mxu0  ;;  %v2651_v55 = vpop.f32.mrb[198].mxu1  ;;  %4552 = vmatprep.subr.bf16.mxu0 %v4551_v32  ;;  %4584 = vmatprep.subr.bf16.mxu1 %v4583_v56  ;;  %v3092_v22 = vmax.f32 %v2646_v36, 0.0  ;;  %v3091_v1 = vmax.f32 %v2487_v37, 0.0 }
 0x27e   :  { %v2491_v40 = vadd.f32 %v2490_v33, %v5732_v20  ;;  %v2652_v59 = vadd.f32 %v2651_v55, %v5732_v20  ;;  %v2492_v42 = vpop.f32.mrb[199].mxu0  ;;  %v2653_v43 = vpop.f32.mrb[199].mxu1  ;;  %4554 = vmatpush1.bf16.msra.mxu0 %v4553_v6  ;;  %4586 = vmatpush1.bf16.msra.mxu1 %v4585_v47  ;;  %v3093_v16 = vmax.f32 %v2648_v21, 0.0 }
 0x27f   :  { %v2493_v46 = vadd.f32 %v2492_v42, %v5732_v20  ;;  %v2654_v41 = vadd.f32 %v2653_v43, %v5732_v20 }
 0x280   :  { %v3106_v49 = vmax.f32 %v2491_v40, 0.0  ;;  %v3108_v51 = vmax.f32 %v2652_v59, 0.0 }
 0x281   :  { %v3107_v54 = vmax.f32 %v2493_v46, 0.0  ;;  %v3109_v23 = vmax.f32 %v2654_v41, 0.0  ;;  %v2496_v57 = vpop.f32.mrb[200].mxu0  ;;  %v2657_v60 = vpop.f32.mrb[200].mxu1 }
 0x282   :  { %v4557_v62 = vpack.c.bf16 %v3106_v49, %v3090_v9  ;;  %v4589_v24 = vpack.c.bf16 %v3108_v51, %v3092_v22  ;;  %v2498_v48 = vpop.f32.mrb[201].mxu0  ;;  %v2659_v26 = vpop.f32.mrb[201].mxu1  ;;  %v2497_v4 = vadd.f32 %v2496_v57, %v5748_v17  ;;  %v2658_v7 = vadd.f32 %v2657_v60, %v5748_v17 }
 0x283   :  { %v4555_v0 = vpack.c.bf16 %v3107_v54, %v3091_v1  ;;  %v4587_v2 = vpack.c.bf16 %v3109_v23, %v3093_v16  ;;  %v2499_v10 = vadd.f32 %v2498_v48, %v5748_v17  ;;  %v2660_v11 = vadd.f32 %v2659_v26, %v5748_v17 }
 0x284   :  { %v3122_v50 = vmax.f32 %v2497_v4, 0.0  ;;  %v3124_v6 = vmax.f32 %v2658_v7, 0.0 }
 0x285   :  { %v2502_v61 = vpop.f32.mrb[202].mxu0  ;;  %v2663_v12 = vpop.f32.mrb[202].mxu1  ;;  %4556 = vmatprep.subr.bf16.mxu0 %v4555_v0  ;;  %4588 = vmatprep.subr.bf16.mxu1 %v4587_v2  ;;  %v3123_v31 = vmax.f32 %v2499_v10, 0.0  ;;  %v3125_v32 = vmax.f32 %v2660_v11, 0.0 }
 0x286   :  { %v2503_v13 = vadd.f32 %v2502_v61, %v5752_v39  ;;  %v2664_v15 = vadd.f32 %v2663_v12, %v5752_v39  ;;  %v2504_v63 = vpop.f32.mrb[203].mxu0  ;;  %v2665_v25 = vpop.f32.mrb[203].mxu1  ;;  %4558 = vmatpush1.bf16.msra.mxu0 %v4557_v62  ;;  %4590 = vmatpush1.bf16.msra.mxu1 %v4589_v24 }
 0x287   :  { %v2505_v18 = vadd.f32 %v2504_v63, %v5752_v39  ;;  %v2666_v19 = vadd.f32 %v2665_v25, %v5752_v39 }
 0x288   :  { %v3138_v47 = vmax.f32 %v2503_v13, 0.0  ;;  %v3140_v29 = vmax.f32 %v2664_v15, 0.0 }
 0x289   :  { %v3139_v56 = vmax.f32 %v2505_v18, 0.0  ;;  %v3141_v8 = vmax.f32 %v2666_v19, 0.0  ;;  %v2508_v36 = vpop.f32.mrb[204].mxu0  ;;  %v2669_v37 = vpop.f32.mrb[204].mxu1 }
 0x28a   :  { %v4561_v21 = vpack.c.bf16 %v3138_v47, %v3122_v50  ;;  %v4593_v33 = vpack.c.bf16 %v3140_v29, %v3124_v6  ;;  %v2510_v55 = vpop.f32.mrb[205].mxu0  ;;  %v2671_v40 = vpop.f32.mrb[205].mxu1  ;;  %v2509_v43 = vadd.f32 %v2508_v36, %v5768_v52  ;;  %v2670_v46 = vadd.f32 %v2669_v37, %v5768_v52 }
 0x28b   :  { %v4559_v59 = vpack.c.bf16 %v3139_v56, %v3123_v31  ;;  %v4591_v42 = vpack.c.bf16 %v3141_v8, %v3125_v32  ;;  %v2511_v41 = vadd.f32 %v2510_v55, %v5768_v52  ;;  %v2672_v9 = vadd.f32 %v2671_v40, %v5768_v52 }
 0x28c   :  { %v3154_v60 = vmax.f32 %v2509_v43, 0.0  ;;  %v3156_v62 = vmax.f32 %v2670_v46, 0.0 }
 0x28d   :  { %v2514_v22 = vpop.f32.mrb[206].mxu0  ;;  %v2675_v49 = vpop.f32.mrb[206].mxu1  ;;  %4560 = vmatprep.subr.bf16.mxu0 %v4559_v59  ;;  %4592 = vmatprep.subr.bf16.mxu1 %v4591_v42  ;;  %v3155_v26 = vmax.f32 %v2511_v41, 0.0  ;;  %v3157_v0 = vmax.f32 %v2672_v9, 0.0 }
 0x28e   :  { %v2515_v51 = vadd.f32 %v2514_v22, %v5772_v45  ;;  %v2676_v1 = vadd.f32 %v2675_v49, %v5772_v45  ;;  %v2516_v16 = vpop.f32.mrb[207].mxu0  ;;  %v2677_v54 = vpop.f32.mrb[207].mxu1  ;;  %4562 = vmatpush1.bf16.msra.mxu0 %v4561_v21  ;;  %4594 = vmatpush1.bf16.msra.mxu1 %v4593_v33 }
 0x28f   :  { %v2517_v23 = vadd.f32 %v2516_v16, %v5772_v45  ;;  %v2678_v57 = vadd.f32 %v2677_v54, %v5772_v45 }
 0x290   :  { %v3170_v24 = vmax.f32 %v2515_v51, 0.0  ;;  %v3172_v48 = vmax.f32 %v2676_v1, 0.0 }
 0x291   :  { %v3171_v2 = vmax.f32 %v2517_v23, 0.0  ;;  %v3173_v4 = vmax.f32 %v2678_v57, 0.0  ;;  %v2520_v7 = vpop.f32.mrb[208].mxu0  ;;  %v2681_v10 = vpop.f32.mrb[208].mxu1 }
 0x292   :  { %v4565_v11 = vpack.c.bf16 %v3170_v24, %v3154_v60  ;;  %v4597_v61 = vpack.c.bf16 %v3172_v48, %v3156_v62  ;;  %v2522_v12 = vpop.f32.mrb[209].mxu0  ;;  %v2683_v13 = vpop.f32.mrb[209].mxu1  ;;  %v2521_v25 = vadd.f32 %v2520_v7, %v5788_v28  ;;  %v2682_v18 = vadd.f32 %v2681_v10, %v5788_v28 }
 0x293   :  { %v4563_v15 = vpack.c.bf16 %v3171_v2, %v3155_v26  ;;  %v4595_v63 = vpack.c.bf16 %v3173_v4, %v3157_v0  ;;  %v2523_v19 = vadd.f32 %v2522_v12, %v5788_v28  ;;  %v2684_v50 = vadd.f32 %v2683_v13, %v5788_v28 }
 0x294   :  { %v3186_v37 = vmax.f32 %v2521_v25, 0.0  ;;  %v3188_v21 = vmax.f32 %v2682_v18, 0.0 }
 0x295   :  { %v2526_v6 = vpop.f32.mrb[210].mxu0  ;;  %v2687_v47 = vpop.f32.mrb[210].mxu1  ;;  %4564 = vmatprep.subr.bf16.mxu0 %v4563_v15  ;;  %4596 = vmatprep.subr.bf16.mxu1 %v4595_v63  ;;  %v3187_v40 = vmax.f32 %v2523_v19, 0.0  ;;  %v3189_v59 = vmax.f32 %v2684_v50, 0.0 }
 0x296   :  { %v2527_v29 = vadd.f32 %v2526_v6, %v5792_v30  ;;  %v2688_v31 = vadd.f32 %v2687_v47, %v5792_v30  ;;  %v2528_v32 = vpop.f32.mrb[211].mxu0  ;;  %v2689_v56 = vpop.f32.mrb[211].mxu1  ;;  %4566 = vmatpush1.bf16.msra.mxu0 %v4565_v11  ;;  %4598 = vmatpush1.bf16.msra.mxu1 %v4597_v61 }
 0x297   :  { %v2529_v8 = vadd.f32 %v2528_v32, %v5792_v30  ;;  %v2690_v36 = vadd.f32 %v2689_v56, %v5792_v30 }
 0x298   :  { %v3202_v33 = vmax.f32 %v2527_v29, 0.0  ;;  %v3204_v55 = vmax.f32 %v2688_v31, 0.0 }
 0x299   :  { %v3203_v42 = vmax.f32 %v2529_v8, 0.0  ;;  %v3205_v43 = vmax.f32 %v2690_v36, 0.0  ;;  %v2532_v46 = vpop.f32.mrb[212].mxu0  ;;  %v2693_v41 = vpop.f32.mrb[212].mxu1 }
 0x29a   :  { %v4569_v9 = vpack.c.bf16 %v3202_v33, %v3186_v37  ;;  %v4601_v22 = vpack.c.bf16 %v3204_v55, %v3188_v21  ;;  %v2534_v49 = vpop.f32.mrb[213].mxu0  ;;  %v2695_v51 = vpop.f32.mrb[213].mxu1  ;;  %v2533_v54 = vadd.f32 %v2532_v46, %v5808_v58  ;;  %v2694_v23 = vadd.f32 %v2693_v41, %v5808_v58 }
 0x29b   :  { %v4567_v1 = vpack.c.bf16 %v3203_v42, %v3187_v40  ;;  %v4599_v16 = vpack.c.bf16 %v3205_v43, %v3189_v59  ;;  %v2535_v57 = vadd.f32 %v2534_v49, %v5808_v58  ;;  %v2696_v60 = vadd.f32 %v2695_v51, %v5808_v58 }
 0x29c   :  { %v3218_v10 = vmax.f32 %v2533_v54, 0.0  ;;  %v3220_v11 = vmax.f32 %v2694_v23, 0.0 }
 0x29d   :  { %v2538_v62 = vpop.f32.mrb[214].mxu0  ;;  %v2699_v24 = vpop.f32.mrb[214].mxu1  ;;  %4568 = vmatprep.subr.bf16.mxu0 %v4567_v1  ;;  %4600 = vmatprep.subr.bf16.mxu1 %v4599_v16  ;;  %v3219_v13 = vmax.f32 %v2535_v57, 0.0  ;;  %v3221_v15 = vmax.f32 %v2696_v60, 0.0 }
 0x29e   :  { %v2539_v48 = vadd.f32 %v2538_v62, %v5812_v14  ;;  %v2700_v26 = vadd.f32 %v2699_v24, %v5812_v14  ;;  %v2540_v0 = vpop.f32.mrb[215].mxu0  ;;  %v2701_v2 = vpop.f32.mrb[215].mxu1  ;;  %4570 = vmatpush1.bf16.msra.mxu0 %v4569_v9  ;;  %4602 = vmatpush1.bf16.msra.mxu1 %v4601_v22 }
 0x29f   :  { %v2541_v4 = vadd.f32 %v2540_v0, %v5812_v14  ;;  %v2702_v7 = vadd.f32 %v2701_v2, %v5812_v14 }
 0x2a0   :  { %v3234_v61 = vmax.f32 %v2539_v48, 0.0  ;;  %v3236_v12 = vmax.f32 %v2700_v26, 0.0 }
 0x2a1   :  { %v3235_v63 = vmax.f32 %v2541_v4, 0.0  ;;  %v3237_v25 = vmax.f32 %v2702_v7, 0.0  ;;  %v2544_v18 = vpop.f32.mrb[216].mxu0  ;;  %v2705_v19 = vpop.f32.mrb[216].mxu1 }
 0x2a2   :  { %v4573_v50 = vpack.c.bf16 %v3234_v61, %v3218_v10  ;;  %v4605_v6 = vpack.c.bf16 %v3236_v12, %v3220_v11  ;;  %v2546_v47 = vpop.f32.mrb[217].mxu0  ;;  %v2707_v29 = vpop.f32.mrb[217].mxu1  ;;  %v2545_v56 = vadd.f32 %v2544_v18, %v5824_v5  ;;  %v2706_v8 = vadd.f32 %v2705_v19, %v5824_v5 }
 0x2a3   :  { %v4571_v31 = vpack.c.bf16 %v3235_v63, %v3219_v13  ;;  %v4603_v32 = vpack.c.bf16 %v3237_v25, %v3221_v15  ;;  %v2547_v36 = vadd.f32 %v2546_v47, %v5824_v5  ;;  %v2708_v37 = vadd.f32 %v2707_v29, %v5824_v5 }
 0x2a4   :  { %v3250_v41 = vmax.f32 %v2545_v56, 0.0  ;;  %v3252_v9 = vmax.f32 %v2706_v8, 0.0 }
 0x2a5   :  { %v2550_v21 = vpop.f32.mrb[218].mxu0  ;;  %v2711_v33 = vpop.f32.mrb[218].mxu1  ;;  %4572 = vmatprep.subr.bf16.mxu0 %v4571_v31  ;;  %4604 = vmatprep.subr.bf16.mxu1 %v4603_v32  ;;  %v3251_v51 = vmax.f32 %v2547_v36, 0.0  ;;  %v3253_v1 = vmax.f32 %v2708_v37, 0.0 }
 0x2a6   :  { %v2551_v55 = vadd.f32 %v2550_v21, %v5826_v53  ;;  %v2712_v40 = vadd.f32 %v2711_v33, %v5826_v53  ;;  %v2552_v59 = vpop.f32.mrb[219].mxu0  ;;  %v2713_v42 = vpop.f32.mrb[219].mxu1  ;;  %4574 = vmatpush1.bf16.msra.mxu0 %v4573_v50  ;;  %4606 = vmatpush1.bf16.msra.mxu1 %v4605_v6 }
 0x2a7   :  { %v2553_v43 = vadd.f32 %v2552_v59, %v5826_v53  ;;  %v2714_v46 = vadd.f32 %v2713_v42, %v5826_v53 }
 0x2a8   :  { %v3266_v22 = vmax.f32 %v2551_v55, 0.0  ;;  %v3268_v49 = vmax.f32 %v2712_v40, 0.0 }
 0x2a9   :  { %v3267_v16 = vmax.f32 %v2553_v43, 0.0  ;;  %v3269_v54 = vmax.f32 %v2714_v46, 0.0  ;;  %v2556_v23 = vpop.f32.mrb[220].mxu0  ;;  %v2717_v57 = vpop.f32.mrb[220].mxu1 }
 0x2aa   :  { %v4577_v60 = vpack.c.bf16 %v3266_v22, %v3250_v41  ;;  %v4609_v62 = vpack.c.bf16 %v3268_v49, %v3252_v9  ;;  %v2558_v24 = vpop.f32.mrb[221].mxu0  ;;  %v2719_v48 = vpop.f32.mrb[221].mxu1  ;;  %v2557_v2 = vadd.f32 %v2556_v23, %v5836_v34  ;;  %v2718_v4 = vadd.f32 %v2717_v57, %v5836_v34 }
 0x2ab   :  { %v4575_v26 = vpack.c.bf16 %v3267_v16, %v3251_v51  ;;  %v4607_v0 = vpack.c.bf16 %v3269_v54, %v3253_v1  ;;  %v2559_v7 = vadd.f32 %v2558_v24, %v5836_v34  ;;  %v2720_v10 = vadd.f32 %v2719_v48, %v5836_v34 }
 0x2ac   :  { %v3282_v19 = vmax.f32 %v2557_v2, 0.0  ;;  %v3284_v50 = vmax.f32 %v2718_v4, 0.0 }
 0x2ad   :  { %v2562_v11 = vpop.f32.mrb[222].mxu0  ;;  %v2723_v61 = vpop.f32.mrb[222].mxu1  ;;  %4576 = vmatprep.subr.bf16.mxu0 %v4575_v26  ;;  %4608 = vmatprep.subr.bf16.mxu1 %v4607_v0  ;;  %v3283_v29 = vmax.f32 %v2559_v7, 0.0  ;;  %v3285_v31 = vmax.f32 %v2720_v10, 0.0  ;;  %v6000_v7 = vld [vmem:[%s6107_s4] sm:$0xff] }
 0x2ae   :  { %v2563_v12 = vadd.f32 %v2562_v11, %v5838_v38  ;;  %v2724_v13 = vadd.f32 %v2723_v61, %v5838_v38  ;;  %v2564_v15 = vpop.f32.mrb[223].mxu0  ;;  %v2725_v63 = vpop.f32.mrb[223].mxu1  ;;  %4578 = vmatpush1.bf16.msra.mxu0 %v4577_v60  ;;  %4610 = vmatpush1.bf16.msra.mxu1 %v4609_v62 }
 0x2af   :  { %v2565_v25 = vadd.f32 %v2564_v15, %v5838_v38  ;;  %v2726_v18 = vadd.f32 %v2725_v63, %v5838_v38 }
 0x2b0   :  { %v3298_v6 = vmax.f32 %v2563_v12, 0.0  ;;  %v3300_v47 = vmax.f32 %v2724_v13, 0.0 }
 0x2b1   :  { %v3299_v32 = vmax.f32 %v2565_v25, 0.0  ;;  %v3301_v56 = vmax.f32 %v2726_v18, 0.0  ;;  %v2794_v8 = vpop.f32.mrb[224].mxu0  ;;  %v2955_v36 = vpop.f32.mrb[224].mxu1 }
 0x2b2   :  { %v4581_v37 = vpack.c.bf16 %v3298_v6, %v3282_v19  ;;  %v4613_v21 = vpack.c.bf16 %v3300_v47, %v3284_v50  ;;  %v2796_v33 = vpop.f32.mrb[225].mxu0  ;;  %v2957_v55 = vpop.f32.mrb[225].mxu1  ;;  %v2795_v42 = vadd.f32 %v2794_v8, %v5704_v44  ;;  %v2956_v43 = vadd.f32 %v2955_v36, %v5704_v44 }
 0x2b3   :  { %v4579_v40 = vpack.c.bf16 %v3299_v32, %v3283_v29  ;;  %v4611_v59 = vpack.c.bf16 %v3301_v56, %v3285_v31  ;;  %v2797_v46 = vadd.f32 %v2796_v33, %v5704_v44  ;;  %v2958_v41 = vadd.f32 %v2957_v55, %v5704_v44 }
 0x2b4   :  { %v3062_v57 = vmax.f32 %v2795_v42, 0.0  ;;  %v3064_v60 = vmax.f32 %v2956_v43, 0.0 }
 0x2b5   :  { %v2800_v9 = vpop.f32.mrb[226].mxu0  ;;  %v2961_v22 = vpop.f32.mrb[226].mxu1  ;;  %4580 = vmatprep.subr.bf16.mxu0 %v4579_v40  ;;  %4612 = vmatprep.subr.bf16.mxu1 %v4611_v59  ;;  %v3063_v24 = vmax.f32 %v2797_v46, 0.0  ;;  %v3065_v48 = vmax.f32 %v2958_v41, 0.0 }
 0x2b6   :  { %v2801_v49 = vadd.f32 %v2800_v9, %v5712_v35  ;;  %v2962_v51 = vadd.f32 %v2961_v22, %v5712_v35  ;;  %v2802_v1 = vpop.f32.mrb[227].mxu0  ;;  %v2963_v16 = vpop.f32.mrb[227].mxu1  ;;  %4582 = vmatpush1.bf16.msra.mxu0 %v4581_v37  ;;  %4614 = vmatpush1.bf16.msra.mxu1 %v4613_v21 }
 0x2b7   :  { %v2803_v54 = vadd.f32 %v2802_v1, %v5712_v35  ;;  %v2964_v23 = vadd.f32 %v2963_v16, %v5712_v35 }
 0x2b8   :  { %v3078_v62 = vmax.f32 %v2801_v49, 0.0  ;;  %v3080_v44 = vmax.f32 %v2962_v51, 0.0 }
 0x2b9   :  { %v3079_v26 = vmax.f32 %v2803_v54, 0.0  ;;  %v3081_v0 = vmax.f32 %v2964_v23, 0.0  ;;  %v2806_v2 = vpop.f32.mrb[228].mxu0  ;;  %v2967_v4 = vpop.f32.mrb[228].mxu1  ;;  %3656 = vmatmul.mubr.f32.vlgmr.msra.gmra.mrb[4].mxu0 %v6000_v7  ;;  %3727 = vmatmul.mubr.f32.vlgmr.msra.gmra.mrb[4].mxu1 %v6000_v7 }
 0x2ba   :  { %v4617_v35 = vpack.c.bf16 %v3078_v62, %v3062_v57  ;;  %v4649_v10 = vpack.c.bf16 %v3080_v44, %v3064_v60  ;;  %v2808_v11 = vpop.f32.mrb[229].mxu0  ;;  %v2969_v61 = vpop.f32.mrb[229].mxu1  ;;  %3797 = vmatprep.mubr.f32.mxu0 %v4733_v3  ;;  %3868 = vmatprep.mubr.f32.mxu1 %v4733_v3  ;;  %v2807_v15 = vadd.f32 %v2806_v2, %v5718_v27 }
 0x2bb   :  { %v4615_v12 = vpack.c.bf16 %v3079_v26, %v3063_v24  ;;  %v4647_v13 = vpack.c.bf16 %v3081_v0, %v3065_v48  ;;  %v2968_v63 = vadd.f32 %v2967_v4, %v5718_v27  ;;  %v2809_v25 = vadd.f32 %v2808_v11, %v5718_v27 }
 0x2bc   :  { %v2970_v18 = vadd.f32 %v2969_v61, %v5718_v27  ;;  %v3094_v56 = vmax.f32 %v2807_v15, 0.0 }
 0x2bd   :  { %v2812_v19 = vpop.f32.mrb[230].mxu0  ;;  %v2973_v50 = vpop.f32.mrb[230].mxu1  ;;  %4616 = vmatprep.subr.bf16.mxu0 %v4615_v12  ;;  %4648 = vmatprep.subr.bf16.mxu1 %v4647_v13  ;;  %v3096_v8 = vmax.f32 %v2968_v63, 0.0  ;;  %v3095_v37 = vmax.f32 %v2809_v25, 0.0 }
 0x2be   :  { %v2813_v6 = vadd.f32 %v2812_v19, %v5732_v20  ;;  %v2974_v47 = vadd.f32 %v2973_v50, %v5732_v20  ;;  %v2814_v29 = vpop.f32.mrb[231].mxu0  ;;  %v2975_v31 = vpop.f32.mrb[231].mxu1  ;;  %4618 = vmatpush1.bf16.msra.mxu0 %v4617_v35  ;;  %4650 = vmatpush1.bf16.msra.mxu1 %v4649_v10  ;;  %v3097_v21 = vmax.f32 %v2970_v18, 0.0 }
 0x2bf   :  { %v2815_v3 = vadd.f32 %v2814_v29, %v5732_v20  ;;  %v2976_v32 = vadd.f32 %v2975_v31, %v5732_v20 }
 0x2c0   :  { %v3110_v36 = vmax.f32 %v2813_v6, 0.0  ;;  %v3112_v27 = vmax.f32 %v2974_v47, 0.0 }
 0x2c1   :  { %v3111_v33 = vmax.f32 %v2815_v3, 0.0  ;;  %v3113_v55 = vmax.f32 %v2976_v32, 0.0  ;;  %v2818_v40 = vpop.f32.mrb[232].mxu0  ;;  %v2979_v59 = vpop.f32.mrb[232].mxu1 }
 0x2c2   :  { %v4621_v42 = vpack.c.bf16 %v3110_v36, %v3094_v56  ;;  %v4653_v43 = vpack.c.bf16 %v3112_v27, %v3096_v8  ;;  %v2820_v46 = vpop.f32.mrb[233].mxu0  ;;  %v2981_v41 = vpop.f32.mrb[233].mxu1  ;;  %v2819_v49 = vadd.f32 %v2818_v40, %v5748_v17  ;;  %v2980_v20 = vadd.f32 %v2979_v59, %v5748_v17 }
 0x2c3   :  { %v4619_v9 = vpack.c.bf16 %v3111_v33, %v3095_v37  ;;  %v4651_v22 = vpack.c.bf16 %v3113_v55, %v3097_v21  ;;  %v2821_v51 = vadd.f32 %v2820_v46, %v5748_v17  ;;  %v2982_v1 = vadd.f32 %v2981_v41, %v5748_v17 }
 0x2c4   :  { %v3126_v48 = vmax.f32 %v2819_v49, 0.0  ;;  %v3128_v26 = vmax.f32 %v2980_v20, 0.0 }
 0x2c5   :  { %v2824_v16 = vpop.f32.mrb[234].mxu0  ;;  %v2985_v54 = vpop.f32.mrb[234].mxu1  ;;  %4620 = vmatprep.subr.bf16.mxu0 %v4619_v9  ;;  %4652 = vmatprep.subr.bf16.mxu1 %v4651_v22  ;;  %v3127_v2 = vmax.f32 %v2821_v51, 0.0  ;;  %v3129_v4 = vmax.f32 %v2982_v1, 0.0 }
 0x2c6   :  { %v2825_v23 = vadd.f32 %v2824_v16, %v5752_v39  ;;  %v2986_v57 = vadd.f32 %v2985_v54, %v5752_v39  ;;  %v2826_v60 = vpop.f32.mrb[235].mxu0  ;;  %v2987_v62 = vpop.f32.mrb[235].mxu1  ;;  %4622 = vmatpush1.bf16.msra.mxu0 %v4621_v42  ;;  %4654 = vmatpush1.bf16.msra.mxu1 %v4653_v43 }
 0x2c7   :  { %v2827_v44 = vadd.f32 %v2826_v60, %v5752_v39  ;;  %v2988_v24 = vadd.f32 %v2987_v62, %v5752_v39 }
 0x2c8   :  { %v3142_v0 = vmax.f32 %v2825_v23, 0.0  ;;  %v3144_v17 = vmax.f32 %v2986_v57, 0.0 }
 0x2c9   :  { %v3143_v35 = vmax.f32 %v2827_v44, 0.0  ;;  %v3145_v10 = vmax.f32 %v2988_v24, 0.0  ;;  %v2830_v11 = vpop.f32.mrb[236].mxu0  ;;  %v2991_v61 = vpop.f32.mrb[236].mxu1 }
 0x2ca   :  { %v4625_v12 = vpack.c.bf16 %v3142_v0, %v3126_v48  ;;  %v4657_v13 = vpack.c.bf16 %v3144_v17, %v3128_v26  ;;  %v2832_v15 = vpop.f32.mrb[237].mxu0  ;;  %v2993_v63 = vpop.f32.mrb[237].mxu1  ;;  %v2831_v19 = vadd.f32 %v2830_v11, %v5768_v52  ;;  %v2992_v39 = vadd.f32 %v2991_v61, %v5768_v52 }
 0x2cb   :  { %v4623_v25 = vpack.c.bf16 %v3143_v35, %v3127_v2  ;;  %v4655_v18 = vpack.c.bf16 %v3145_v10, %v3129_v4  ;;  %v2833_v50 = vadd.f32 %v2832_v15, %v5768_v52  ;;  %v2994_v6 = vadd.f32 %v2993_v63, %v5768_v52 }
 0x2cc   :  { %v3158_v27 = vmax.f32 %v2831_v19, 0.0  ;;  %v3160_v37 = vmax.f32 %v2992_v39, 0.0 }
 0x2cd   :  { %v2836_v47 = vpop.f32.mrb[238].mxu0  ;;  %v2997_v29 = vpop.f32.mrb[238].mxu1  ;;  %4624 = vmatprep.subr.bf16.mxu0 %v4623_v25  ;;  %4656 = vmatprep.subr.bf16.mxu1 %v4655_v18  ;;  %v3159_v33 = vmax.f32 %v2833_v50, 0.0  ;;  %v3161_v55 = vmax.f32 %v2994_v6, 0.0 }
 0x2ce   :  { %v2837_v31 = vadd.f32 %v2836_v47, %v5772_v45  ;;  %v2998_v3 = vadd.f32 %v2997_v29, %v5772_v45  ;;  %v2838_v32 = vpop.f32.mrb[239].mxu0  ;;  %v2999_v56 = vpop.f32.mrb[239].mxu1  ;;  %4626 = vmatpush1.bf16.msra.mxu0 %v4625_v12  ;;  %4658 = vmatpush1.bf16.msra.mxu1 %v4657_v13 }
 0x2cf   :  { %v2839_v8 = vadd.f32 %v2838_v32, %v5772_v45  ;;  %v3000_v36 = vadd.f32 %v2999_v56, %v5772_v45 }
 0x2d0   :  { %v3174_v21 = vmax.f32 %v2837_v31, 0.0  ;;  %v3176_v52 = vmax.f32 %v2998_v3, 0.0 }
 0x2d1   :  { %v3175_v40 = vmax.f32 %v2839_v8, 0.0  ;;  %v3177_v59 = vmax.f32 %v3000_v36, 0.0  ;;  %v2842_v42 = vpop.f32.mrb[240].mxu0  ;;  %v3003_v43 = vpop.f32.mrb[240].mxu1 }
 0x2d2   :  { %v4629_v46 = vpack.c.bf16 %v3174_v21, %v3158_v27  ;;  %v4661_v41 = vpack.c.bf16 %v3176_v52, %v3160_v37  ;;  %v2844_v9 = vpop.f32.mrb[241].mxu0  ;;  %v3005_v22 = vpop.f32.mrb[241].mxu1  ;;  %v2843_v51 = vadd.f32 %v2842_v42, %v5788_v28  ;;  %v3004_v45 = vadd.f32 %v3003_v43, %v5788_v28 }
 0x2d3   :  { %v4627_v49 = vpack.c.bf16 %v3175_v40, %v3159_v33  ;;  %v4659_v20 = vpack.c.bf16 %v3177_v59, %v3161_v55  ;;  %v2845_v1 = vadd.f32 %v2844_v9, %v5788_v28  ;;  %v3006_v16 = vadd.f32 %v3005_v22, %v5788_v28 }
 0x2d4   :  { %v3190_v26 = vmax.f32 %v2843_v51, 0.0  ;;  %v3192_v0 = vmax.f32 %v3004_v45, 0.0 }
 0x2d5   :  { %v2848_v54 = vpop.f32.mrb[242].mxu0  ;;  %v3009_v23 = vpop.f32.mrb[242].mxu1  ;;  %4628 = vmatprep.subr.bf16.mxu0 %v4627_v49  ;;  %4660 = vmatprep.subr.bf16.mxu1 %v4659_v20  ;;  %v3191_v2 = vmax.f32 %v2845_v1, 0.0  ;;  %v3193_v4 = vmax.f32 %v3006_v16, 0.0 }
 0x2d6   :  { %v2849_v57 = vadd.f32 %v2848_v54, %v5792_v30  ;;  %v3010_v60 = vadd.f32 %v3009_v23, %v5792_v30  ;;  %v2850_v62 = vpop.f32.mrb[243].mxu0  ;;  %v3011_v44 = vpop.f32.mrb[243].mxu1  ;;  %4630 = vmatpush1.bf16.msra.mxu0 %v4629_v46  ;;  %4662 = vmatpush1.bf16.msra.mxu1 %v4661_v41 }
 0x2d7   :  { %v2851_v24 = vadd.f32 %v2850_v62, %v5792_v30  ;;  %v3012_v48 = vadd.f32 %v3011_v44, %v5792_v30 }
 0x2d8   :  { %v3206_v17 = vmax.f32 %v2849_v57, 0.0  ;;  %v3208_v28 = vmax.f32 %v3010_v60, 0.0 }
 0x2d9   :  { %v3207_v35 = vmax.f32 %v2851_v24, 0.0  ;;  %v3209_v10 = vmax.f32 %v3012_v48, 0.0  ;;  %v2854_v11 = vpop.f32.mrb[244].mxu0  ;;  %v3015_v61 = vpop.f32.mrb[244].mxu1 }
 0x2da   :  { %v4633_v12 = vpack.c.bf16 %v3206_v17, %v3190_v26  ;;  %v4665_v13 = vpack.c.bf16 %v3208_v28, %v3192_v0  ;;  %v2856_v15 = vpop.f32.mrb[245].mxu0  ;;  %v3017_v63 = vpop.f32.mrb[245].mxu1  ;;  %v2855_v19 = vadd.f32 %v2854_v11, %v5808_v58  ;;  %v3016_v30 = vadd.f32 %v3015_v61, %v5808_v58 }
 0x2db   :  { %v4631_v25 = vpack.c.bf16 %v3207_v35, %v3191_v2  ;;  %v4663_v18 = vpack.c.bf16 %v3209_v10, %v3193_v4  ;;  %v2857_v39 = vadd.f32 %v2856_v15, %v5808_v58  ;;  %v3018_v50 = vadd.f32 %v3017_v63, %v5808_v58 }
 0x2dc   :  { %v3222_v36 = vmax.f32 %v2855_v19, 0.0  ;;  %v3224_v27 = vmax.f32 %v3016_v30, 0.0 }
 0x2dd   :  { %v2860_v6 = vpop.f32.mrb[246].mxu0  ;;  %v3021_v47 = vpop.f32.mrb[246].mxu1  ;;  %4632 = vmatprep.subr.bf16.mxu0 %v4631_v25  ;;  %4664 = vmatprep.subr.bf16.mxu1 %v4663_v18  ;;  %v3223_v21 = vmax.f32 %v2857_v39, 0.0  ;;  %v3225_v52 = vmax.f32 %v3018_v50, 0.0 }
 0x2de   :  { %v2861_v29 = vadd.f32 %v2860_v6, %v5812_v14  ;;  %v3022_v31 = vadd.f32 %v3021_v47, %v5812_v14  ;;  %v2862_v3 = vpop.f32.mrb[247].mxu0  ;;  %v3023_v32 = vpop.f32.mrb[247].mxu1  ;;  %4634 = vmatpush1.bf16.msra.mxu0 %v4633_v12  ;;  %4666 = vmatpush1.bf16.msra.mxu1 %v4665_v13 }
 0x2df   :  { %v2863_v56 = vadd.f32 %v2862_v3, %v5812_v14  ;;  %v3024_v8 = vadd.f32 %v3023_v32, %v5812_v14 }
 0x2e0   :  { %v3238_v37 = vmax.f32 %v2861_v29, 0.0  ;;  %v3240_v58 = vmax.f32 %v3022_v31, 0.0 }
 0x2e1   :  { %v3239_v33 = vmax.f32 %v2863_v56, 0.0  ;;  %v3241_v55 = vmax.f32 %v3024_v8, 0.0  ;;  %v2866_v40 = vpop.f32.mrb[248].mxu0  ;;  %v3027_v59 = vpop.f32.mrb[248].mxu1 }
 0x2e2   :  { %v4637_v42 = vpack.c.bf16 %v3238_v37, %v3222_v36  ;;  %v4669_v43 = vpack.c.bf16 %v3240_v58, %v3224_v27  ;;  %v2868_v46 = vpop.f32.mrb[249].mxu0  ;;  %v3029_v41 = vpop.f32.mrb[249].mxu1  ;;  %v2867_v49 = vadd.f32 %v2866_v40, %v5824_v5  ;;  %v3028_v14 = vadd.f32 %v3027_v59, %v5824_v5 }
 0x2e3   :  { %v4635_v9 = vpack.c.bf16 %v3239_v33, %v3223_v21  ;;  %v4667_v22 = vpack.c.bf16 %v3241_v55, %v3225_v52  ;;  %v2869_v20 = vadd.f32 %v2868_v46, %v5824_v5  ;;  %v3030_v51 = vadd.f32 %v3029_v41, %v5824_v5  ;;  %v3879_v40 = vpop.permute.xlu0 %3878 }
 0x2e4   :  { %v3254_v44 = vmax.f32 %v2867_v49, 0.0  ;;  %v3256_v24 = vmax.f32 %v3028_v14, 0.0 }
 0x2e5   :  { %v2872_v45 = vpop.f32.mrb[250].mxu0  ;;  %v3033_v1 = vpop.f32.mrb[250].mxu1  ;;  %4636 = vmatprep.subr.bf16.mxu0 %v4635_v9  ;;  %4668 = vmatprep.subr.bf16.mxu1 %v4667_v22  ;;  %v3255_v26 = vmax.f32 %v2869_v20, 0.0  ;;  %v3257_v0 = vmax.f32 %v3030_v51, 0.0 }
 0x2e6   :  { %v2873_v16 = vadd.f32 %v2872_v45, %v5826_v53  ;;  %v3034_v54 = vadd.f32 %v3033_v1, %v5826_v53  ;;  %v2874_v23 = vpop.f32.mrb[251].mxu0  ;;  %v3035_v57 = vpop.f32.mrb[251].mxu1  ;;  %4638 = vmatpush1.bf16.msra.mxu0 %v4637_v42  ;;  %4670 = vmatpush1.bf16.msra.mxu1 %v4669_v43 }
 0x2e7   :  { %v2875_v60 = vadd.f32 %v2874_v23, %v5826_v53  ;;  %v3036_v62 = vadd.f32 %v3035_v57, %v5826_v53 }
 0x2e8   :  { %v3270_v48 = vmax.f32 %v2873_v16, 0.0  ;;  %v3272_v5 = vmax.f32 %v3034_v54, 0.0 }
 0x2e9   :  { %v3271_v17 = vmax.f32 %v2875_v60, 0.0  ;;  %v3273_v28 = vmax.f32 %v3036_v62, 0.0  ;;  %v2878_v2 = vpop.f32.mrb[252].mxu0  ;;  %v3039_v4 = vpop.f32.mrb[252].mxu1 }
 0x2ea   :  { %v4641_v35 = vpack.c.bf16 %v3270_v48, %v3254_v44  ;;  %v4673_v10 = vpack.c.bf16 %v3272_v5, %v3256_v24  ;;  %v2880_v11 = vpop.f32.mrb[253].mxu0  ;;  %v3041_v61 = vpop.f32.mrb[253].mxu1  ;;  %v2879_v15 = vadd.f32 %v2878_v2, %v5836_v34  ;;  %v3040_v53 = vadd.f32 %v3039_v4, %v5836_v34 }
 0x2eb   :  { %v4639_v12 = vpack.c.bf16 %v3271_v17, %v3255_v26  ;;  %v4671_v13 = vpack.c.bf16 %v3273_v28, %v3257_v0  ;;  %v2881_v63 = vadd.f32 %v2880_v11, %v5836_v34  ;;  %v3042_v25 = vadd.f32 %v3041_v61, %v5836_v34 }
 0x2ec   :  { %v3286_v31 = vmax.f32 %v2879_v15, 0.0  ;;  %v3288_v3 = vmax.f32 %v3040_v53, 0.0 }
 0x2ed   :  { %v2884_v18 = vpop.f32.mrb[254].mxu0  ;;  %v3045_v19 = vpop.f32.mrb[254].mxu1  ;;  %4640 = vmatprep.subr.bf16.mxu0 %v4639_v12  ;;  %4672 = vmatprep.subr.bf16.mxu1 %v4671_v13  ;;  %v3287_v56 = vmax.f32 %v2881_v63, 0.0  ;;  %v3289_v8 = vmax.f32 %v3042_v25, 0.0 }
 0x2ee   :  { %v2885_v30 = vadd.f32 %v2884_v18, %v5838_v38  ;;  %v3046_v39 = vadd.f32 %v3045_v19, %v5838_v38  ;;  %v2886_v50 = vpop.f32.mrb[255].mxu0  ;;  %v3047_v6 = vpop.f32.mrb[255].mxu1  ;;  %4642 = vmatpush1.bf16.msra.mxu0 %v4641_v35  ;;  %4674 = vmatpush1.bf16.msra.mxu1 %v4673_v10 }
 0x2ef   :  { %v2887_v47 = vadd.f32 %v2886_v50, %v5838_v38  ;;  %v3048_v29 = vadd.f32 %v3047_v6, %v5838_v38  ;;  %v3881_v38 = vlaneseq }
 0x2f0   :  { %v3302_v32 = vmax.f32 %v2885_v30, 0.0  ;;  %v3304_v34 = vmax.f32 %v3046_v39, 0.0 }
 0x2f1   :  { %v3303_v36 = vmax.f32 %v2887_v47, 0.0  ;;  %v3305_v27 = vmax.f32 %v3048_v29, 0.0  ;;  %v3882_v33 = vshrl.u32 %v3881_v38, 7 }
 0x2f2   :  { %v4645_v37 = vpack.c.bf16 %v3302_v32, %v3286_v31  ;;  %v4677_v58 = vpack.c.bf16 %v3304_v34, %v3288_v3 }
 0x2f3   :  { %v4643_v21 = vpack.c.bf16 %v3303_v36, %v3287_v56  ;;  %v4675_v52 = vpack.c.bf16 %v3305_v27, %v3289_v8  ;;  %v3883_v55 = vsub.s32 0, %v3882_v33 }
 0x2f5   :  { %4644 = vmatprep.subr.bf16.mxu0 %v4643_v21  ;;  %4676 = vmatprep.subr.bf16.mxu1 %v4675_v52  ;;  %v6064_v59 = vrot.slane %v3879_v40, %v3883_v55 }
 0x2f6   :  { %4646 = vmatpush1.bf16.msra.mxu0 %v4645_v37  ;;  %4678 = vmatpush1.bf16.msra.mxu1 %v4677_v58 }
 0x2f9   :  { %3798 = vmatmul.mubr.f32.vlgmr.msra.gmra.mrb[6].mxu0 %v6000_v7  ;;  %3869 = vmatmul.mubr.f32.vlgmr.msra.gmra.mrb[6].mxu1 %v6000_v7  ;;  %v4735_v7 = vmov 1966171168  }
 0x2fa   :  { %v3938_v20 = vunpack.c.l.s4 %v4735_v7 }
 0x2fc   :  { %v3939_v51 = vunpack.c.0.s8 %v3938_v20 }
 0x2fe   :  { %v6070_v16 = vsub.s32 %v3939_v51, %v3882_v33 }
 0x30b   :  { %v3373_v42 = vpop.f32.mrb[0].mxu0  ;;  %v3444_v43 = vpop.f32.mrb[0].mxu1 }
 0x30c   :  { %v3885_v46 = vadd.f32 %v6064_v59, %v3373_v42  ;;  %v3887_v41 = vadd.f32 %v6064_v59, %v3444_v43  ;;  %v3375_v9 = vpop.f32.mrb[1].mxu0  ;;  %v3446_v22 = vpop.f32.mrb[1].mxu1 }
 0x30d   :  { %v3886_v49 = vadd.f32 %v6064_v59, %v3375_v9  ;;  %v3888_v14 = vadd.f32 %v6064_v59, %v3446_v22 }
 0x30e   :  { %4684 = vtanh.f32 %v3885_v46 }
 0x30f   :  { %4686 = vtanh.f32 %v3887_v41 }
 0x310   :  { %4688 = vtanh.f32 %v3886_v49 }
 0x311   :  { %4690 = vtanh.f32 %v3888_v14 }
 0x318   :  { %v4685_v45 = vpop.eup %4684 }
 0x319   :  { %v4687_v1 = vpop.eup %4686 }
 0x31a   :  { %v4689_v54 = vpop.eup %4688 }
 0x31b   :  { %v4691_v23 = vpop.eup %4690  ;;  %v3933_v57 = vcombine.low %v4685_v45, %v4689_v54 }
 0x31c   :  { %v3934_v60 = vcombine.low %v4687_v1, %v4691_v23 }
 0x31d   :  { %v3943_v62 = vrot.slane %v3933_v57, %v6070_v16 }
 0x31e   :  { %v3950_v44 = vrot.slane %v3934_v60, %v6070_v16 }
 0x320   :  { %v3965_v24 = vcombine.low %v3943_v62, %v3950_v44 }
 0x322   :  { %v3973_v25 = vrot.slane %v3965_v24, %v6070_v16 }
 0x34c   :  { %v3515_v48 = vpop.f32.mrb[2].mxu0  ;;  %v3586_v5 = vpop.f32.mrb[2].mxu1 }
 0x34d   :  { %v3889_v26 = vadd.f32 %v6064_v59, %v3515_v48  ;;  %v3891_v0 = vadd.f32 %v6064_v59, %v3586_v5  ;;  %v3517_v17 = vpop.f32.mrb[3].mxu0  ;;  %v3588_v28 = vpop.f32.mrb[3].mxu1 }
 0x34e   :  { %v3890_v2 = vadd.f32 %v6064_v59, %v3517_v17  ;;  %v3892_v4 = vadd.f32 %v6064_v59, %v3588_v28 }
 0x34f   :  { %4692 = vtanh.f32 %v3889_v26 }
 0x350   :  { %4694 = vtanh.f32 %v3891_v0 }
 0x351   :  { %4696 = vtanh.f32 %v3890_v2 }
 0x352   :  { %4698 = vtanh.f32 %v3892_v4 }
 0x359   :  { %v4693_v35 = vpop.eup %4692 }
 0x35a   :  { %v4695_v10 = vpop.eup %4694 }
 0x35b   :  { %v4697_v11 = vpop.eup %4696 }
 0x35c   :  { %v4699_v61 = vpop.eup %4698  ;;  %v3935_v12 = vcombine.low %v4693_v35, %v4697_v11 }
 0x35d   :  { %v3936_v13 = vcombine.low %v4695_v10, %v4699_v61 }
 0x35e   :  { %v3957_v15 = vrot.slane %v3935_v12, %v6070_v16 }
 0x35f   :  { %v3964_v53 = vrot.slane %v3936_v13, %v6070_v16 }
 0x361   :  { %v3966_v63 = vcombine.low %v3957_v15, %v3964_v53 }
 0x363   :  { %v3980_v18 = vrot.slane %v3966_v63, %v6070_v16 }
 0x365   :  { %v3981_v19 = vcombine.low %v3973_v25, %v3980_v18 }
 0x367   :  { %4033 = vst [vmem:[%s6108_s6] sm:$0xff] %v3981_v19 }
 0x38c   :  { %v3657_v30 = vpop.f32.mrb[4].mxu0  ;;  %v3728_v39 = vpop.f32.mrb[4].mxu1 }
 0x38d   :  { %v3893_v50 = vadd.f32 %v6064_v59, %v3657_v30  ;;  %v3895_v6 = vadd.f32 %v6064_v59, %v3728_v39  ;;  %v3659_v47 = vpop.f32.mrb[5].mxu0  ;;  %v3730_v29 = vpop.f32.mrb[5].mxu1 }
 0x38e   :  { %v3894_v31 = vadd.f32 %v6064_v59, %v3659_v47  ;;  %v3896_v3 = vadd.f32 %v6064_v59, %v3730_v29 }
 0x38f   :  { %4700 = vtanh.f32 %v3893_v50 }
 0x390   :  { %4702 = vtanh.f32 %v3895_v6 }
 0x391   :  { %4704 = vtanh.f32 %v3894_v31 }
 0x392   :  { %4706 = vtanh.f32 %v3896_v3 }
 0x399   :  { %v4701_v32 = vpop.eup %4700 }
 0x39a   :  { %v4703_v34 = vpop.eup %4702 }
 0x39b   :  { %v4705_v56 = vpop.eup %4704 }
 0x39c   :  { %v4707_v8 = vpop.eup %4706  ;;  %v3982_v36 = vcombine.low %v4701_v32, %v4705_v56 }
 0x39d   :  { %v3983_v27 = vcombine.low %v4703_v34, %v4707_v8 }
 0x39e   :  { %v3992_v37 = vrot.slane %v3982_v36, %v6070_v16 }
 0x39f   :  { %v3999_v58 = vrot.slane %v3983_v27, %v6070_v16 }
 0x3a1   :  { %v4014_v21 = vcombine.low %v3992_v37, %v3999_v58 }
 0x3a3   :  { %v4022_v1 = vrot.slane %v4014_v21, %v6070_v16 }
 0x3cc   :  { %v3799_v52 = vpop.f32.mrb[6].mxu0  ;;  %v3870_v38 = vpop.f32.mrb[6].mxu1 }
 0x3cd   :  { %v3897_v33 = vadd.f32 %v6064_v59, %v3799_v52  ;;  %v3899_v55 = vadd.f32 %v6064_v59, %v3870_v38  ;;  %v3801_v40 = vpop.f32.mrb[7].mxu0  ;;  %v3872_v42 = vpop.f32.mrb[7].mxu1 }
 0x3ce   :  { %v3898_v43 = vadd.f32 %v6064_v59, %v3801_v40  ;;  %v3900_v46 = vadd.f32 %v6064_v59, %v3872_v42 }
 0x3cf   :  { %4708 = vtanh.f32 %v3897_v33 }
 0x3d0   :  { %4710 = vtanh.f32 %v3899_v55 }
 0x3d1   :  { %4712 = vtanh.f32 %v3898_v43 }
 0x3d2   :  { %4714 = vtanh.f32 %v3900_v46 }
 0x3d9   :  { %v4709_v41 = vpop.eup %4708 }
 0x3da   :  { %v4711_v9 = vpop.eup %4710 }
 0x3db   :  { %v4713_v22 = vpop.eup %4712 }
 0x3dc   :  { %v4715_v49 = vpop.eup %4714  ;;  %v3984_v14 = vcombine.low %v4709_v41, %v4713_v22 }
 0x3dd   :  { %v3985_v7 = vcombine.low %v4711_v9, %v4715_v49 }
 0x3de   :  { %v4006_v20 = vrot.slane %v3984_v14, %v6070_v16 }
 0x3df   :  { %v4013_v51 = vrot.slane %v3985_v7, %v6070_v16 }
 0x3e1   :  { %v4015_v45 = vcombine.low %v4006_v20, %v4013_v51 }
 0x3e3   :  { %v4029_v54 = vrot.slane %v4015_v45, %v6070_v16 }
 0x3e5   :  { %v4030_v59 = vcombine.low %v4022_v1, %v4029_v54 }
 0x3e7   :  { %4034 = vst [vmem:[%s6108_s6 + $0x8] sm:$0xff] %v4030_v59 }

</bundles_post_ra>
